<compile_context>
chip_gen: v7x
topology: tpu7x:2x2x1
jax: 0.10.0
libtpu: 0.0.40
codegen_flags: <defaults>
</compile_context>

<pallas_src>
import functools

import jax
import jax.numpy as jnp
from jax.experimental import pallas as pl
from jax.experimental.pallas import tpu as pltpu

LN_EPS = 1e-5  # torch.nn.LayerNorm default


def _patch_expand_kernel(x_ref, w_ref, gb_ref, o_ref, *, c, mxu_dtype):
    """One (row-tile, p1) step: y = x @ W[p1]; two-pass LayerNorm; layout-preserving store."""
    two_c = 2 * c
    p1 = pl.program_id(1)

    x = x_ref[...]                                   # (tm, dim)
    if x.dtype != mxu_dtype:
        x = x.astype(mxu_dtype)
    w = w_ref[p1]                                    # (dim, 2c), resident in VMEM, already mxu dtype
    y = jnp.dot(x, w, preferred_element_type=jnp.float32)   # (tm, 2c) f32 accumulation

    gamma2 = gb_ref[0:1, :]                          # (1, 2c) f32, gamma tiled to both halves
    beta2 = gb_ref[1:2, :]                           # (1, 2c)

    # LayerNorm over each c-wide half (p2 = 0 / 1) WITHOUT lane slicing / concat:
    # full-width masked reductions + per-lane select keep everything in the VPU slot.
    lane = jax.lax.broadcasted_iota(jnp.int32, (1, two_c), 1)
    hi = lane >= c                                   # (1, 2c): True on the p2=1 half
    inv_c = 1.0 / c

    s_lo = jnp.sum(jnp.where(hi, 0.0, y), axis=-1, keepdims=True)
    s_hi = jnp.sum(jnp.where(hi, y, 0.0), axis=-1, keepdims=True)
    mean = jnp.where(hi, s_hi, s_lo) * inv_c         # (tm, 2c) per-lane mean
    yc = y - mean                                    # two-pass (centered) variance
    sq = yc * yc
    v_lo = jnp.sum(jnp.where(hi, 0.0, sq), axis=-1, keepdims=True)
    v_hi = jnp.sum(jnp.where(hi, sq, 0.0), axis=-1, keepdims=True)
    var = jnp.where(hi, v_hi, v_lo) * inv_c

    yn = yc * jax.lax.rsqrt(var + LN_EPS) * gamma2 + beta2       # (tm, 2c)
    # W (padded) is a multiple of 8, so this reshape is a pure sublane-aligned view.
    o_ref[...] = yn.reshape(o_ref.shape).astype(o_ref.dtype)


def _hw_config():
    """Per-generation tiling defaults: (target_rows, vmem_cap_bytes)."""
    kind = ""
    try:
        kind = jax.devices()[0].device_kind.lower()
    except Exception:
        pass
    if "v7" in kind or "7x" in kind:
        return 1536, 48 << 20       # v7x: 64 MiB VMEM / TensorCore -> keep double-buffering
    return 3072, 100 << 20          # v5e / v6e: 128 MiB VMEM


def patch_expand_forward(x, w_expand, gamma, beta, input_resolution,
                         mxu_dtype=jnp.bfloat16, target_rows=None, min_row_tiles=2):
    """
    x:        (B, H*W, dim)
    w_expand: (2*dim, dim)   nn.Linear(dim, 2*dim, bias=False).weight (PyTorch layout)
    gamma:    (dim//2,)      LayerNorm weight
    beta:     (dim//2,)      LayerNorm bias
    returns   (B, (2H)*(2W), dim//2)
    """
    # TODO(synk): dim_scale != 2 path (expand = nn.Identity) is not implemented here.
    H, W = input_resolution
    B, L, dim = x.shape
    assert L == H * W, "input feature has wrong size"
    assert dim % 2 == 0, "dim must be even for PatchExpand(dim_scale=2)"
    c = dim // 2
    two_c = 2 * c
    BH = B * H

    default_rows, vmem_cap = _hw_config()
    if target_rows is None:
        target_rows = default_rows

    # Pad W to a sublane multiple so the in-kernel (tm, 2c) -> (tbh, 1, W, 2c) reshape
    # is always a free, aligned view (no unrolled masked-store fallback).
    W_pad = ((W + 7) // 8) * 8

    in_bpe = jnp.dtype(x.dtype).itemsize
    out_bpe = in_bpe
    mxu_bpe = jnp.dtype(mxu_dtype).itemsize
    w_bytes = 2 * dim * two_c * mxu_bpe

    # Row tile: biggest tbh (rows of (b,h)) within target_rows and the VMEM budget,
    # while keeping grid[0] >= min_row_tiles so both v7x TensorCores get work.
    bytes_per_row = 2 * (dim * in_bpe + two_c * out_bpe) + 4 * two_c * 4  # dbl-buffered IO + f32 temps
    fixed_bytes = w_bytes + 2 * two_c * 4 + (4 << 20)                     # resident weight + gb + margin
    rows_by_vmem = max(W_pad, (vmem_cap - fixed_bytes) // bytes_per_row)
    tbh = max(1, min(BH, target_rows // max(W_pad, 1), rows_by_vmem // W_pad))
    if BH >= min_row_tiles:
        tbh = min(tbh, max(1, BH // min_row_tiles))
    n_tiles = -(-BH // tbh)                 # cdiv: awkward B*H values get a padded last tile
    BH_pad = n_tiles * tbh
    tm = tbh * W_pad

    vmem_bytes = int(min(vmem_cap, max(32 << 20, fixed_bytes + tm * bytes_per_row)))

    # Input rows padded with zeros (they normalize to beta and are sliced off below).
    x3 = x.reshape(BH, W, dim)
    if BH_pad != BH or W_pad != W:
        x3 = jnp.pad(x3, ((0, BH_pad - BH), (0, W_pad - W), (0, 0)))
    x2d = x3.reshape(BH_pad * W_pad, dim)

    # Transposed weight columns are ordered (p1, p2, c); split p1 out so slice p1 has
    # columns ordered (p2, c).  Cast once to the MXU dtype (weight is tiny).
    w_t = jnp.transpose(w_expand)                                            # (dim, 2*dim)
    w_split = jnp.transpose(w_t.reshape(dim, 2, two_c), (1, 0, 2)).astype(mxu_dtype)  # (2, dim, 2c)
    # gamma/beta pre-tiled to the full 2c lane width (single full-width affine in-kernel).
    gb = jnp.stack([jnp.tile(gamma, 2), jnp.tile(beta, 2)], axis=0).astype(jnp.float32)  # (2, 2c)

    kernel = functools.partial(_patch_expand_kernel, c=c, mxu_dtype=mxu_dtype)

    out4 = pl.pallas_call(
        kernel,
        out_shape=jax.ShapeDtypeStruct((BH_pad, 2, W_pad, two_c), x.dtype),
        grid_spec=pltpu.PrefetchScalarGridSpec(
            num_scalar_prefetch=0,
            grid=(n_tiles, 2),                                               # (row tiles, p1)
            in_specs=[
                pl.BlockSpec((tm, dim), lambda i, p1: (i, 0)),               # x reused across p1
                pl.BlockSpec((2, dim, two_c), lambda i, p1: (0, 0, 0)),      # weight VMEM-resident
                pl.BlockSpec((2, two_c), lambda i, p1: (0, 0)),              # gamma/beta (tiled)
            ],
            out_specs=pl.BlockSpec((tbh, 1, W_pad, two_c), lambda i, p1: (i, p1, 0, 0)),
        ),
        compiler_params=pltpu.CompilerParams(
            dimension_semantics=("parallel", "arbitrary"),
            vmem_limit_bytes=vmem_bytes,
        ),
    )(x2d, w_split, gb)

    if BH_pad != BH or W_pad != W:
        out4 = out4[:BH, :, :W, :]
    # (BH, 2, W, 2c) == (B, H, p1, W, p2, c): contiguous, transpose-free final reshape.
    return out4.reshape(B, (2 * H) * (2 * W), c)


def _reference_forward(x, w_expand, gamma, beta, input_resolution):
    """Pure-JAX reference matching the PyTorch module semantics."""
    H, W = input_resolution
    B, L, dim = x.shape
    c = dim // 2
    y = jnp.einsum("bld,od->blo", x, w_expand,
                   precision=jax.lax.Precision.HIGHEST)              # (B, L, 2*dim)
    y = y.reshape(B, H, W, 2, 2, c)
    y = jnp.transpose(y, (0, 1, 3, 2, 4, 5)).reshape(B, 4 * H * W, c)
    mean = jnp.mean(y, axis=-1, keepdims=True)
    var = jnp.mean((y - mean) ** 2, axis=-1, keepdims=True)
    return (y - mean) / jnp.sqrt(var + LN_EPS) * gamma + beta


if __name__ == "__main__":
    # Main shapes: batch=4, 16x16 resolution, dim=128 (2c = 128 -> lane-dense output).
    B, H, W, dim = 4, 16, 16, 128
    key = jax.random.PRNGKey(0)
    kx, kw, kg, kb = jax.random.split(key, 4)

    x = jax.random.normal(kx, (B, H * W, dim), dtype=jnp.float32)
    w_expand = jax.random.normal(kw, (2 * dim, dim), dtype=jnp.float32) * 0.05
    gamma = 1.0 + 0.1 * jax.random.normal(kg, (dim // 2,), dtype=jnp.float32)
    beta = 0.1 * jax.random.normal(kb, (dim // 2,), dtype=jnp.float32)

    ref = jax.block_until_ready(_reference_forward(x, w_expand, gamma, beta, (H, W)))

    # Exact path (f32 MXU operands): tight tolerance against the PyTorch-equivalent reference.
    out_f32 = jax.block_until_ready(
        patch_expand_forward(x, w_expand, gamma, beta, (H, W), mxu_dtype=jnp.float32))
    assert out_f32.shape == (B, (2 * H) * (2 * W), dim // 2)
    err = float(jnp.max(jnp.abs(out_f32 - ref)))
    assert jnp.allclose(out_f32, ref, atol=1e-3, rtol=1e-3), f"f32 path mismatch {err:.3e}"

    # Default fast path: bf16 MXU operands, f32 accumulation + f32 LayerNorm.
    out_bf = jax.block_until_ready(patch_expand_forward(x, w_expand, gamma, beta, (H, W)))
    errb = float(jnp.max(jnp.abs(out_bf - ref)))
    assert jnp.allclose(out_bf, ref, atol=5e-2, rtol=5e-2), f"bf16 path mismatch {errb:.3e}"

    # Padded path: W not a multiple of 8 and B*H not divisible by the row tile.
    B2, H2, W2, dim2 = 1, 5, 6, 64
    x2 = jax.random.normal(kx, (B2, H2 * W2, dim2), dtype=jnp.float32)
    w2 = jax.random.normal(kw, (2 * dim2, dim2), dtype=jnp.float32) * 0.05
    g2 = 1.0 + 0.1 * jax.random.normal(kg, (dim2 // 2,), dtype=jnp.float32)
    b2 = 0.1 * jax.random.normal(kb, (dim2 // 2,), dtype=jnp.float32)
    ref2 = jax.block_until_ready(_reference_forward(x2, w2, g2, b2, (H2, W2)))
    out2 = jax.block_until_ready(
        patch_expand_forward(x2, w2, g2, b2, (H2, W2), mxu_dtype=jnp.float32))
    err2 = float(jnp.max(jnp.abs(out2 - ref2)))
    assert out2.shape == (B2, (2 * H2) * (2 * W2), dim2 // 2)
    assert jnp.allclose(out2, ref2, atol=1e-3, rtol=1e-3), f"padded path mismatch {err2:.3e}"

    print("KERNEL_OK")
</pallas_src>

<mosaic_0001>
module attributes {stable_mosaic.version = 11 : i64} {
  func.func @_patch_expand_kernel(%arg0: i32, %arg1: i32, %arg2: memref<512x128xf32, #tpu.memory_space<vmem>>, %arg3: memref<2x128x128xf32, #tpu.memory_space<vmem>>, %arg4: memref<2x128xf32, #tpu.memory_space<vmem>>, %arg5: memref<32x1x16x128xf32, #tpu.memory_space<vmem>>) attributes {dimension_semantics = [#tpu.dimension_semantics<parallel>, #tpu.dimension_semantics<arbitrary>], iteration_bounds = array<i64: 2, 2>, scalar_prefetch = 0 : i64, scratch_operands = 0 : i64, tpu.core_type = #tpu.core_type<tc>, window_params = [{transform_indices = @transform_0, window_bounds = array<i64: 512, 128>}, {pipeline_mode = #tpu.pipeline_mode<synchronous>, transform_indices = @transform_1, window_bounds = array<i64: 2, 128, 128>}, {pipeline_mode = #tpu.pipeline_mode<synchronous>, transform_indices = @transform_2, window_bounds = array<i64: 2, 128>}, {transform_indices = @transform_3, window_bounds = array<i64: 32, 1, 16, 128>}]} {
    %c0 = arith.constant 0 : index
    %c0_0 = arith.constant 0 : index
    %0 = vector.load %arg2[%c0, %c0_0] : memref<512x128xf32, #tpu.memory_space<vmem>>, vector<512x128xf32>
    %1 = arith.index_cast %arg1 : i32 to index
    %c0_1 = arith.constant 0 : index
    %c0_2 = arith.constant 0 : index
    %2 = vector.load %arg3[%1, %c0_1, %c0_2] : memref<2x128x128xf32, #tpu.memory_space<vmem>>, vector<1x128x128xf32>
    %3 = vector.shape_cast %2 : vector<1x128x128xf32> to vector<128x128xf32>
    %cst = arith.constant dense<0.000000e+00> : vector<512x128xf32>
    %4 = tpu.matmul %0, %3, %cst {dimension_numbers = #tpu.dot_dimension_numbers<[1], [0], [0], [1], [0, 0, 1, 1], [], []>} : vector<512x128xf32>, vector<128x128xf32>, vector<512x128xf32> -> vector<512x128xf32>
    %c0_3 = arith.constant 0 : index
    %c0_4 = arith.constant 0 : index
    %5 = vector.load %arg4[%c0_3, %c0_4] : memref<2x128xf32, #tpu.memory_space<vmem>>, vector<1x128xf32>
    %c1 = arith.constant 1 : index
    %c0_5 = arith.constant 0 : index
    %6 = vector.load %arg4[%c1, %c0_5] : memref<2x128xf32, #tpu.memory_space<vmem>>, vector<1x128xf32>
    %7 = tpu.iota {dimensions = array<i32: 1>} : vector<1x128xi32>
    %c64_i32 = arith.constant 64 : i32
    %8 = vector.broadcast %c64_i32 : i32 to vector<1x128xi32>
    %9 = arith.cmpi sge, %7, %8 : vector<1x128xi32>
    %cst_6 = arith.constant 0.000000e+00 : f32
    %10 = vector.shape_cast %9 : vector<1x128xi1> to vector<1x128xi1>
    %11 = vector.broadcast %10 : vector<1x128xi1> to vector<512x128xi1>
    %12 = vector.broadcast %cst_6 : f32 to vector<512x128xf32>
    %13 = arith.select %11, %12, %4 : vector<512x128xi1>, vector<512x128xf32>
    %cst_7 = arith.constant dense<0.000000e+00> : vector<512xf32>
    %14 = vector.multi_reduction <add>, %13, %cst_7 [1] : vector<512x128xf32> to vector<512xf32>
    %15 = vector.shape_cast %14 : vector<512xf32> to vector<512x1xf32>
    %cst_8 = arith.constant 0.000000e+00 : f32
    %16 = vector.shape_cast %9 : vector<1x128xi1> to vector<1x128xi1>
    %17 = vector.broadcast %16 : vector<1x128xi1> to vector<512x128xi1>
    %18 = vector.broadcast %cst_8 : f32 to vector<512x128xf32>
    %19 = arith.select %17, %4, %18 : vector<512x128xi1>, vector<512x128xf32>
    %cst_9 = arith.constant dense<0.000000e+00> : vector<512xf32>
    %20 = vector.multi_reduction <add>, %19, %cst_9 [1] : vector<512x128xf32> to vector<512xf32>
    %21 = vector.shape_cast %20 : vector<512xf32> to vector<512x1xf32>
    %22 = vector.shape_cast %9 : vector<1x128xi1> to vector<1x128xi1>
    %23 = vector.broadcast %22 : vector<1x128xi1> to vector<512x128xi1>
    %24 = vector.shape_cast %21 : vector<512x1xf32> to vector<512x1xf32>
    %25 = vector.broadcast %24 : vector<512x1xf32> to vector<512x128xf32>
    %26 = vector.shape_cast %15 : vector<512x1xf32> to vector<512x1xf32>
    %27 = vector.broadcast %26 : vector<512x1xf32> to vector<512x128xf32>
    %28 = arith.select %23, %25, %27 : vector<512x128xi1>, vector<512x128xf32>
    %cst_10 = arith.constant 1.562500e-02 : f32
    %29 = vector.broadcast %cst_10 : f32 to vector<512x128xf32>
    %30 = arith.mulf %28, %29 : vector<512x128xf32>
    %31 = arith.subf %4, %30 : vector<512x128xf32>
    %32 = arith.mulf %31, %31 : vector<512x128xf32>
    %cst_11 = arith.constant 0.000000e+00 : f32
    %33 = vector.shape_cast %9 : vector<1x128xi1> to vector<1x128xi1>
    %34 = vector.broadcast %33 : vector<1x128xi1> to vector<512x128xi1>
    %35 = vector.broadcast %cst_11 : f32 to vector<512x128xf32>
    %36 = arith.select %34, %35, %32 : vector<512x128xi1>, vector<512x128xf32>
    %cst_12 = arith.constant dense<0.000000e+00> : vector<512xf32>
    %37 = vector.multi_reduction <add>, %36, %cst_12 [1] : vector<512x128xf32> to vector<512xf32>
    %38 = vector.shape_cast %37 : vector<512xf32> to vector<512x1xf32>
    %cst_13 = arith.constant 0.000000e+00 : f32
    %39 = vector.shape_cast %9 : vector<1x128xi1> to vector<1x128xi1>
    %40 = vector.broadcast %39 : vector<1x128xi1> to vector<512x128xi1>
    %41 = vector.broadcast %cst_13 : f32 to vector<512x128xf32>
    %42 = arith.select %40, %32, %41 : vector<512x128xi1>, vector<512x128xf32>
    %cst_14 = arith.constant dense<0.000000e+00> : vector<512xf32>
    %43 = vector.multi_reduction <add>, %42, %cst_14 [1] : vector<512x128xf32> to vector<512xf32>
    %44 = vector.shape_cast %43 : vector<512xf32> to vector<512x1xf32>
    %45 = vector.shape_cast %9 : vector<1x128xi1> to vector<1x128xi1>
    %46 = vector.broadcast %45 : vector<1x128xi1> to vector<512x128xi1>
    %47 = vector.shape_cast %44 : vector<512x1xf32> to vector<512x1xf32>
    %48 = vector.broadcast %47 : vector<512x1xf32> to vector<512x128xf32>
    %49 = vector.shape_cast %38 : vector<512x1xf32> to vector<512x1xf32>
    %50 = vector.broadcast %49 : vector<512x1xf32> to vector<512x128xf32>
    %51 = arith.select %46, %48, %50 : vector<512x128xi1>, vector<512x128xf32>
    %cst_15 = arith.constant 1.562500e-02 : f32
    %52 = vector.broadcast %cst_15 : f32 to vector<512x128xf32>
    %53 = arith.mulf %51, %52 : vector<512x128xf32>
    %cst_16 = arith.constant 9.99999974E-6 : f32
    %54 = vector.broadcast %cst_16 : f32 to vector<512x128xf32>
    %55 = arith.addf %53, %54 : vector<512x128xf32>
    %56 = math.rsqrt %55 : vector<512x128xf32>
    %57 = arith.mulf %31, %56 : vector<512x128xf32>
    %58 = vector.broadcast %5 : vector<1x128xf32> to vector<512x128xf32>
    %59 = arith.mulf %57, %58 : vector<512x128xf32>
    %60 = vector.broadcast %6 : vector<1x128xf32> to vector<512x128xf32>
    %61 = arith.addf %59, %60 : vector<512x128xf32>
    %62 = vector.shape_cast %61 : vector<512x128xf32> to vector<32x1x16x128xf32>
    %c0_17 = arith.constant 0 : index
    %c0_18 = arith.constant 0 : index
    %c0_19 = arith.constant 0 : index
    %c0_20 = arith.constant 0 : index
    %63 = vector.load %arg5[%c0_17, %c0_18, %c0_19, %c0_20] : memref<32x1x16x128xf32, #tpu.memory_space<vmem>>, vector<32x1x16x128xf32>
    tpu.vector_store %arg5[%c0_17, %c0_18, %c0_19, %c0_20], %62 {strides = array<i32>} : memref<32x1x16x128xf32, #tpu.memory_space<vmem>>, vector<32x1x16x128xf32>,
    return
  }
  func.func @transform_0(%arg0: i32, %arg1: i32) -> (i32, i32) {
    %c0_i32 = arith.constant 0 : i32
    %c0_i32_0 = arith.constant 0 : i32
    return %arg0, %c0_i32 : i32, i32
  }
  func.func @transform_1(%arg0: i32, %arg1: i32) -> (i32, i32, i32) {
    %c0_i32 = arith.constant 0 : i32
    %c0_i32_0 = arith.constant 0 : i32
    %c0_i32_1 = arith.constant 0 : i32
    %c0_i32_2 = arith.constant 0 : i32
    return %c0_i32, %c0_i32_0, %c0_i32_1 : i32, i32, i32
  }
  func.func @transform_2(%arg0: i32, %arg1: i32) -> (i32, i32) {
    %c0_i32 = arith.constant 0 : i32
    %c0_i32_0 = arith.constant 0 : i32
    %c0_i32_1 = arith.constant 0 : i32
    return %c0_i32, %c0_i32_0 : i32, i32
  }
  func.func @transform_3(%arg0: i32, %arg1: i32) -> (i32, i32, i32, i32) {
    %c0_i32 = arith.constant 0 : i32
    %c0_i32_0 = arith.constant 0 : i32
    %c0_i32_1 = arith.constant 0 : i32
    return %arg0, %arg1, %c0_i32, %c0_i32_0 : i32, i32, i32, i32
  }
}

</mosaic_0001>

<bundles_post_ra>
// kernel: tpu_custom_call.1
= control target key start
LH: loop header
LB: loop body
LE: loop exit
PB: predicated region body
PF: predicated region fallthrough
CT: control target
= control target key end

     0   :  { %s5238_s0 = inlined_call_operand.hbm [shape: f32[1024,128], index: 0, kind: input, shape index: {}]   ;;  %s5239_s1 = inlined_call_operand.hbm [shape: f32[2,128,128], index: 1, kind: input, shape index: {}]   ;;  %s5240_s2 = inlined_call_operand.vmem [shape: f32[2,128], index: 2, kind: input, shape index: {}]   ;;  %s5241_s3 = inlined_call_operand.hbm [shape: f32[64,2,16,128], index: 3, kind: output, shape index: {}]  }
   0x1   :  { %5325 = sst [smem:[#allocation70_spill]] %s5239_s1 }
   0x2   :  { %8 = vsyncpa [#allocation3], 0 }
   0x3   :  { %10 = vsyncpa [#allocation3 + $0x1], 0 }
   0x4   :  { %11 = vsyncpa [#allocation6], 0 }
   0x5   :  { %12 = vsyncpa [#allocation4], 0 }
   0x6   :  { %14 = vsyncpa [#allocation4 + $0x1], 0  ;;  %s3110_s12 = smov 0   ;;  %s3112_s13 = smov 0  }
   0x7   :  { %s3114_s14 = smov 0   ;;  %s3116_s15 = smov 0  }
   0x8   :  { %s3118_s16 = smov 0   ;;  %s3120_s17 = smov 0  }
   0x9   :  { %s3122_s18 = smov 0   ;;  %s3124_s19 = smov 0  }
   0xa   :  { %s3126_s20 = smov 0   ;;  %s3128_s21 = smov 0  }
   0xb   :  { %s3130_s22 = smov 0  }
   0xc LB: > { %5326 = sst [smem:[#allocation13_spill]] %s3037_s12  ;;  %s2383_s23 = sadd.s32 4294967295, %s3077_s22   ;;  %s3077_s22 = sphi %s3130_s22, %s20_s22   ;;  %s3073_s21 = sphi %s3128_s21, %s5501_s21   ;;  %s3069_s20 = sphi %s3126_s20, %s5492_s20   ;;  %s3065_s19 = sphi %s3124_s19, %s5500_s19   ;;  %s3061_s18 = sphi %s3122_s18, %s5491_s18   ;;  %s3057_s17 = sphi %s3120_s17, %s5499_s17   ;;  %s3053_s16 = sphi %s3118_s16, %s5498_s16   ;;  %s3049_s15 = sphi %s3116_s15, %s5497_s15   ;;  %s3045_s14 = sphi %s3114_s14, %s5496_s14   ;;  %s3041_s13 = sphi %s3112_s13, %s5495_s13   ;;  %s3037_s12 = sphi %s3110_s12, %s5494_s12  }
   0xd   : > { %5327 = sst [smem:[#allocation14_spill]] %s3069_s20  ;;  %s2384_s24 = sadd.s32 4294967294, %s3077_s22  }
   0xe   : > { %p52_p0 = scmp.ne.s32.totalorder %s3053_s16, %s3049_s15  ;;  %p3166_p1 = scmp.eq.s32.totalorder %s2383_s23, 0 }
   0xf   : > { %s109_s26 = sadd.s32 1, %s3045_s14  ;;  %p119_p2 = scmp.ne.s32.totalorder %s3045_s14, %s3041_s13 }
  0x10   : > { %s5328_s25 = scalar_select %p3166_p1, 1, 0 }
  0x11   : > { %p3175_p3 = por %p3166_p1, %p52_p0  ;;  %p120_p4 = scmp.eq.s32.totalorder %s2383_s23, 3 }
  0x12   : > { %p125_p5 = scmp.ne.s32.totalorder %s3041_s13, %s3037_s12  ;;  %p126_p6 = scmp.eq.s32.totalorder %s2384_s24, 3 }
  0x13   : > { %s5329_s27 = scalar_select %p3175_p3, 1, 0 }
  0x14   : > { %p3181_p7 = por %p120_p4, %p119_p2  ;;  %p2385_p8 = scmp.ge.s32.totalorder %s3077_s22, 1 }
  0x15   : > { %p3186_p9 = por %p126_p6, %p125_p5  ;;  %p133_p10 = scmp.lt.s32.totalorder %s3077_s22, 5 }
  0x16   : > { %s5330_s28 = scalar_select %p3181_p7, 1, 0 }
  0x17   : > { %s5331_s29 = scalar_select %p3186_p9, 1, 0 }
  0x18   : > { %p3191_p11 = pnand %p2385_p8, %p133_p10  ;;  %s3079_s4 = smov [#allocation5]  }
  0x19   : > { %5332 = sst [smem:[#allocation15_spill]] %s5331_s29  ;;  %s145_s5 = sshll.u32 %s3079_s4, 4  ;;  %s146_s5 = int_to_ptr.vmem [resolvable:$true] %s145_s5 }
  0x1a   : > { %s5333_s30 = scalar_select %p3191_p11, 1, 0 }
  0x1b   : > { %p2677_p12 = pneg %p3191_p11  ;;  %s5335_s1 = sld [smem:[#allocation70_spill]] }
  0x1d   : > { %p3199_p13 = pnand %p2677_p12, %p3166_p1 }
  0x1f   : > { %p2923_p2 = pneg %p3199_p13 }
  0x21   : > { %s2921_s9 = scalar_lea.hbm %s5335_s1, 4096 }
  0x22   : > { %p2922_p0 = scmp.ne.s32.totalorder %s5335_s1, %s2921_s9  ;;  %p2928_p6 = scmp.lt.u32.totalorder %s2921_s9, %s5335_s1 }
  0x24   : > { %p2924_p4 = pnand %p2923_p2, %p2922_p0 }
  0x26   : > { %p2925_p5 = pneg %p2924_p4 }
  0x28   : > { %p2930_p8 = pnand %p2928_p6, %p2925_p5 }
  0x2a   : > { %2933 = shalt.err (!%p2930_p8)
}
  0x2b   : > { %s2934_s24 = scalar_lea.vmem %s146_s5, 4096  ;;  %p2942_p7 = scmp.lt.s32.totalorder %s146_s5, %s146_s5 }
  0x2c   : > { %p2935_p10 = scmp.ne.s32.totalorder %s146_s5, %s2934_s24  ;;  %p2943_p1 = scmp.lt.s32.totalorder %s2934_s24, %s2934_s24 }
  0x2e   : > { %p2937_p12 = pnand %p2935_p10, %p2923_p2  ;;  %p2944_p3 = por %p2943_p1, %p2942_p7 }
  0x30   : > { %p2938_p9 = pneg %p2937_p12 }
  0x32   : > { %p2945_p11 = pnand %p2944_p3, %p2938_p9 }
  0x34   : > { %2948 = shalt.err (!%p2945_p11)
}
  0x35   : > { %s5247_s4 = smov 128   ;;  %s5248_s7 = smov 8  }
  0x36   : > { %2680 = dma.hbm_to_vmem [thread:$0]  (!%p3199_p13), %s5335_s1, 4096, %s146_s5, [#allocation6], %s5247_s4, %s5247_s4, %s5248_s7  }
  0x37   : > { %s29_s10 = sadd.s32 1, %s3069_s20  ;;  %s32_s11 = sadd.s32 1, %s3073_s21 }
  0x38   : > { %p30_p1 = scmp.ge.s32.totalorder %s29_s10, 2  ;;  %s39_s15 = sadd.s32 1, %s3057_s17 }
  0x39   : > { %p46_p3 = scmp.ne.s32.totalorder %s3057_s17, %s3053_s16  ;;  %p47_p7 = scmp.eq.s32.totalorder %s3077_s22, 0 }
  0x3a   : > { %s5503_s10 = smov (%p30_p1, %s29_s10), 0  ;;  %s5505_s11 = smov (!%p30_p1, %s32_s11), %s3073_s21 }
  0x3b   : > { %5336 = sst [smem:[#allocation16_spill]] %s5503_s10  ;;  %s105_s6 = ssub.s32 %s3069_s20, %s5503_s10 }
  0x3c   : > { %p34_p9 = scmp.ge.s32.totalorder %s5505_s11, 2  ;;  %p2690_p11 = scmp.lt.s32.totalorder %s3077_s22, 4 }
  0x3d   : > { %p3234_p13 = por %p47_p7, %p46_p3  ;;  %s162_s23 = sand.u32 1, %s3057_s17  }
  0x3e   : > { %s5507_s11 = smov (%p34_p9, %s5505_s11), 0  ;;  %s2388_s24 = sshll.u32 %s162_s23, 9 }
  0x3f   : > { %5338 = sst [smem:[#allocation17_spill]] %s5507_s11  ;;  %s36_s8 = ssub.s32 %s3073_s21, %s5507_s11 }
  0x40   : > { %p37_p0 = scmp.eq.s32.totalorder %s36_s8, 0  ;;  %s106_s9 = sor.u32 %s105_s6, %s36_s8 }
  0x41   : > { %p107_p2 = scmp.eq.s32.totalorder %s106_s9, 0  ;;  %s2405_s4 = sshll.u32 %s3073_s21, 13 }
  0x42   : > { %s3245_s7 = scalar_select %p37_p0, %s3057_s17, %s39_s15  }
  0x43   : > { %s3250_s1 = scalar_select %p107_p2, %s3045_s14, %s109_s26  }
  0x44   : > { %s3255_s29 = scalar_lea.hbm %s5238_s0, %s2405_s4  ;;  %s166_s12 = scalar_lea.vmem [#allocation2], %s2388_s24 }
  0x45   : > { %s173_s11 = sshll.u32 %s166_s12, 4  ;;  %p3263_p4 = pnand %p2690_p11, %p3234_p13  ;;  %s3257_s11 = int_to_ptr.vmem [resolvable:$true] %s173_s11 }
  0x46   : > { %s3267_s26 = scalar_lea.sflag [#allocation3], %s162_s23  ;;  %s2949_s20 = scalar_lea.hbm %s3255_s29, 8192 }
  0x47   : > { %p2950_p5 = scmp.ne.s32.totalorder %s3255_s29, %s2949_s20  ;;  %p2951_p6 = pneg %p3263_p4 }
  0x48   : > { %s2954_s10 = scalar_lea.hbm %s5238_s0, 16384  ;;  %p2955_p12 = scmp.lt.u32.totalorder %s3255_s29, %s5238_s0 }
  0x49   : > { %p2952_p8 = pnand %p2951_p6, %p2950_p5  ;;  %p2956_p1 = scmp.lt.u32.totalorder %s2954_s10, %s2949_s20 }
  0x4a   : > { %p2958_p7 = scmp.lt.u32.totalorder %s2949_s20, %s3255_s29 }
  0x4b   : > { %p2953_p10 = pneg %p2952_p8  ;;  %p2957_p3 = por %p2956_p1, %p2955_p12 }
  0x4d   : > { %p2959_p9 = por %p2958_p7, %p2957_p3 }
  0x4f   : > { %p2960_p11 = pnand %p2959_p9, %p2953_p10 }
  0x51   : > { %2963 = shalt.err (!%p2960_p11)
}
  0x52   : > { %s2964_s23 = scalar_lea.vmem %s3257_s11, 8192  ;;  %s3082_s24 = smov [#allocation2]  }
  0x53   : > { %p2965_p13 = scmp.ne.s32.totalorder %s3257_s11, %s2964_s23  ;;  %s2969_s8 = sshll.u32 %s3082_s24, 4  ;;  %s2970_s8 = int_to_ptr.vmem [resolvable:$false] %s2969_s8 }
  0x54   : > { %s2971_s9 = scalar_lea.vmem %s2970_s8, 16384  ;;  %p2972_p5 = scmp.lt.s32.totalorder %s3257_s11, %s2970_s8 }
  0x55   : > { %p2967_p0 = pnand %p2965_p13, %p2951_p6  ;;  %p2973_p8 = scmp.lt.s32.totalorder %s2971_s9, %s2964_s23 }
  0x57   : > { %p2968_p2 = pneg %p2967_p0  ;;  %p2974_p12 = por %p2973_p8, %p2972_p5 }
  0x59   : > { %p2975_p1 = pnand %p2974_p12, %p2968_p2 }
  0x5b   : > { %2978 = shalt.err (!%p2975_p1)
}
  0x5c   : > { %s5340_s20 = smov 8   ;;  %s5341_s12 = smov 128  }
  0x5d   : > { %2684 = dma.hbm_to_vmem [thread:$0]  (!%p3263_p4), %s3255_s29, 8192, %s3257_s11, %s3267_s26, %s5341_s12, %s5341_s12, %s5340_s20  }
  0x5e   : > { %p5342_p6 = scmp.ne.s32.totalorder %s5333_s30, 0 }
  0x60   : > { %185 = sbr.rel (%p5342_p6) target bundleno = 1047 (0x417), region = 32 }
  0x67   : > { %s187_s4 = sand.u32 1, %s3053_s16   ;;  %p5343_p10 = scmp.ne.s32.totalorder %s5329_s27, 0 }
  0x68   : > { %s2392_s10 = sshll.u32 %s187_s4, 9  ;;  %s188_s6 = scalar_lea.sflag [#allocation3], %s187_s4 }
  0x69   : > { %s3301_s5 = scalar_lea.vmem [#allocation2], %s2392_s10 }
  0x6a   : > { %3024 = dma.done.wait (%p5343_p10), %s188_s6, 8192  }
  0x6b   : > { %3026 = vsyncadd (%p5343_p10), %s188_s6, 4294959104  ;;  %p5344_p3 = scmp.ne.s32.totalorder %s5328_s25, 0 }
  0x6d   : > { %3028 = dma.done.wait (%p5344_p3), [#allocation6], 4096  }
  0x6e   : > { %3030 = vsyncadd (%p5344_p3), [#allocation6], 4294963200  ;;  %s2395_s29 = sshll.u32 %s3061_s18, 7  ;;  %v220_v9 = vld [vmem:[%s3301_s5] sm:$0xff]  ;;  %v221_v26 = vld [vmem:[%s3301_s5 + $0x8] sm:$0xff]  ;;  %s215_s25 = sand.u32 1, %s3041_s13  }
  0x6f   : > { %s3312_s30 = scalar_lea.vmem [#allocation5], %s2395_s29  ;;  %v252_v10 = vld [vmem:[%s3301_s5 + $0x100] sm:$0xff]  ;;  %2519 = vmatprep.mubr.f32.mxu0 %v220_v9  ;;  %v253_v27 = vld [vmem:[%s3301_s5 + $0x108] sm:$0xff]  ;;  %v222_v28 = vld [vmem:[%s3301_s5 + $0x10] sm:$0xff]  ;;  %s4563_s15 = sshll.u32 %s215_s25, 9 }
  0x70   : > { %v286_v0 = vld [vmem:[%s3312_s30] sm:$0xff]  ;;  %v287_v1 = vld [vmem:[%s3312_s30 + $0x8] sm:$0xff]  ;;  %v288_v2 = vld [vmem:[%s3312_s30 + $0x10] sm:$0xff]  ;;  %2567 = vmatprep.mubr.f32.mxu1 %v252_v10  ;;  %s4601_s24 = scalar_lea.vmem [#allocation7], %s4563_s15  ;;  %s2239_s4 = scalar_lea.sflag [#allocation4], %s215_s25 }
  0x71   : > { %v2615_v3 = vpack.c.bf16 %v287_v1, %v286_v0  ;;  %v289_v4 = vld [vmem:[%s3312_s30 + $0x18] sm:$0xff]  ;;  %v290_v6 = vld [vmem:[%s3312_s30 + $0x20] sm:$0xff]  ;;  %v291_v7 = vld [vmem:[%s3312_s30 + $0x28] sm:$0xff] }
  0x72   : > { %v2619_v5 = vpack.c.bf16 %v289_v4, %v288_v2  ;;  %v2623_v8 = vpack.c.bf16 %v291_v7, %v290_v6  ;;  %v292_v11 = vld [vmem:[%s3312_s30 + $0x30] sm:$0xff]  ;;  %v293_v12 = vld [vmem:[%s3312_s30 + $0x38] sm:$0xff]  ;;  %v294_v14 = vld [vmem:[%s3312_s30 + $0x40] sm:$0xff] }
  0x73   : > { %2616 = vmatprep.subr.bf16.mxu0 %v2615_v3  ;;  %2647 = vmatprep.subr.bf16.mxu1 %v2615_v3  ;;  %v2627_v13 = vpack.c.bf16 %v293_v12, %v292_v11  ;;  %v295_v15 = vld [vmem:[%s3312_s30 + $0x48] sm:$0xff]  ;;  %v296_v17 = vld [vmem:[%s3312_s30 + $0x50] sm:$0xff]  ;;  %v297_v18 = vld [vmem:[%s3312_s30 + $0x58] sm:$0xff] }
  0x74   : > { %2618 = vmatpush3.bf16.msra.mxu0 %v2615_v3  ;;  %2655 = vmatpush3.bf16.msra.mxu1 %v2615_v3  ;;  %v2631_v16 = vpack.c.bf16 %v295_v15, %v294_v14  ;;  %v2635_v19 = vpack.c.bf16 %v297_v18, %v296_v17  ;;  %v298_v20 = vld [vmem:[%s3312_s30 + $0x60] sm:$0xff]  ;;  %v299_v21 = vld [vmem:[%s3312_s30 + $0x68] sm:$0xff]  ;;  %v300_v23 = vld [vmem:[%s3312_s30 + $0x70] sm:$0xff] }
  0x75   : > { %2620 = vmatprep.subr.bf16.mxu0 %v2619_v5  ;;  %2648 = vmatprep.subr.bf16.mxu1 %v2619_v5  ;;  %v2639_v22 = vpack.c.bf16 %v299_v21, %v298_v20  ;;  %v301_v24 = vld [vmem:[%s3312_s30 + $0x78] sm:$0xff]  ;;  %v254_v29 = vld [vmem:[%s3301_s5 + $0x110] sm:$0xff]  ;;  %v224_v32 = vld [vmem:[%s3301_s5 + $0x20] sm:$0xff] }
  0x76   : > { %v2643_v25 = vpack.c.bf16 %v301_v24, %v300_v23  ;;  %v223_v30 = vld [vmem:[%s3301_s5 + $0x18] sm:$0xff]  ;;  %v256_v33 = vld [vmem:[%s3301_s5 + $0x120] sm:$0xff]  ;;  %v225_v34 = vld [vmem:[%s3301_s5 + $0x28] sm:$0xff]  ;;  %v689_v24 = vlaneseq }
  0x77   : > { %v255_v31 = vld [vmem:[%s3301_s5 + $0x118] sm:$0xff]  ;;  %v257_v35 = vld [vmem:[%s3301_s5 + $0x128] sm:$0xff]  ;;  %v226_v36 = vld [vmem:[%s3301_s5 + $0x30] sm:$0xff] }
  0x78   : > { %2622 = vmatpush3.bf16.msra.mxu0 %v2619_v5  ;;  %2656 = vmatpush3.bf16.msra.mxu1 %v2619_v5  ;;  %v258_v37 = vld [vmem:[%s3301_s5 + $0x130] sm:$0xff]  ;;  %v227_v38 = vld [vmem:[%s3301_s5 + $0x38] sm:$0xff]  ;;  %v228_v40 = vld [vmem:[%s3301_s5 + $0x40] sm:$0xff] }
  0x79   : > { %2624 = vmatprep.subr.bf16.mxu0 %v2623_v8  ;;  %2649 = vmatprep.subr.bf16.mxu1 %v2623_v8  ;;  %v259_v39 = vld [vmem:[%s3301_s5 + $0x138] sm:$0xff]  ;;  %v260_v41 = vld [vmem:[%s3301_s5 + $0x140] sm:$0xff]  ;;  %v229_v42 = vld [vmem:[%s3301_s5 + $0x48] sm:$0xff] }
  0x7a   : > { %v261_v43 = vld [vmem:[%s3301_s5 + $0x148] sm:$0xff]  ;;  %v230_v44 = vld [vmem:[%s3301_s5 + $0x50] sm:$0xff]  ;;  %v231_v46 = vld [vmem:[%s3301_s5 + $0x58] sm:$0xff] }
  0x7b   : > { %v262_v45 = vld [vmem:[%s3301_s5 + $0x150] sm:$0xff]  ;;  %v263_v47 = vld [vmem:[%s3301_s5 + $0x158] sm:$0xff]  ;;  %v232_v48 = vld [vmem:[%s3301_s5 + $0x60] sm:$0xff] }
  0x7c   : > { %2626 = vmatpush3.bf16.msra.mxu0 %v2623_v8  ;;  %2657 = vmatpush3.bf16.msra.mxu1 %v2623_v8  ;;  %v264_v49 = vld [vmem:[%s3301_s5 + $0x160] sm:$0xff]  ;;  %v233_v50 = vld [vmem:[%s3301_s5 + $0x68] sm:$0xff]  ;;  %v234_v52 = vld [vmem:[%s3301_s5 + $0x70] sm:$0xff] }
  0x7d   : > { %2628 = vmatprep.subr.bf16.mxu0 %v2627_v13  ;;  %2650 = vmatprep.subr.bf16.mxu1 %v2627_v13  ;;  %v265_v51 = vld [vmem:[%s3301_s5 + $0x168] sm:$0xff]  ;;  %v266_v53 = vld [vmem:[%s3301_s5 + $0x170] sm:$0xff]  ;;  %v235_v54 = vld [vmem:[%s3301_s5 + $0x78] sm:$0xff] }
  0x7e   : > { %v267_v55 = vld [vmem:[%s3301_s5 + $0x178] sm:$0xff]  ;;  %v236_v56 = vld [vmem:[%s3301_s5 + $0x80] sm:$0xff]  ;;  %v237_v58 = vld [vmem:[%s3301_s5 + $0x88] sm:$0xff] }
  0x7f   : > { %v268_v57 = vld [vmem:[%s3301_s5 + $0x180] sm:$0xff]  ;;  %v269_v59 = vld [vmem:[%s3301_s5 + $0x188] sm:$0xff]  ;;  %v238_v60 = vld [vmem:[%s3301_s5 + $0x90] sm:$0xff] }
  0x80   : > { %2630 = vmatpush3.bf16.msra.mxu0 %v2627_v13  ;;  %2658 = vmatpush3.bf16.msra.mxu1 %v2627_v13  ;;  %v270_v61 = vld [vmem:[%s3301_s5 + $0x190] sm:$0xff]  ;;  %v239_v62 = vld [vmem:[%s3301_s5 + $0x98] sm:$0xff]  ;;  %v240_v0 = vld [vmem:[%s3301_s5 + $0xa0] sm:$0xff] }
  0x81   : > { %2632 = vmatprep.subr.bf16.mxu0 %v2631_v16  ;;  %2651 = vmatprep.subr.bf16.mxu1 %v2631_v16  ;;  %v271_v63 = vld [vmem:[%s3301_s5 + $0x198] sm:$0xff]  ;;  %v272_v1 = vld [vmem:[%s3301_s5 + $0x1a0] sm:$0xff]  ;;  %v241_v2 = vld [vmem:[%s3301_s5 + $0xa8] sm:$0xff] }
  0x82   : > { %v273_v3 = vld [vmem:[%s3301_s5 + $0x1a8] sm:$0xff]  ;;  %v242_v4 = vld [vmem:[%s3301_s5 + $0xb0] sm:$0xff]  ;;  %v243_v6 = vld [vmem:[%s3301_s5 + $0xb8] sm:$0xff] }
  0x83   : > { %v274_v5 = vld [vmem:[%s3301_s5 + $0x1b0] sm:$0xff]  ;;  %v275_v7 = vld [vmem:[%s3301_s5 + $0x1b8] sm:$0xff]  ;;  %v244_v8 = vld [vmem:[%s3301_s5 + $0xc0] sm:$0xff] }
  0x84   : > { %2634 = vmatpush3.bf16.msra.mxu0 %v2631_v16  ;;  %2659 = vmatpush3.bf16.msra.mxu1 %v2631_v16  ;;  %v276_v9 = vld [vmem:[%s3301_s5 + $0x1c0] sm:$0xff]  ;;  %v245_v10 = vld [vmem:[%s3301_s5 + $0xc8] sm:$0xff]  ;;  %v246_v12 = vld [vmem:[%s3301_s5 + $0xd0] sm:$0xff] }
  0x85   : > { %2636 = vmatprep.subr.bf16.mxu0 %v2635_v19  ;;  %2652 = vmatprep.subr.bf16.mxu1 %v2635_v19  ;;  %v277_v11 = vld [vmem:[%s3301_s5 + $0x1c8] sm:$0xff]  ;;  %v278_v13 = vld [vmem:[%s3301_s5 + $0x1d0] sm:$0xff]  ;;  %v247_v14 = vld [vmem:[%s3301_s5 + $0xd8] sm:$0xff] }
  0x86   : > { %v279_v15 = vld [vmem:[%s3301_s5 + $0x1d8] sm:$0xff]  ;;  %v248_v16 = vld [vmem:[%s3301_s5 + $0xe0] sm:$0xff]  ;;  %v249_v17 = vld [vmem:[%s3301_s5 + $0xe8] sm:$0xff] }
  0x87   : > { %v280_v18 = vld [vmem:[%s3301_s5 + $0x1e0] sm:$0xff]  ;;  %v250_v20 = vld [vmem:[%s3301_s5 + $0xf0] sm:$0xff]  ;;  %v251_v21 = vld [vmem:[%s3301_s5 + $0xf8] sm:$0xff] }
  0x88   : > { %2638 = vmatpush3.bf16.msra.mxu0 %v2635_v19  ;;  %2660 = vmatpush3.bf16.msra.mxu1 %v2635_v19  ;;  %v281_v19 = vld [vmem:[%s3301_s5 + $0x1e8] sm:$0xff]  ;;  %v283_v23 = vld [vmem:[%s3301_s5 + $0x1f8] sm:$0xff] }
  0x89   : > { %2640 = vmatprep.subr.bf16.mxu0 %v2639_v22  ;;  %2653 = vmatprep.subr.bf16.mxu1 %v2639_v22 }
  0x8c   : > { %2642 = vmatpush3.bf16.msra.mxu0 %v2639_v22  ;;  %2661 = vmatpush3.bf16.msra.mxu1 %v2639_v22  ;;  %v282_v22 = vld [vmem:[%s3301_s5 + $0x1f0] sm:$0xff] }
  0x8d   : > { %2644 = vmatprep.subr.bf16.mxu0 %v2643_v25  ;;  %2654 = vmatprep.subr.bf16.mxu1 %v2643_v25 }
  0x90   : > { %2646 = vmatpush3.bf16.msra.mxu0 %v2643_v25  ;;  %2662 = vmatpush3.bf16.msra.mxu1 %v2643_v25  ;;  %v3394_v25 = vand.u32 127, %v689_v24 }
  0x92   : > { %vm691_vm0 = vcmp.ge.s32.totalorder %v3394_v25, 64 }
  0x93   : > { %2520 = vmatmul.mubr.f32.vlgmr.msra.gmra.mrb[0].mxu0 %v221_v26  ;;  %2568 = vmatmul.mubr.f32.vlgmr.msra.gmra.mrb[0].mxu1 %v253_v27 }
  0x94   : > { %2522 = vmatprep.mubr.f32.mxu0 %v222_v28  ;;  %2570 = vmatprep.mubr.f32.mxu1 %v254_v29 }
  0x97   : > { %2523 = vmatmul.mubr.f32.gmra.mrb[2].mxu0 %v223_v30  ;;  %2571 = vmatmul.mubr.f32.gmra.mrb[2].mxu1 %v255_v31 }
  0x98   : > { %2525 = vmatprep.mubr.f32.mxu0 %v224_v32  ;;  %2573 = vmatprep.mubr.f32.mxu1 %v256_v33 }
  0x9b   : > { %2526 = vmatmul.mubr.f32.gmra.mrb[4].mxu0 %v225_v34  ;;  %2574 = vmatmul.mubr.f32.gmra.mrb[4].mxu1 %v257_v35 }
  0x9c   : > { %2528 = vmatprep.mubr.f32.mxu0 %v226_v36  ;;  %2576 = vmatprep.mubr.f32.mxu1 %v258_v37 }
  0x9f   : > { %2529 = vmatmul.mubr.f32.gmra.mrb[6].mxu0 %v227_v38  ;;  %2577 = vmatmul.mubr.f32.gmra.mrb[6].mxu1 %v259_v39 }
  0xa0   : > { %2531 = vmatprep.mubr.f32.mxu0 %v228_v40  ;;  %2579 = vmatprep.mubr.f32.mxu1 %v260_v41 }
  0xa3   : > { %2532 = vmatmul.mubr.f32.gmra.mrb[8].mxu0 %v229_v42  ;;  %2580 = vmatmul.mubr.f32.gmra.mrb[8].mxu1 %v261_v43 }
  0xa4   : > { %2534 = vmatprep.mubr.f32.mxu0 %v230_v44  ;;  %2582 = vmatprep.mubr.f32.mxu1 %v262_v45 }
  0xa7   : > { %2535 = vmatmul.mubr.f32.gmra.mrb[10].mxu0 %v231_v46  ;;  %2583 = vmatmul.mubr.f32.gmra.mrb[10].mxu1 %v263_v47 }
  0xa8   : > { %2537 = vmatprep.mubr.f32.mxu0 %v232_v48  ;;  %2585 = vmatprep.mubr.f32.mxu1 %v264_v49 }
  0xab   : > { %2538 = vmatmul.mubr.f32.gmra.mrb[12].mxu0 %v233_v50  ;;  %2586 = vmatmul.mubr.f32.gmra.mrb[12].mxu1 %v265_v51 }
  0xac   : > { %2540 = vmatprep.mubr.f32.mxu0 %v234_v52  ;;  %2588 = vmatprep.mubr.f32.mxu1 %v266_v53 }
  0xaf   : > { %2541 = vmatmul.mubr.f32.gmra.mrb[14].mxu0 %v235_v54  ;;  %2589 = vmatmul.mubr.f32.gmra.mrb[14].mxu1 %v267_v55 }
  0xb0   : > { %2543 = vmatprep.mubr.f32.mxu0 %v236_v56  ;;  %2591 = vmatprep.mubr.f32.mxu1 %v268_v57 }
  0xb3   : > { %2544 = vmatmul.mubr.f32.gmra.mrb[16].mxu0 %v237_v58  ;;  %2592 = vmatmul.mubr.f32.gmra.mrb[16].mxu1 %v269_v59 }
  0xb4   : > { %2546 = vmatprep.mubr.f32.mxu0 %v238_v60  ;;  %2594 = vmatprep.mubr.f32.mxu1 %v270_v61 }
  0xb7   : > { %2547 = vmatmul.mubr.f32.gmra.mrb[18].mxu0 %v239_v62  ;;  %2595 = vmatmul.mubr.f32.gmra.mrb[18].mxu1 %v271_v63 }
  0xb8   : > { %2549 = vmatprep.mubr.f32.mxu0 %v240_v0  ;;  %2597 = vmatprep.mubr.f32.mxu1 %v272_v1 }
  0xbb   : > { %2550 = vmatmul.mubr.f32.gmra.mrb[20].mxu0 %v241_v2  ;;  %2598 = vmatmul.mubr.f32.gmra.mrb[20].mxu1 %v273_v3 }
  0xbc   : > { %2552 = vmatprep.mubr.f32.mxu0 %v242_v4  ;;  %2600 = vmatprep.mubr.f32.mxu1 %v274_v5 }
  0xbf   : > { %2553 = vmatmul.mubr.f32.gmra.mrb[22].mxu0 %v243_v6  ;;  %2601 = vmatmul.mubr.f32.gmra.mrb[22].mxu1 %v275_v7 }
  0xc0   : > { %2555 = vmatprep.mubr.f32.mxu0 %v244_v8  ;;  %2603 = vmatprep.mubr.f32.mxu1 %v276_v9 }
  0xc3   : > { %2556 = vmatmul.mubr.f32.gmra.mrb[24].mxu0 %v245_v10  ;;  %2604 = vmatmul.mubr.f32.gmra.mrb[24].mxu1 %v277_v11 }
  0xc4   : > { %2558 = vmatprep.mubr.f32.mxu0 %v246_v12  ;;  %2606 = vmatprep.mubr.f32.mxu1 %v278_v13 }
  0xc7   : > { %2559 = vmatmul.mubr.f32.gmra.mrb[26].mxu0 %v247_v14  ;;  %2607 = vmatmul.mubr.f32.gmra.mrb[26].mxu1 %v279_v15 }
  0xc8   : > { %2561 = vmatprep.mubr.f32.mxu0 %v248_v16  ;;  %2609 = vmatprep.mubr.f32.mxu1 %v280_v18 }
  0xcb   : > { %2562 = vmatmul.mubr.f32.gmra.mrb[28].mxu0 %v249_v17  ;;  %2610 = vmatmul.mubr.f32.gmra.mrb[28].mxu1 %v281_v19 }
  0xcc   : > { %2564 = vmatprep.mubr.f32.mxu0 %v250_v20  ;;  %2612 = vmatprep.mubr.f32.mxu1 %v282_v22 }
  0xcf   : > { %2565 = vmatmul.mubr.f32.gmra.mrb[30].mxu0 %v251_v21  ;;  %2613 = vmatmul.mubr.f32.gmra.mrb[30].mxu1 %v283_v23 }
 0x166   : > { %v3397_v26 = vpop.f32.mrb[0].mxu0  ;;  %v3399_v27 = vpop.f32.mrb[0].mxu1 }
 0x167   : > { %v3401_v28 = vpop.f32.mrb[1].mxu0  ;;  %v3403_v29 = vpop.f32.mrb[1].mxu1  ;;  %v727_v30 = vsel %vm691_vm0, 0.0, %v3399_v27  ;;  %v695_v31 = vsel %vm691_vm0, 0.0, %v3397_v26  ;;  %v887_v34 = vsel %vm691_vm0, %v3397_v26, 0.0  ;;  %v919_v40 = vsel %vm691_vm0, %v3399_v27, 0.0 }
 0x168   : > { %824 = vadd.xlane.f32.xlu1 %v727_v30  ;;  %760 = vadd.xlane.f32.xlu0 %v695_v31  ;;  %v694_v35 = vsel %vm691_vm0, 0.0, %v3401_v28  ;;  %v726_v41 = vsel %vm691_vm0, 0.0, %v3403_v29  ;;  %v886_v47 = vsel %vm691_vm0, %v3401_v28, 0.0  ;;  %v918_v53 = vsel %vm691_vm0, %v3403_v29, 0.0 }
 0x16a   : > { %v3411_v32 = vpop.f32.mrb[2].mxu0  ;;  %v3413_v33 = vpop.f32.mrb[2].mxu1 }
 0x16b   : > { %v3421_v36 = vpop.f32.mrb[3].mxu0  ;;  %v3423_v37 = vpop.f32.mrb[3].mxu1  ;;  %v697_v44 = vsel %vm691_vm0, 0.0, %v3411_v32  ;;  %v729_v50 = vsel %vm691_vm0, 0.0, %v3413_v33  ;;  %v889_v59 = vsel %vm691_vm0, %v3411_v32, 0.0  ;;  %v921_v0 = vsel %vm691_vm0, %v3413_v33, 0.0 }
 0x16c   : > { %952 = vadd.xlane.f32.xlu1 %v887_v34  ;;  %758 = vadd.xlane.f32.xlu0 %v694_v35  ;;  %v728_v58 = vsel %vm691_vm0, 0.0, %v3423_v37  ;;  %v888_v1 = vsel %vm691_vm0, %v3421_v36, 0.0  ;;  %v920_v6 = vsel %vm691_vm0, %v3423_v37, 0.0  ;;  %v696_v7 = vsel %vm691_vm0, 0.0, %v3421_v36 }
 0x16e   : > { %v3425_v38 = vpop.f32.mrb[4].mxu0  ;;  %v3427_v39 = vpop.f32.mrb[4].mxu1 }
 0x16f   : > { %v3435_v42 = vpop.f32.mrb[5].mxu0  ;;  %v3437_v43 = vpop.f32.mrb[5].mxu1  ;;  %v699_v10 = vsel %vm691_vm0, 0.0, %v3425_v38  ;;  %v731_v16 = vsel %vm691_vm0, 0.0, %v3427_v39  ;;  %v891_v24 = vsel %vm691_vm0, %v3425_v38, 0.0  ;;  %v923_v35 = vsel %vm691_vm0, %v3427_v39, 0.0 }
 0x170   : > { %1016 = vadd.xlane.f32.xlu1 %v919_v40  ;;  %822 = vadd.xlane.f32.xlu0 %v726_v41  ;;  %v698_v11 = vsel %vm691_vm0, 0.0, %v3435_v42  ;;  %v730_v17 = vsel %vm691_vm0, 0.0, %v3437_v43  ;;  %v890_v30 = vsel %vm691_vm0, %v3435_v42, 0.0  ;;  %v922_v40 = vsel %vm691_vm0, %v3437_v43, 0.0 }
 0x172   : > { %v3442_v45 = vpop.f32.mrb[6].mxu0  ;;  %v3444_v46 = vpop.f32.mrb[6].mxu1 }
 0x173   : > { %v3449_v48 = vpop.f32.mrb[7].mxu0  ;;  %v3451_v49 = vpop.f32.mrb[7].mxu1 }
 0x174   : > { %950 = vadd.xlane.f32.xlu0 %v886_v47  ;;  %764 = vadd.xlane.f32.xlu1 %v697_v44  ;;  %v701_v44 = vsel %vm691_vm0, 0.0, %v3442_v45  ;;  %v700_v47 = vsel %vm691_vm0, 0.0, %v3449_v48 }
 0x176   : > { %v3456_v51 = vpop.f32.mrb[8].mxu0  ;;  %v3458_v52 = vpop.f32.mrb[8].mxu1 }
 0x177   : > { %v3463_v54 = vpop.f32.mrb[9].mxu0  ;;  %v3465_v55 = vpop.f32.mrb[9].mxu1 }
 0x178   : > { %1014 = vadd.xlane.f32.xlu0 %v918_v53  ;;  %828 = vadd.xlane.f32.xlu1 %v729_v50 }
 0x17a   : > { %v3467_v56 = vpop.f32.mrb[10].mxu0  ;;  %v3469_v57 = vpop.f32.mrb[10].mxu1 }
 0x17b   : > { %5345 = vst [vmem:[#allocation18_spill] sm:$0xff] %v3469_v57  ;;  %v3477_v60 = vpop.f32.mrb[11].mxu0  ;;  %v3479_v61 = vpop.f32.mrb[11].mxu1 }
 0x17c   : > { %5346 = vst [vmem:[#allocation19_spill] sm:$0xff] %v3477_v60  ;;  %5347 = vst [vmem:[#allocation20_spill] sm:$0xff] %v3479_v61  ;;  %826 = vadd.xlane.f32.xlu0 %v728_v58  ;;  %956 = vadd.xlane.f32.xlu1 %v889_v59  ;;  %v733_v59 = vsel %vm691_vm0, 0.0, %v3444_v46 }
 0x17e   : > { %v3481_v62 = vpop.f32.mrb[12].mxu0  ;;  %v3483_v63 = vpop.f32.mrb[12].mxu1 }
 0x17f   : > { %5348 = vst [vmem:[#allocation21_spill] sm:$0xff] %v3481_v62  ;;  %5349 = vst [vmem:[#allocation22_spill] sm:$0xff] %v3483_v63  ;;  %v3491_v2 = vpop.f32.mrb[13].mxu0  ;;  %v3493_v3 = vpop.f32.mrb[13].mxu1 }
 0x180   : > { %5350 = vst [vmem:[#allocation23_spill] sm:$0xff] %v3491_v2  ;;  %5351 = vst [vmem:[#allocation24_spill] sm:$0xff] %v3493_v3  ;;  %1020 = vadd.xlane.f32.xlu1 %v921_v0  ;;  %954 = vadd.xlane.f32.xlu0 %v888_v1  ;;  %v732_v0 = vsel %vm691_vm0, 0.0, %v3451_v49  ;;  %v893_v1 = vsel %vm691_vm0, %v3442_v45, 0.0 }
 0x182   : > { %v3495_v4 = vpop.f32.mrb[14].mxu0  ;;  %v3497_v5 = vpop.f32.mrb[14].mxu1 }
 0x183   : > { %5352 = vst [vmem:[#allocation25_spill] sm:$0xff] %v3495_v4  ;;  %5353 = vst [vmem:[#allocation26_spill] sm:$0xff] %v3497_v5  ;;  %v3505_v8 = vpop.f32.mrb[15].mxu0  ;;  %v3507_v9 = vpop.f32.mrb[15].mxu1 }
 0x184   : > { %5354 = vst [vmem:[#allocation27_spill] sm:$0xff] %v3505_v8  ;;  %5355 = vst [vmem:[#allocation28_spill] sm:$0xff] %v3507_v9  ;;  %1018 = vadd.xlane.f32.xlu0 %v920_v6  ;;  %762 = vadd.xlane.f32.xlu1 %v696_v7  ;;  %v892_v6 = vsel %vm691_vm0, %v3449_v48, 0.0  ;;  %v925_v7 = vsel %vm691_vm0, %v3444_v46, 0.0 }
 0x186   : > { %v3515_v12 = vpop.f32.mrb[16].mxu0  ;;  %v3517_v13 = vpop.f32.mrb[16].mxu1 }
 0x187   : > { %5356 = vst [vmem:[#allocation29_spill] sm:$0xff] %v3515_v12  ;;  %5357 = vst [vmem:[#allocation30_spill] sm:$0xff] %v3517_v13  ;;  %v3519_v14 = vpop.f32.mrb[17].mxu0  ;;  %v3521_v15 = vpop.f32.mrb[17].mxu1 }
 0x188   : > { %5358 = vst [vmem:[#allocation31_spill] sm:$0xff] %v3519_v14  ;;  %5359 = vst [vmem:[#allocation32_spill] sm:$0xff] %v3521_v15  ;;  %768 = vadd.xlane.f32.xlu1 %v699_v10  ;;  %766 = vadd.xlane.f32.xlu0 %v698_v11  ;;  %v924_v10 = vsel %vm691_vm0, %v3451_v49, 0.0 }
 0x18a   : > { %v3529_v18 = vpop.f32.mrb[18].mxu0  ;;  %v3531_v19 = vpop.f32.mrb[18].mxu1 }
 0x18b   : > { %v3533_v20 = vpop.f32.mrb[19].mxu0  ;;  %v3535_v21 = vpop.f32.mrb[19].mxu1 }
 0x18c   : > { %832 = vadd.xlane.f32.xlu1 %v731_v16  ;;  %830 = vadd.xlane.f32.xlu0 %v730_v17  ;;  %v703_v16 = vsel %vm691_vm0, 0.0, %v3456_v51  ;;  %v702_v17 = vsel %vm691_vm0, 0.0, %v3463_v54 }
 0x18e   : > { %v3537_v22 = vpop.f32.mrb[20].mxu0  ;;  %v3539_v23 = vpop.f32.mrb[20].mxu1 }
 0x18f   : > { %v3547_v31 = vpop.f32.mrb[21].mxu0  ;;  %v3549_v34 = vpop.f32.mrb[21].mxu1 }
 0x190   : > { %960 = vadd.xlane.f32.xlu1 %v891_v24  ;;  %958 = vadd.xlane.f32.xlu0 %v890_v30 }
 0x192   : > { %v3557_v41 = vpop.f32.mrb[22].mxu0  ;;  %v3567_v53 = vpop.f32.mrb[22].mxu1 }
 0x193   : > { %v3565_v50 = vpop.f32.mrb[23].mxu0  ;;  %v3569_v58 = vpop.f32.mrb[23].mxu1 }
 0x194   : > { %1024 = vadd.xlane.f32.xlu1 %v923_v35  ;;  %1022 = vadd.xlane.f32.xlu0 %v922_v40  ;;  %v735_v40 = vsel %vm691_vm0, 0.0, %v3458_v52 }
 0x196   : > { %v3589_v11 = vpop.f32.mrb[24].mxu0  ;;  %v3599_v30 = vpop.f32.mrb[24].mxu1 }
 0x197   : > { %v3597_v24 = vpop.f32.mrb[25].mxu0  ;;  %v3601_v35 = vpop.f32.mrb[25].mxu1 }
 0x198   : > { %772 = vadd.xlane.f32.xlu1 %v701_v44  ;;  %770 = vadd.xlane.f32.xlu0 %v700_v47  ;;  %v734_v44 = vsel %vm691_vm0, 0.0, %v3465_v55  ;;  %v895_v47 = vsel %vm691_vm0, %v3456_v51, 0.0 }
 0x19c   : > { %836 = vadd.xlane.f32.xlu1 %v733_v59  ;;  %834 = vadd.xlane.f32.xlu0 %v732_v0  ;;  %v894_v59 = vsel %vm691_vm0, %v3463_v54, 0.0  ;;  %v927_v0 = vsel %vm691_vm0, %v3458_v52, 0.0 }
 0x1a0   : > { %964 = vadd.xlane.f32.xlu1 %v893_v1  ;;  %962 = vadd.xlane.f32.xlu0 %v892_v6  ;;  %v926_v1 = vsel %vm691_vm0, %v3465_v55, 0.0  ;;  %v3621_v6 = vpop.f32.mrb[26].mxu0 }
 0x1a4   : > { %1028 = vadd.xlane.f32.xlu1 %v925_v7  ;;  %1026 = vadd.xlane.f32.xlu0 %v924_v10  ;;  %v705_v7 = vsel %vm691_vm0, 0.0, %v3467_v56  ;;  %v704_v10 = vsel %vm691_vm0, 0.0, %v3477_v60 }
 0x1a8   : > { %776 = vadd.xlane.f32.xlu1 %v703_v16  ;;  %774 = vadd.xlane.f32.xlu0 %v702_v17  ;;  %v3629_v16 = vpop.f32.mrb[27].mxu0  ;;  %v3631_v17 = vpop.f32.mrb[26].mxu1 }
 0x1ac   : > { %840 = vadd.xlane.f32.xlu1 %v735_v40  ;;  %838 = vadd.xlane.f32.xlu0 %v734_v44  ;;  %v3633_v40 = vpop.f32.mrb[27].mxu1  ;;  %v737_v44 = vsel %vm691_vm0, 0.0, %v3469_v57 }
 0x1ad   : > { %5360 = vst [vmem:[#allocation33_spill] sm:$0xff] %v3633_v40 }
 0x1b0   : > { %968 = vadd.xlane.f32.xlu1 %v895_v47  ;;  %966 = vadd.xlane.f32.xlu0 %v894_v59  ;;  %v736_v47 = vsel %vm691_vm0, 0.0, %v3479_v61  ;;  %v897_v59 = vsel %vm691_vm0, %v3467_v56, 0.0 }
 0x1b4   : > { %1032 = vadd.xlane.f32.xlu1 %v927_v0  ;;  %1030 = vadd.xlane.f32.xlu0 %v926_v1  ;;  %v896_v0 = vsel %vm691_vm0, %v3477_v60, 0.0  ;;  %v929_v1 = vsel %vm691_vm0, %v3469_v57, 0.0  ;;  %v899_v57 = vsel %vm691_vm0, %v3481_v62, 0.0  ;;  %v930_v60 = vsel %vm691_vm0, %v3493_v3, 0.0 }
 0x1b8   : > { %780 = vadd.xlane.f32.xlu1 %v705_v7  ;;  %778 = vadd.xlane.f32.xlu0 %v704_v10  ;;  %v928_v7 = vsel %vm691_vm0, %v3479_v61, 0.0  ;;  %v3653_v10 = vpop.f32.mrb[28].mxu0 }
 0x1b9   : > { %5361 = vst [vmem:[#allocation34_spill] sm:$0xff] %v3653_v10 }
 0x1bc   : > { %844 = vadd.xlane.f32.xlu1 %v737_v44  ;;  %842 = vadd.xlane.f32.xlu0 %v736_v47  ;;  %v707_v44 = vsel %vm691_vm0, 0.0, %v3481_v62  ;;  %v706_v47 = vsel %vm691_vm0, 0.0, %v3491_v2  ;;  %v932_v62 = vsel %vm691_vm0, %v3507_v9, 0.0 }
 0x1c0   : > { %972 = vadd.xlane.f32.xlu1 %v897_v59  ;;  %970 = vadd.xlane.f32.xlu0 %v896_v0  ;;  %v3661_v59 = vpop.f32.mrb[29].mxu0  ;;  %v3663_v0 = vpop.f32.mrb[28].mxu1 }
 0x1c1   : > { %5362 = vst [vmem:[#allocation35_spill] sm:$0xff] %v3661_v59  ;;  %5363 = vst [vmem:[#allocation36_spill] sm:$0xff] %v3663_v0  ;;  %v3671_v61 = vpop.f32.mrb[29].mxu1 }
 0x1c2   : > { %5364 = vst [vmem:[#allocation37_spill] sm:$0xff] %v3671_v61 }
 0x1c4   : > { %1036 = vadd.xlane.f32.xlu1 %v929_v1  ;;  %1034 = vadd.xlane.f32.xlu0 %v928_v7  ;;  %v739_v1 = vsel %vm691_vm0, 0.0, %v3483_v63  ;;  %v738_v7 = vsel %vm691_vm0, 0.0, %v3493_v3 }
 0x1c8   : > { %784 = vadd.xlane.f32.xlu1 %v707_v44  ;;  %782 = vadd.xlane.f32.xlu0 %v706_v47  ;;  %v898_v44 = vsel %vm691_vm0, %v3491_v2, 0.0  ;;  %v931_v47 = vsel %vm691_vm0, %v3483_v63, 0.0  ;;  %v3695_v63 = vpop.f32.mrb[30].mxu1  ;;  %v901_v2 = vsel %vm691_vm0, %v3495_v4, 0.0 }
 0x1c9   : > { %5367 = vst [vmem:[#allocation40_spill] sm:$0xff] %v3695_v63  ;;  %v3703_v3 = vpop.f32.mrb[31].mxu1 }
 0x1ca   : > { %5368 = vst [vmem:[#allocation41_spill] sm:$0xff] %v3703_v3 }
 0x1cc   : > { %848 = vadd.xlane.f32.xlu1 %v739_v1  ;;  %846 = vadd.xlane.f32.xlu0 %v738_v7  ;;  %v3685_v1 = vpop.f32.mrb[30].mxu0  ;;  %v709_v7 = vsel %vm691_vm0, 0.0, %v3495_v4  ;;  %v905_v4 = vsel %vm691_vm0, %v3529_v18, 0.0 }
 0x1cd   : > { %5365 = vst [vmem:[#allocation38_spill] sm:$0xff] %v3685_v1 }
 0x1d0   : > { %976 = vadd.xlane.f32.xlu1 %v899_v57  ;;  %974 = vadd.xlane.f32.xlu0 %v898_v44  ;;  %v708_v57 = vsel %vm691_vm0, 0.0, %v3505_v8  ;;  %v3693_v44 = vpop.f32.mrb[31].mxu0 }
 0x1d1   : > { %5366 = vst [vmem:[#allocation39_spill] sm:$0xff] %v3693_v44 }
 0x1d4   : > { %1040 = vadd.xlane.f32.xlu1 %v931_v47  ;;  %1038 = vadd.xlane.f32.xlu0 %v930_v60  ;;  %v741_v60 = vsel %vm691_vm0, 0.0, %v3497_v5  ;;  %v740_v47 = vsel %vm691_vm0, 0.0, %v3507_v9 }
 0x1d8   : > { %788 = vadd.xlane.f32.xlu1 %v709_v7  ;;  %786 = vadd.xlane.f32.xlu0 %v708_v57  ;;  %v900_v7 = vsel %vm691_vm0, %v3505_v8, 0.0  ;;  %v933_v57 = vsel %vm691_vm0, %v3497_v5, 0.0 }
 0x1dc   : > { %852 = vadd.xlane.f32.xlu1 %v741_v60  ;;  %850 = vadd.xlane.f32.xlu0 %v740_v47  ;;  %v711_v60 = vsel %vm691_vm0, 0.0, %v3515_v12  ;;  %v710_v47 = vsel %vm691_vm0, 0.0, %v3519_v14 }
 0x1e0   : > { %980 = vadd.xlane.f32.xlu1 %v901_v2  ;;  %978 = vadd.xlane.f32.xlu0 %v900_v7  ;;  %v743_v2 = vsel %vm691_vm0, 0.0, %v3517_v13  ;;  %v742_v7 = vsel %vm691_vm0, 0.0, %v3521_v15 }
 0x1e4   : > { %1044 = vadd.xlane.f32.xlu1 %v933_v57  ;;  %1042 = vadd.xlane.f32.xlu0 %v932_v62  ;;  %v903_v62 = vsel %vm691_vm0, %v3515_v12, 0.0  ;;  %v902_v57 = vsel %vm691_vm0, %v3519_v14, 0.0  ;;  %v713_v12 = vsel %vm691_vm0, 0.0, %v3529_v18 }
 0x1e8   : > { %792 = vadd.xlane.f32.xlu1 %v711_v60  ;;  %790 = vadd.xlane.f32.xlu0 %v710_v47  ;;  %v935_v60 = vsel %vm691_vm0, %v3517_v13, 0.0  ;;  %v934_v47 = vsel %vm691_vm0, %v3521_v15, 0.0  ;;  %v745_v15 = vsel %vm691_vm0, 0.0, %v3531_v19 }
 0x1ec   : > { %856 = vadd.xlane.f32.xlu1 %v743_v2  ;;  %854 = vadd.xlane.f32.xlu0 %v742_v7 }
 0x1f0   : > { %984 = vadd.xlane.f32.xlu1 %v903_v62  ;;  %982 = vadd.xlane.f32.xlu0 %v902_v57  ;;  %v712_v62 = vsel %vm691_vm0, 0.0, %v3533_v20 }
 0x1f4   : > { %1048 = vadd.xlane.f32.xlu1 %v935_v60  ;;  %1046 = vadd.xlane.f32.xlu0 %v934_v47  ;;  %v744_v60 = vsel %vm691_vm0, 0.0, %v3535_v21 }
 0x1f5   : > { %v825_v2 = vpop.xlane.xlu1 %824  ;;  %v761_v7 = vpop.xlane.xlu0 %760 }
 0x1f8   : > { %796 = vadd.xlane.f32.xlu1 %v713_v12  ;;  %794 = vadd.xlane.f32.xlu0 %v712_v62 }
 0x1f9   : > { %v953_v57 = vpop.xlane.xlu1 %952  ;;  %v759_v13 = vpop.xlane.xlu0 %758 }
 0x1fa   : > { %v1079_v47 = vsel %vm691_vm0, %v953_v57, %v761_v7  ;;  %v904_v7 = vsel %vm691_vm0, %v3533_v20, 0.0 }
 0x1fb   : > { %v1143_v14 = vmul.f32 0.015625, %v1079_v47  ;;  %v714_v47 = vsel %vm691_vm0, 0.0, %v3547_v31 }
 0x1fc   : > { %860 = vadd.xlane.f32.xlu1 %v745_v15  ;;  %858 = vadd.xlane.f32.xlu0 %v744_v60  ;;  %v936_v60 = vsel %vm691_vm0, %v3535_v21, 0.0 }
 0x1fd   : > { %v3756_v9 = vsub.f32 %v3397_v26, %v1143_v14  ;;  %v1017_v12 = vpop.xlane.xlu1 %1016  ;;  %v823_v62 = vpop.xlane.xlu0 %822 }
 0x1fe   : > { %v1111_v5 = vsel %vm691_vm0, %v1017_v12, %v825_v2 }
 0x1ff   : > { %5369 = vst [vmem:[#allocation42_spill] sm:$0xff] %v3756_v9  ;;  %v1175_v8 = vmul.f32 0.015625, %v1111_v5  ;;  %v937_v5 = vsel %vm691_vm0, %v3531_v19, 0.0 }
 0x200   : > { %988 = vadd.xlane.f32.xlu1 %v905_v4  ;;  %986 = vadd.xlane.f32.xlu0 %v904_v7 }
 0x201   : > { %v3767_v15 = vsub.f32 %v3399_v27, %v1175_v8  ;;  %v951_v26 = vpop.xlane.xlu0 %950  ;;  %v765_v14 = vpop.xlane.xlu1 %764 }
 0x202   : > { %v1078_v57 = vsel %vm691_vm0, %v951_v26, %v759_v13  ;;  %v715_v13 = vsel %vm691_vm0, 0.0, %v3537_v22 }
 0x203   : > { %5370 = vst [vmem:[#allocation43_spill] sm:$0xff] %v3767_v15  ;;  %v1142_v2 = vmul.f32 0.015625, %v1078_v57 }
 0x204   : > { %1052 = vadd.xlane.f32.xlu1 %v937_v5  ;;  %1050 = vadd.xlane.f32.xlu0 %v936_v60  ;;  %v746_v5 = vsel %vm691_vm0, 0.0, %v3549_v34 }
 0x205   : > { %v3778_v4 = vsub.f32 %v3401_v28, %v1142_v2  ;;  %v1015_v27 = vpop.xlane.xlu0 %1014  ;;  %v829_v8 = vpop.xlane.xlu1 %828  ;;  %v747_v2 = vsel %vm691_vm0, 0.0, %v3539_v23 }
 0x206   : > { %v1110_v12 = vsel %vm691_vm0, %v1015_v27, %v823_v62 }
 0x207   : > { %5371 = vst [vmem:[#allocation44_spill] sm:$0xff] %v3778_v4  ;;  %v1174_v7 = vmul.f32 0.015625, %v1110_v12 }
 0x208   : > { %800 = vadd.xlane.f32.xlu1 %v715_v13  ;;  %798 = vadd.xlane.f32.xlu0 %v714_v47 }
 0x209   : > { %v3789_v26 = vsub.f32 %v3403_v29, %v1174_v7  ;;  %v827_v28 = vpop.xlane.xlu0 %826  ;;  %v957_v57 = vpop.xlane.xlu1 %956  ;;  %v907_v7 = vsel %vm691_vm0, %v3537_v22, 0.0 }
 0x20a   : > { %v1081_v60 = vsel %vm691_vm0, %v957_v57, %v765_v14  ;;  %v906_v14 = vsel %vm691_vm0, %v3547_v31, 0.0 }
 0x20b   : > { %5372 = vst [vmem:[#allocation45_spill] sm:$0xff] %v3789_v26  ;;  %v1145_v62 = vmul.f32 0.015625, %v1081_v60 }
 0x20c   : > { %864 = vadd.xlane.f32.xlu1 %v747_v2  ;;  %862 = vadd.xlane.f32.xlu0 %v746_v5 }
 0x20d   : > { %v3800_v27 = vsub.f32 %v3411_v32, %v1145_v62  ;;  %v1021_v29 = vpop.xlane.xlu1 %1020  ;;  %v955_v13 = vpop.xlane.xlu0 %954 }
 0x20e   : > { %v1113_v47 = vsel %vm691_vm0, %v1021_v29, %v829_v8  ;;  %v939_v29 = vsel %vm691_vm0, %v3539_v23, 0.0 }
 0x20f   : > { %5373 = vst [vmem:[#allocation46_spill] sm:$0xff] %v3800_v27  ;;  %v1177_v12 = vmul.f32 0.015625, %v1113_v47  ;;  %v938_v47 = vsel %vm691_vm0, %v3549_v34, 0.0 }
 0x210   : > { %992 = vadd.xlane.f32.xlu1 %v907_v7  ;;  %990 = vadd.xlane.f32.xlu0 %v906_v14  ;;  %v717_v7 = vsel %vm691_vm0, 0.0, %v3557_v41  ;;  %v716_v14 = vsel %vm691_vm0, 0.0, %v3565_v50 }
 0x211   : > { %v3811_v57 = vsub.f32 %v3413_v33, %v1177_v12  ;;  %v1019_v32 = vpop.xlane.xlu0 %1018  ;;  %v763_v2 = vpop.xlane.xlu1 %762 }
 0x212   : > { %v1112_v5 = vsel %vm691_vm0, %v1019_v32, %v827_v28  ;;  %v1080_v8 = vsel %vm691_vm0, %v955_v13, %v763_v2 }
 0x213   : > { %5374 = vst [vmem:[#allocation47_spill] sm:$0xff] %v3811_v57  ;;  %v1176_v60 = vmul.f32 0.015625, %v1112_v5  ;;  %v1144_v62 = vmul.f32 0.015625, %v1080_v8 }
 0x214   : > { %1056 = vadd.xlane.f32.xlu1 %v939_v29  ;;  %1054 = vadd.xlane.f32.xlu0 %v938_v47 }
 0x215   : > { %v3824_v33 = vsub.f32 %v3423_v37, %v1176_v60  ;;  %v3827_v28 = vsub.f32 %v3421_v36, %v1144_v62  ;;  %v769_v12 = vpop.xlane.xlu1 %768  ;;  %v767_v13 = vpop.xlane.xlu0 %766  ;;  %v749_v37 = vsel %vm691_vm0, 0.0, %v3567_v53  ;;  %v748_v36 = vsel %vm691_vm0, 0.0, %v3569_v58 }
 0x217   : > { %5375 = vst [vmem:[#allocation48_spill] sm:$0xff] %v3824_v33  ;;  %5376 = vst [vmem:[#allocation49_spill] sm:$0xff] %v3827_v28 }
 0x218   : > { %804 = vadd.xlane.f32.xlu1 %v717_v7  ;;  %802 = vadd.xlane.f32.xlu0 %v716_v14  ;;  %v909_v7 = vsel %vm691_vm0, %v3557_v41, 0.0  ;;  %v908_v14 = vsel %vm691_vm0, %v3565_v50, 0.0 }
 0x219   : > { %v833_v32 = vpop.xlane.xlu1 %832  ;;  %v831_v2 = vpop.xlane.xlu0 %830 }
 0x21c   : > { %868 = vadd.xlane.f32.xlu1 %v749_v37  ;;  %866 = vadd.xlane.f32.xlu0 %v748_v36 }
 0x21d   : > { %v961_v5 = vpop.xlane.xlu1 %960  ;;  %v959_v8 = vpop.xlane.xlu0 %958 }
 0x21e   : > { %v1083_v60 = vsel %vm691_vm0, %v961_v5, %v769_v12  ;;  %v1082_v62 = vsel %vm691_vm0, %v959_v8, %v767_v13 }
 0x21f   : > { %v1147_v29 = vmul.f32 0.015625, %v1083_v60  ;;  %v1146_v47 = vmul.f32 0.015625, %v1082_v62 }
 0x220   : > { %996 = vadd.xlane.f32.xlu1 %v909_v7  ;;  %994 = vadd.xlane.f32.xlu0 %v908_v14  ;;  %v941_v7 = vsel %vm691_vm0, %v3567_v53, 0.0  ;;  %v718_v14 = vsel %vm691_vm0, 0.0, %v3597_v24 }
 0x221   : > { %v3852_v37 = vsub.f32 %v3425_v38, %v1147_v29  ;;  %v3855_v12 = vsub.f32 %v3435_v42, %v1146_v47  ;;  %v1025_v36 = vpop.xlane.xlu1 %1024  ;;  %v1023_v13 = vpop.xlane.xlu0 %1022  ;;  %v940_v38 = vsel %vm691_vm0, %v3569_v58, 0.0  ;;  %v719_v47 = vsel %vm691_vm0, 0.0, %v3589_v11 }
 0x222   : > { %v1115_v5 = vsel %vm691_vm0, %v1025_v36, %v833_v32  ;;  %v1114_v8 = vsel %vm691_vm0, %v1023_v13, %v831_v2 }
 0x223   : > { %v1179_v60 = vmul.f32 0.015625, %v1115_v5  ;;  %v1178_v62 = vmul.f32 0.015625, %v1114_v8 }
 0x224   : > { %1060 = vadd.xlane.f32.xlu1 %v941_v7  ;;  %1058 = vadd.xlane.f32.xlu0 %v940_v38 }
 0x225   : > { %v3868_v42 = vsub.f32 %v3427_v39, %v1179_v60  ;;  %v3871_v32 = vsub.f32 %v3437_v43, %v1178_v62  ;;  %v773_v29 = vpop.xlane.xlu1 %772  ;;  %v771_v2 = vpop.xlane.xlu0 %770  ;;  %v751_v39 = vsel %vm691_vm0, 0.0, %v3599_v30  ;;  %v750_v43 = vsel %vm691_vm0, 0.0, %v3601_v35 }
 0x227   : > { %5377 = vst [vmem:[#allocation50_spill] sm:$0xff] %v3868_v42  ;;  %5378 = vst [vmem:[#allocation51_spill] sm:$0xff] %v3871_v32 }
 0x228   : > { %808 = vadd.xlane.f32.xlu1 %v719_v47  ;;  %806 = vadd.xlane.f32.xlu0 %v718_v14  ;;  %v911_v47 = vsel %vm691_vm0, %v3589_v11, 0.0  ;;  %v910_v14 = vsel %vm691_vm0, %v3597_v24, 0.0 }
 0x229   : > { %v837_v36 = vpop.xlane.xlu1 %836  ;;  %v835_v13 = vpop.xlane.xlu0 %834 }
 0x22c   : > { %872 = vadd.xlane.f32.xlu1 %v751_v39  ;;  %870 = vadd.xlane.f32.xlu0 %v750_v43 }
 0x22d   : > { %v965_v5 = vpop.xlane.xlu1 %964  ;;  %v963_v8 = vpop.xlane.xlu0 %962 }
 0x22e   : > { %v1085_v60 = vsel %vm691_vm0, %v965_v5, %v773_v29  ;;  %v1084_v62 = vsel %vm691_vm0, %v963_v8, %v771_v2 }
 0x22f   : > { %v1149_v7 = vmul.f32 0.015625, %v1085_v60  ;;  %v1148_v38 = vmul.f32 0.015625, %v1084_v62 }
 0x230   : > { %1000 = vadd.xlane.f32.xlu1 %v911_v47  ;;  %998 = vadd.xlane.f32.xlu0 %v910_v14  ;;  %v943_v47 = vsel %vm691_vm0, %v3599_v30, 0.0  ;;  %v720_v14 = vsel %vm691_vm0, 0.0, %v3629_v16 }
 0x231   : > { %v3896_v39 = vsub.f32 %v3442_v45, %v1149_v7  ;;  %v3899_v29 = vsub.f32 %v3449_v48, %v1148_v38  ;;  %v1029_v43 = vpop.xlane.xlu1 %1028  ;;  %v1027_v2 = vpop.xlane.xlu0 %1026  ;;  %v942_v45 = vsel %vm691_vm0, %v3601_v35, 0.0  ;;  %v721_v38 = vsel %vm691_vm0, 0.0, %v3621_v6 }
 0x232   : > { %v1117_v5 = vsel %vm691_vm0, %v1029_v43, %v837_v36  ;;  %v1116_v8 = vsel %vm691_vm0, %v1027_v2, %v835_v13 }
 0x233   : > { %v1181_v60 = vmul.f32 0.015625, %v1117_v5  ;;  %v1180_v62 = vmul.f32 0.015625, %v1116_v8 }
 0x234   : > { %1064 = vadd.xlane.f32.xlu1 %v943_v47  ;;  %1062 = vadd.xlane.f32.xlu0 %v942_v45 }
 0x235   : > { %v3912_v48 = vsub.f32 %v3444_v46, %v1181_v60  ;;  %v3915_v36 = vsub.f32 %v3451_v49, %v1180_v62  ;;  %v777_v7 = vpop.xlane.xlu1 %776  ;;  %v775_v13 = vpop.xlane.xlu0 %774  ;;  %v753_v46 = vsel %vm691_vm0, 0.0, %v3631_v17  ;;  %v752_v49 = vsel %vm691_vm0, 0.0, %v3633_v40 }
 0x238   : > { %812 = vadd.xlane.f32.xlu1 %v721_v38  ;;  %810 = vadd.xlane.f32.xlu0 %v720_v14  ;;  %v913_v38 = vsel %vm691_vm0, %v3621_v6, 0.0  ;;  %v912_v14 = vsel %vm691_vm0, %v3629_v16, 0.0 }
 0x239   : > { %v841_v43 = vpop.xlane.xlu1 %840  ;;  %v839_v2 = vpop.xlane.xlu0 %838 }
 0x23c   : > { %876 = vadd.xlane.f32.xlu1 %v753_v46  ;;  %874 = vadd.xlane.f32.xlu0 %v752_v49 }
 0x23d   : > { %v969_v5 = vpop.xlane.xlu1 %968  ;;  %v967_v8 = vpop.xlane.xlu0 %966 }
 0x23e   : > { %v1087_v60 = vsel %vm691_vm0, %v969_v5, %v777_v7  ;;  %v1086_v62 = vsel %vm691_vm0, %v967_v8, %v775_v13 }
 0x23f   : > { %v1151_v47 = vmul.f32 0.015625, %v1087_v60  ;;  %v1150_v45 = vmul.f32 0.015625, %v1086_v62 }
 0x240   : > { %1004 = vadd.xlane.f32.xlu1 %v913_v38  ;;  %1002 = vadd.xlane.f32.xlu0 %v912_v14  ;;  %v945_v38 = vsel %vm691_vm0, %v3631_v17, 0.0  ;;  %v722_v14 = vsel %vm691_vm0, 0.0, %v3661_v59 }
 0x241   : > { %v3940_v46 = vsub.f32 %v3456_v51, %v1151_v47  ;;  %v3943_v7 = vsub.f32 %v3463_v54, %v1150_v45  ;;  %v1033_v49 = vpop.xlane.xlu1 %1032  ;;  %v1031_v13 = vpop.xlane.xlu0 %1030  ;;  %v944_v51 = vsel %vm691_vm0, %v3633_v40, 0.0  ;;  %v723_v45 = vsel %vm691_vm0, 0.0, %v3653_v10 }
 0x242   : > { %v1119_v5 = vsel %vm691_vm0, %v1033_v49, %v841_v43  ;;  %v1118_v8 = vsel %vm691_vm0, %v1031_v13, %v839_v2 }
 0x243   : > { %v1183_v60 = vmul.f32 0.015625, %v1119_v5  ;;  %v1182_v62 = vmul.f32 0.015625, %v1118_v8 }
 0x244   : > { %1068 = vadd.xlane.f32.xlu1 %v945_v38  ;;  %1066 = vadd.xlane.f32.xlu0 %v944_v51 }
 0x245   : > { %v3956_v54 = vsub.f32 %v3458_v52, %v1183_v60  ;;  %v3959_v43 = vsub.f32 %v3465_v55, %v1182_v62  ;;  %v781_v47 = vpop.xlane.xlu1 %780  ;;  %v779_v2 = vpop.xlane.xlu0 %778  ;;  %v755_v52 = vsel %vm691_vm0, 0.0, %v3663_v0  ;;  %v754_v55 = vsel %vm691_vm0, 0.0, %v3671_v61 }
 0x248   : > { %816 = vadd.xlane.f32.xlu1 %v723_v45  ;;  %814 = vadd.xlane.f32.xlu0 %v722_v14  ;;  %v915_v45 = vsel %vm691_vm0, %v3653_v10, 0.0  ;;  %v914_v14 = vsel %vm691_vm0, %v3661_v59, 0.0  ;;  %v5387_v59 = vld [vmem:[#allocation23_spill] sm:$0xff] }
 0x249   : > { %v845_v49 = vpop.xlane.xlu1 %844  ;;  %v843_v13 = vpop.xlane.xlu0 %842 }
 0x24c   : > { %880 = vadd.xlane.f32.xlu1 %v755_v52  ;;  %878 = vadd.xlane.f32.xlu0 %v754_v55  ;;  %v5379_v55 = vld [vmem:[#allocation19_spill] sm:$0xff] }
 0x24d   : > { %v973_v5 = vpop.xlane.xlu1 %972  ;;  %v971_v8 = vpop.xlane.xlu0 %970 }
 0x24e   : > { %v1089_v60 = vsel %vm691_vm0, %v973_v5, %v781_v47  ;;  %v1088_v62 = vsel %vm691_vm0, %v971_v8, %v779_v2 }
 0x24f   : > { %v1153_v38 = vmul.f32 0.015625, %v1089_v60  ;;  %v1152_v51 = vmul.f32 0.015625, %v1088_v62 }
 0x250   : > { %1008 = vadd.xlane.f32.xlu1 %v915_v45  ;;  %1006 = vadd.xlane.f32.xlu0 %v914_v14  ;;  %v947_v45 = vsel %vm691_vm0, %v3663_v0, 0.0  ;;  %v5383_v14 = vld [vmem:[#allocation20_spill] sm:$0xff]  ;;  %v916_v0 = vsel %vm691_vm0, %v3693_v44, 0.0 }
 0x251   : > { %v3984_v52 = vsub.f32 %v3467_v56, %v1153_v38  ;;  %v3987_v47 = vsub.f32 %v5379_v55, %v1152_v51  ;;  %v1037_v5 = vpop.xlane.xlu1 %1036  ;;  %v1035_v2 = vpop.xlane.xlu0 %1034  ;;  %v946_v56 = vsel %vm691_vm0, %v3671_v61, 0.0  ;;  %v5381_v38 = vld [vmem:[#allocation18_spill] sm:$0xff]  ;;  %v917_v61 = vsel %vm691_vm0, %v3685_v1, 0.0 }
 0x252   : > { %v1121_v8 = vsel %vm691_vm0, %v1037_v5, %v845_v49  ;;  %v1120_v60 = vsel %vm691_vm0, %v1035_v2, %v843_v13  ;;  %v725_v5 = vsel %vm691_vm0, 0.0, %v3685_v1  ;;  %v724_v2 = vsel %vm691_vm0, 0.0, %v3693_v44  ;;  %v5395_v1 = vld [vmem:[#allocation27_spill] sm:$0xff] }
 0x253   : > { %5380 = vst [vmem:[#allocation19_spill] sm:$0xff] %v3987_v47  ;;  %v1185_v62 = vmul.f32 0.015625, %v1121_v8  ;;  %v1184_v10 = vmul.f32 0.015625, %v1120_v60 }
 0x254   : > { %1072 = vadd.xlane.f32.xlu1 %v947_v45  ;;  %1070 = vadd.xlane.f32.xlu0 %v946_v56 }
 0x255   : > { %v4000_v51 = vsub.f32 %v5381_v38, %v1185_v62  ;;  %v4003_v49 = vsub.f32 %v5383_v14, %v1184_v10  ;;  %v785_v55 = vpop.xlane.xlu1 %784  ;;  %v783_v13 = vpop.xlane.xlu0 %782  ;;  %v757_v62 = vsel %vm691_vm0, 0.0, %v3695_v63  ;;  %v756_v10 = vsel %vm691_vm0, 0.0, %v3703_v3 }
 0x257   : > { %5382 = vst [vmem:[#allocation18_spill] sm:$0xff] %v4000_v51  ;;  %5384 = vst [vmem:[#allocation20_spill] sm:$0xff] %v4003_v49 }
 0x258   : > { %820 = vadd.xlane.f32.xlu1 %v725_v5  ;;  %818 = vadd.xlane.f32.xlu0 %v724_v2 }
 0x259   : > { %v849_v8 = vpop.xlane.xlu1 %848  ;;  %v847_v60 = vpop.xlane.xlu0 %846 }
 0x25c   : > { %884 = vadd.xlane.f32.xlu1 %v757_v62  ;;  %882 = vadd.xlane.f32.xlu0 %v756_v10  ;;  %v5385_v62 = vld [vmem:[#allocation21_spill] sm:$0xff] }
 0x25d   : > { %v977_v45 = vpop.xlane.xlu1 %976  ;;  %v975_v56 = vpop.xlane.xlu0 %974 }
 0x25e   : > { %v1091_v38 = vsel %vm691_vm0, %v977_v45, %v785_v55  ;;  %v1090_v14 = vsel %vm691_vm0, %v975_v56, %v783_v13 }
 0x25f   : > { %v1155_v5 = vmul.f32 0.015625, %v1091_v38  ;;  %v1154_v2 = vmul.f32 0.015625, %v1090_v14  ;;  %v949_v14 = vsel %vm691_vm0, %v3695_v63, 0.0 }
 0x260   : > { %1012 = vadd.xlane.f32.xlu1 %v917_v61  ;;  %1010 = vadd.xlane.f32.xlu0 %v916_v0  ;;  %v948_v61 = vsel %vm691_vm0, %v3703_v3, 0.0 }
 0x261   : > { %v4028_v10 = vsub.f32 %v5385_v62, %v1155_v5  ;;  %v4031_v55 = vsub.f32 %v5387_v59, %v1154_v2  ;;  %v1041_v45 = vpop.xlane.xlu1 %1040  ;;  %v1039_v13 = vpop.xlane.xlu0 %1038  ;;  %v1271_v59 = vmul.f32 %v3756_v9, %v3756_v9  ;;  %v1270_v2 = vmul.f32 %v3778_v4, %v3778_v4  ;;  %v5391_v62 = vld [vmem:[#allocation24_spill] sm:$0xff] }
 0x262   : > { %v1123_v56 = vsel %vm691_vm0, %v1041_v45, %v849_v8  ;;  %v1122_v38 = vsel %vm691_vm0, %v1039_v13, %v847_v60  ;;  %v5389_v8 = vld [vmem:[#allocation22_spill] sm:$0xff]  ;;  %v1303_v9 = vmul.f32 %v3767_v15, %v3767_v15 }
 0x263   : > { %5386 = vst [vmem:[#allocation21_spill] sm:$0xff] %v4028_v10  ;;  %5388 = vst [vmem:[#allocation23_spill] sm:$0xff] %v4031_v55  ;;  %v1187_v0 = vmul.f32 0.015625, %v1123_v56  ;;  %v1186_v5 = vmul.f32 0.015625, %v1122_v38  ;;  %v1335_v56 = vsel %vm691_vm0, 0.0, %v1271_v59  ;;  %v1334_v38 = vsel %vm691_vm0, 0.0, %v1270_v2 }
 0x264   : > { %1076 = vadd.xlane.f32.xlu1 %v949_v14  ;;  %1074 = vadd.xlane.f32.xlu0 %v948_v61  ;;  %v1302_v14 = vmul.f32 %v3789_v26, %v3789_v26  ;;  %v1527_v3 = vsel %vm691_vm0, %v1271_v59, 0.0  ;;  %v1526_v44 = vsel %vm691_vm0, %v1270_v2, 0.0  ;;  %v1272_v59 = vmul.f32 %v3827_v28, %v3827_v28  ;;  %v5397_v2 = vld [vmem:[#allocation26_spill] sm:$0xff]  ;;  %v5403_v28 = vld [vmem:[#allocation31_spill] sm:$0xff] }
 0x265   : > { %v4048_v60 = vsub.f32 %v5389_v8, %v1187_v0  ;;  %v4051_v45 = vsub.f32 %v5391_v62, %v1186_v5  ;;  %v789_v13 = vpop.xlane.xlu1 %788  ;;  %v787_v63 = vpop.xlane.xlu0 %786  ;;  %v1367_v5 = vsel %vm691_vm0, 0.0, %v1303_v9 }
 0x266   : > { %v1366_v8 = vsel %vm691_vm0, 0.0, %v1302_v14 }
 0x267   : > { %5390 = vst [vmem:[#allocation22_spill] sm:$0xff] %v4048_v60  ;;  %5392 = vst [vmem:[#allocation24_spill] sm:$0xff] %v4051_v45 }
 0x268   : > { %1400 = vadd.xlane.f32.xlu1 %v1335_v56  ;;  %1398 = vadd.xlane.f32.xlu0 %v1334_v38 }
 0x269   : > { %v853_v61 = vpop.xlane.xlu1 %852  ;;  %v851_v0 = vpop.xlane.xlu0 %850 }
 0x26c   : > { %1464 = vadd.xlane.f32.xlu1 %v1367_v5  ;;  %1462 = vadd.xlane.f32.xlu0 %v1366_v8  ;;  %v5393_v5 = vld [vmem:[#allocation25_spill] sm:$0xff] }
 0x26d   : > { %v981_v62 = vpop.xlane.xlu1 %980  ;;  %v979_v4 = vpop.xlane.xlu0 %978 }
 0x26e   : > { %v1093_v15 = vsel %vm691_vm0, %v981_v62, %v789_v13  ;;  %v1092_v26 = vsel %vm691_vm0, %v979_v4, %v787_v63  ;;  %v1559_v4 = vsel %vm691_vm0, %v1303_v9, 0.0 }
 0x26f   : > { %v1157_v56 = vmul.f32 0.015625, %v1093_v15  ;;  %v1156_v38 = vmul.f32 0.015625, %v1092_v26 }
 0x270   : > { %1592 = vadd.xlane.f32.xlu1 %v1527_v3  ;;  %1590 = vadd.xlane.f32.xlu0 %v1526_v44  ;;  %v1558_v3 = vsel %vm691_vm0, %v1302_v14, 0.0 }
 0x271   : > { %v4074_v8 = vsub.f32 %v5393_v5, %v1157_v56  ;;  %v4077_v40 = vsub.f32 %v5395_v1, %v1156_v38  ;;  %v1045_v13 = vpop.xlane.xlu1 %1044  ;;  %v1043_v62 = vpop.xlane.xlu0 %1042  ;;  %v1273_v1 = vmul.f32 %v3800_v27, %v3800_v27  ;;  %v1336_v5 = vsel %vm691_vm0, 0.0, %v1272_v59 }
 0x272   : > { %v1125_v63 = vsel %vm691_vm0, %v1045_v13, %v853_v61  ;;  %v1124_v15 = vsel %vm691_vm0, %v1043_v62, %v851_v0  ;;  %v5399_v0 = vld [vmem:[#allocation28_spill] sm:$0xff]  ;;  %v1305_v13 = vmul.f32 %v3811_v57, %v3811_v57  ;;  %v1304_v62 = vmul.f32 %v3824_v33, %v3824_v33 }
 0x273   : > { %5394 = vst [vmem:[#allocation25_spill] sm:$0xff] %v4074_v8  ;;  %5396 = vst [vmem:[#allocation27_spill] sm:$0xff] %v4077_v40  ;;  %v1189_v44 = vmul.f32 0.015625, %v1125_v63  ;;  %v1188_v26 = vmul.f32 0.015625, %v1124_v15  ;;  %v1337_v14 = vsel %vm691_vm0, 0.0, %v1273_v1  ;;  %v1529_v33 = vsel %vm691_vm0, %v1273_v1, 0.0 }
 0x274   : > { %1656 = vadd.xlane.f32.xlu1 %v1559_v4  ;;  %1654 = vadd.xlane.f32.xlu0 %v1558_v3  ;;  %v1369_v4 = vsel %vm691_vm0, 0.0, %v1305_v13  ;;  %v1368_v3 = vsel %vm691_vm0, 0.0, %v1304_v62  ;;  %v1528_v57 = vsel %vm691_vm0, %v1272_v59, 0.0  ;;  %v1561_v1 = vsel %vm691_vm0, %v1305_v13, 0.0 }
 0x275   : > { %v4092_v61 = vsub.f32 %v5397_v2, %v1189_v44  ;;  %v4095_v56 = vsub.f32 %v5399_v0, %v1188_v26  ;;  %v793_v9 = vpop.xlane.xlu1 %792  ;;  %v791_v38 = vpop.xlane.xlu0 %790 }
 0x277   : > { %5398 = vst [vmem:[#allocation26_spill] sm:$0xff] %v4092_v61  ;;  %5400 = vst [vmem:[#allocation28_spill] sm:$0xff] %v4095_v56 }
 0x278   : > { %1404 = vadd.xlane.f32.xlu1 %v1337_v14  ;;  %1402 = vadd.xlane.f32.xlu0 %v1336_v5 }
 0x279   : > { %v857_v63 = vpop.xlane.xlu1 %856  ;;  %v855_v15 = vpop.xlane.xlu0 %854 }
 0x27c   : > { %1468 = vadd.xlane.f32.xlu1 %v1369_v4  ;;  %1466 = vadd.xlane.f32.xlu0 %v1368_v3  ;;  %v5401_v4 = vld [vmem:[#allocation29_spill] sm:$0xff] }
 0x27d   : > { %v985_v44 = vpop.xlane.xlu1 %984  ;;  %v983_v26 = vpop.xlane.xlu0 %982 }
 0x27e   : > { %v1095_v2 = vsel %vm691_vm0, %v985_v44, %v793_v9  ;;  %v1094_v0 = vsel %vm691_vm0, %v983_v26, %v791_v38 }
 0x27f   : > { %v1159_v14 = vmul.f32 0.015625, %v1095_v2  ;;  %v1158_v5 = vmul.f32 0.015625, %v1094_v0  ;;  %v1274_v2 = vmul.f32 %v3855_v12, %v3855_v12 }
 0x280   : > { %1596 = vadd.xlane.f32.xlu1 %v1529_v33  ;;  %1594 = vadd.xlane.f32.xlu0 %v1528_v57  ;;  %v1560_v57 = vsel %vm691_vm0, %v1304_v62, 0.0 }
 0x281   : > { %v4118_v3 = vsub.f32 %v5401_v4, %v1159_v14  ;;  %v4121_v27 = vsub.f32 %v5403_v28, %v1158_v5  ;;  %v1049_v9 = vpop.xlane.xlu1 %1048  ;;  %v1047_v44 = vpop.xlane.xlu0 %1046  ;;  %v1275_v28 = vmul.f32 %v3852_v37, %v3852_v37  ;;  %v1338_v4 = vsel %vm691_vm0, 0.0, %v1274_v2 }
 0x282   : > { %v1127_v38 = vsel %vm691_vm0, %v1049_v9, %v857_v63  ;;  %v1126_v26 = vsel %vm691_vm0, %v1047_v44, %v855_v15  ;;  %v5405_v63 = vld [vmem:[#allocation30_spill] sm:$0xff]  ;;  %v5407_v15 = vld [vmem:[#allocation32_spill] sm:$0xff]  ;;  %v1307_v9 = vmul.f32 %v3868_v42, %v3868_v42  ;;  %v1306_v44 = vmul.f32 %v3871_v32, %v3871_v32 }
 0x283   : > { %5402 = vst [vmem:[#allocation29_spill] sm:$0xff] %v4118_v3  ;;  %5404 = vst [vmem:[#allocation31_spill] sm:$0xff] %v4121_v27  ;;  %v1191_v33 = vmul.f32 0.015625, %v1127_v38  ;;  %v1190_v59 = vmul.f32 0.015625, %v1126_v26  ;;  %v1339_v62 = vsel %vm691_vm0, 0.0, %v1275_v28  ;;  %v1531_v32 = vsel %vm691_vm0, %v1275_v28, 0.0 }
 0x284   : > { %1660 = vadd.xlane.f32.xlu1 %v1561_v1  ;;  %1658 = vadd.xlane.f32.xlu0 %v1560_v57  ;;  %v1371_v1 = vsel %vm691_vm0, 0.0, %v1307_v9  ;;  %v1370_v57 = vsel %vm691_vm0, 0.0, %v1306_v44  ;;  %v1530_v42 = vsel %vm691_vm0, %v1274_v2, 0.0  ;;  %v1563_v2 = vsel %vm691_vm0, %v1307_v9, 0.0 }
 0x285   : > { %v4136_v0 = vsub.f32 %v5405_v63, %v1191_v33  ;;  %v4139_v14 = vsub.f32 %v5407_v15, %v1190_v59  ;;  %v797_v13 = vpop.xlane.xlu1 %796  ;;  %v795_v5 = vpop.xlane.xlu0 %794 }
 0x287   : > { %5406 = vst [vmem:[#allocation30_spill] sm:$0xff] %v4136_v0  ;;  %5408 = vst [vmem:[#allocation32_spill] sm:$0xff] %v4139_v14 }
 0x288   : > { %1408 = vadd.xlane.f32.xlu1 %v1339_v62  ;;  %1406 = vadd.xlane.f32.xlu0 %v1338_v4 }
 0x289   : > { %v861_v38 = vpop.xlane.xlu1 %860  ;;  %v859_v26 = vpop.xlane.xlu0 %858 }
 0x28c   : > { %1472 = vadd.xlane.f32.xlu1 %v1371_v1  ;;  %1470 = vadd.xlane.f32.xlu0 %v1370_v57 }
 0x28d   : > { %v989_v33 = vpop.xlane.xlu1 %988  ;;  %v987_v59 = vpop.xlane.xlu0 %986 }
 0x28e   : > { %v1097_v63 = vsel %vm691_vm0, %v989_v33, %v797_v13  ;;  %v1096_v15 = vsel %vm691_vm0, %v987_v59, %v795_v5  ;;  %v1276_v59 = vmul.f32 %v3899_v29, %v3899_v29 }
 0x28f   : > { %v1161_v62 = vmul.f32 0.015625, %v1097_v63  ;;  %v1160_v4 = vmul.f32 0.015625, %v1096_v15 }
 0x290   : > { %1600 = vadd.xlane.f32.xlu1 %v1531_v32  ;;  %1598 = vadd.xlane.f32.xlu0 %v1530_v42  ;;  %v1562_v42 = vsel %vm691_vm0, %v1306_v44, 0.0  ;;  %v1340_v15 = vsel %vm691_vm0, 0.0, %v1276_v59 }
 0x291   : > { %v4162_v1 = vsub.f32 %v3529_v18, %v1161_v62  ;;  %v4165_v57 = vsub.f32 %v3533_v20, %v1160_v4  ;;  %v1053_v13 = vpop.xlane.xlu1 %1052  ;;  %v1051_v33 = vpop.xlane.xlu0 %1050  ;;  %v1277_v20 = vmul.f32 %v3896_v39, %v3896_v39  ;;  %v1309_v62 = vmul.f32 %v3912_v48, %v3912_v48 }
 0x292   : > { %v1129_v5 = vsel %vm691_vm0, %v1053_v13, %v861_v38  ;;  %v1128_v28 = vsel %vm691_vm0, %v1051_v33, %v859_v26  ;;  %v1308_v4 = vmul.f32 %v3915_v36, %v3915_v36 }
 0x293   : > { %5409 = vst [vmem:[#allocation52_spill] sm:$0xff] %v4162_v1  ;;  %5410 = vst [vmem:[#allocation53_spill] sm:$0xff] %v4165_v57  ;;  %v1193_v32 = vmul.f32 0.015625, %v1129_v5  ;;  %v1192_v18 = vmul.f32 0.015625, %v1128_v28  ;;  %v1341_v44 = vsel %vm691_vm0, 0.0, %v1277_v20 }
 0x294   : > { %1664 = vadd.xlane.f32.xlu1 %v1563_v2  ;;  %1662 = vadd.xlane.f32.xlu0 %v1562_v42  ;;  %v1372_v33 = vsel %vm691_vm0, 0.0, %v1308_v4 }
 0x295   : > { %v4181_v38 = vsub.f32 %v3531_v19, %v1193_v32  ;;  %v4184_v26 = vsub.f32 %v3535_v21, %v1192_v18  ;;  %v801_v9 = vpop.xlane.xlu1 %800  ;;  %v799_v63 = vpop.xlane.xlu0 %798  ;;  %v1373_v21 = vsel %vm691_vm0, 0.0, %v1309_v62 }
 0x297   : > { %5411 = vst [vmem:[#allocation54_spill] sm:$0xff] %v4181_v38  ;;  %5412 = vst [vmem:[#allocation55_spill] sm:$0xff] %v4184_v26 }
 0x298   : > { %1412 = vadd.xlane.f32.xlu1 %v1341_v44  ;;  %1410 = vadd.xlane.f32.xlu0 %v1340_v15  ;;  %v1533_v44 = vsel %vm691_vm0, %v1277_v20, 0.0  ;;  %v1532_v15 = vsel %vm691_vm0, %v1276_v59, 0.0  ;;  %v1565_v20 = vsel %vm691_vm0, %v1309_v62, 0.0  ;;  %v1564_v59 = vsel %vm691_vm0, %v1308_v4, 0.0 }
 0x299   : > { %v865_v19 = vpop.xlane.xlu1 %864  ;;  %v863_v13 = vpop.xlane.xlu0 %862 }
 0x29c   : > { %1476 = vadd.xlane.f32.xlu1 %v1373_v21  ;;  %1474 = vadd.xlane.f32.xlu0 %v1372_v33 }
 0x29d   : > { %v993_v5 = vpop.xlane.xlu1 %992  ;;  %v991_v28 = vpop.xlane.xlu0 %990 }
 0x29e   : > { %v1099_v2 = vsel %vm691_vm0, %v993_v5, %v801_v9  ;;  %v1098_v42 = vsel %vm691_vm0, %v991_v28, %v799_v63 }
 0x29f   : > { %v1163_v32 = vmul.f32 0.015625, %v1099_v2  ;;  %v1162_v18 = vmul.f32 0.015625, %v1098_v42  ;;  %v1278_v42 = vmul.f32 %v3943_v7, %v3943_v7 }
 0x2a0   : > { %1604 = vadd.xlane.f32.xlu1 %v1533_v44  ;;  %1602 = vadd.xlane.f32.xlu0 %v1532_v15  ;;  %v1311_v44 = vmul.f32 %v3956_v54, %v3956_v54  ;;  %v1310_v15 = vmul.f32 %v3959_v43, %v3959_v43 }
 0x2a1   : > { %v4207_v21 = vsub.f32 %v3537_v22, %v1163_v32  ;;  %v4210_v33 = vsub.f32 %v3547_v31, %v1162_v18  ;;  %v1057_v9 = vpop.xlane.xlu1 %1056  ;;  %v1055_v5 = vpop.xlane.xlu0 %1054  ;;  %v1279_v31 = vmul.f32 %v3940_v46, %v3940_v46  ;;  %v1342_v18 = vsel %vm691_vm0, 0.0, %v1278_v42 }
 0x2a2   : > { %v1131_v63 = vsel %vm691_vm0, %v1057_v9, %v865_v19  ;;  %v1130_v28 = vsel %vm691_vm0, %v1055_v5, %v863_v13  ;;  %v1374_v5 = vsel %vm691_vm0, 0.0, %v1310_v15 }
 0x2a3   : > { %5413 = vst [vmem:[#allocation56_spill] sm:$0xff] %v4207_v21  ;;  %5414 = vst [vmem:[#allocation57_spill] sm:$0xff] %v4210_v33  ;;  %v1195_v2 = vmul.f32 0.015625, %v1131_v63  ;;  %v1194_v22 = vmul.f32 0.015625, %v1130_v28  ;;  %v1343_v4 = vsel %vm691_vm0, 0.0, %v1279_v31 }
 0x2a4   : > { %1668 = vadd.xlane.f32.xlu1 %v1565_v20  ;;  %1666 = vadd.xlane.f32.xlu0 %v1564_v59 }
 0x2a5   : > { %v4225_v19 = vsub.f32 %v3539_v23, %v1195_v2  ;;  %v4228_v13 = vsub.f32 %v3549_v34, %v1194_v22  ;;  %v805_v62 = vpop.xlane.xlu1 %804  ;;  %v803_v32 = vpop.xlane.xlu0 %802  ;;  %v1375_v34 = vsel %vm691_vm0, 0.0, %v1311_v44 }
 0x2a7   : > { %5415 = vst [vmem:[#allocation58_spill] sm:$0xff] %v4225_v19  ;;  %5416 = vst [vmem:[#allocation59_spill] sm:$0xff] %v4228_v13 }
 0x2a8   : > { %1416 = vadd.xlane.f32.xlu1 %v1343_v4  ;;  %1414 = vadd.xlane.f32.xlu0 %v1342_v18  ;;  %v1535_v4 = vsel %vm691_vm0, %v1279_v31, 0.0  ;;  %v1534_v18 = vsel %vm691_vm0, %v1278_v42, 0.0  ;;  %v1567_v31 = vsel %vm691_vm0, %v1311_v44, 0.0  ;;  %v1566_v42 = vsel %vm691_vm0, %v1310_v15, 0.0 }
 0x2a9   : > { %v869_v23 = vpop.xlane.xlu1 %868  ;;  %v867_v9 = vpop.xlane.xlu0 %866 }
 0x2ac   : > { %1480 = vadd.xlane.f32.xlu1 %v1375_v34  ;;  %1478 = vadd.xlane.f32.xlu0 %v1374_v5 }
 0x2ad   : > { %v997_v63 = vpop.xlane.xlu1 %996  ;;  %v995_v28 = vpop.xlane.xlu0 %994 }
 0x2ae   : > { %v1101_v20 = vsel %vm691_vm0, %v997_v63, %v805_v62  ;;  %v1100_v59 = vsel %vm691_vm0, %v995_v28, %v803_v32 }
 0x2af   : > { %v1165_v2 = vmul.f32 0.015625, %v1101_v20  ;;  %v1164_v22 = vmul.f32 0.015625, %v1100_v59  ;;  %v1280_v59 = vmul.f32 %v3987_v47, %v3987_v47 }
 0x2b0   : > { %1608 = vadd.xlane.f32.xlu1 %v1535_v4  ;;  %1606 = vadd.xlane.f32.xlu0 %v1534_v18  ;;  %v4280_v4 = vmul.f32 %v4000_v51, %v4000_v51  ;;  %v4284_v18 = vmul.f32 %v4003_v49, %v4003_v49  ;;  %v5430_v51 = vld [vmem:[#allocation35_spill] sm:$0xff] }
 0x2b1   : > { %v4251_v34 = vsub.f32 %v3557_v41, %v1165_v2  ;;  %v4254_v5 = vsub.f32 %v3565_v50, %v1164_v22  ;;  %v1061_v62 = vpop.xlane.xlu1 %1060  ;;  %v1059_v63 = vpop.xlane.xlu0 %1058  ;;  %v1281_v50 = vmul.f32 %v3984_v52, %v3984_v52  ;;  %v1344_v22 = vsel %vm691_vm0, 0.0, %v1280_v59 }
 0x2b2   : > { %v1133_v32 = vsel %vm691_vm0, %v1061_v62, %v869_v23  ;;  %v1132_v28 = vsel %vm691_vm0, %v1059_v63, %v867_v9  ;;  %v1377_v62 = vsel %vm691_vm0, 0.0, %v4280_v4  ;;  %v1376_v63 = vsel %vm691_vm0, 0.0, %v4284_v18 }
 0x2b3   : > { %5417 = vst [vmem:[#allocation60_spill] sm:$0xff] %v4251_v34  ;;  %5418 = vst [vmem:[#allocation61_spill] sm:$0xff] %v4254_v5  ;;  %v1197_v20 = vmul.f32 0.015625, %v1133_v32  ;;  %v1196_v41 = vmul.f32 0.015625, %v1132_v28  ;;  %v1345_v15 = vsel %vm691_vm0, 0.0, %v1281_v50 }
 0x2b4   : > { %1672 = vadd.xlane.f32.xlu1 %v1567_v31  ;;  %1670 = vadd.xlane.f32.xlu0 %v1566_v42 }
 0x2b5   : > { %v4269_v23 = vsub.f32 %v3567_v53, %v1197_v20  ;;  %v4272_v9 = vsub.f32 %v3569_v58, %v1196_v41  ;;  %v809_v44 = vpop.xlane.xlu1 %808  ;;  %v807_v2 = vpop.xlane.xlu0 %806  ;;  %v1283_v20 = vmul.f32 %v4028_v10, %v4028_v10  ;;  %v1282_v41 = vmul.f32 %v4031_v55, %v4031_v55 }
 0x2b7   : > { %5419 = vst [vmem:[#allocation62_spill] sm:$0xff] %v4269_v23  ;;  %5420 = vst [vmem:[#allocation63_spill] sm:$0xff] %v4272_v9 }
 0x2b8   : > { %1420 = vadd.xlane.f32.xlu1 %v1345_v15  ;;  %1418 = vadd.xlane.f32.xlu0 %v1344_v22 }
 0x2b9   : > { %v873_v53 = vpop.xlane.xlu1 %872  ;;  %v871_v58 = vpop.xlane.xlu0 %870 }
 0x2bc   : > { %1484 = vadd.xlane.f32.xlu1 %v1377_v62  ;;  %1482 = vadd.xlane.f32.xlu0 %v1376_v63  ;;  %v1537_v62 = vsel %vm691_vm0, %v1281_v50, 0.0  ;;  %v1536_v63 = vsel %vm691_vm0, %v1280_v59, 0.0  ;;  %v1347_v50 = vsel %vm691_vm0, 0.0, %v1283_v20  ;;  %v1346_v59 = vsel %vm691_vm0, 0.0, %v1282_v41 }
 0x2bd   : > { %v1001_v32 = vpop.xlane.xlu1 %1000  ;;  %v999_v28 = vpop.xlane.xlu0 %998 }
 0x2be   : > { %v1103_v31 = vsel %vm691_vm0, %v1001_v32, %v809_v44  ;;  %v1102_v42 = vsel %vm691_vm0, %v999_v28, %v807_v2 }
 0x2bf   : > { %v1167_v15 = vmul.f32 0.015625, %v1103_v31  ;;  %v1166_v22 = vmul.f32 0.015625, %v1102_v42 }
 0x2c0   : > { %1612 = vadd.xlane.f32.xlu1 %v1537_v62  ;;  %1610 = vadd.xlane.f32.xlu0 %v1536_v63 }
 0x2c1   : > { %v4305_v44 = vsub.f32 %v3589_v11, %v1167_v15  ;;  %v4308_v2 = vsub.f32 %v3597_v24, %v1166_v22  ;;  %v1065_v32 = vpop.xlane.xlu1 %1064  ;;  %v1063_v28 = vpop.xlane.xlu0 %1062  ;;  %v4320_v24 = vmul.f32 %v4048_v60, %v4048_v60  ;;  %v4324_v15 = vmul.f32 %v4051_v45, %v4051_v45 }
 0x2c2   : > { %v1135_v31 = vsel %vm691_vm0, %v1065_v32, %v873_v53  ;;  %v1134_v42 = vsel %vm691_vm0, %v1063_v28, %v871_v58 }
 0x2c3   : > { %5421 = vst [vmem:[#allocation64_spill] sm:$0xff] %v4305_v44  ;;  %5422 = vst [vmem:[#allocation65_spill] sm:$0xff] %v4308_v2  ;;  %v1199_v62 = vmul.f32 0.015625, %v1135_v31  ;;  %v1198_v11 = vmul.f32 0.015625, %v1134_v42  ;;  %v1379_v32 = vsel %vm691_vm0, 0.0, %v4320_v24  ;;  %v1378_v28 = vsel %vm691_vm0, 0.0, %v4324_v15 }
 0x2c4   : > { %1424 = vadd.xlane.f32.xlu1 %v1347_v50  ;;  %1422 = vadd.xlane.f32.xlu0 %v1346_v59  ;;  %v1539_v50 = vsel %vm691_vm0, %v1283_v20, 0.0  ;;  %v1538_v59 = vsel %vm691_vm0, %v1282_v41, 0.0  ;;  %v4356_v41 = vmul.f32 %v4092_v61, %v4092_v61 }
 0x2c5   : > { %v4327_v53 = vsub.f32 %v3599_v30, %v1199_v62  ;;  %v4330_v58 = vsub.f32 %v3601_v35, %v1198_v11  ;;  %v813_v22 = vpop.xlane.xlu1 %812  ;;  %v811_v63 = vpop.xlane.xlu0 %810  ;;  %v1285_v30 = vmul.f32 %v4074_v8, %v4074_v8  ;;  %v1284_v35 = vmul.f32 %v4077_v40, %v4077_v40 }
 0x2c7   : > { %5423 = vst [vmem:[#allocation66_spill] sm:$0xff] %v4327_v53  ;;  %5424 = vst [vmem:[#allocation67_spill] sm:$0xff] %v4330_v58  ;;  %v1349_v45 = vsel %vm691_vm0, 0.0, %v1285_v30  ;;  %v1348_v60 = vsel %vm691_vm0, 0.0, %v1284_v35 }
 0x2c8   : > { %1488 = vadd.xlane.f32.xlu1 %v1379_v32  ;;  %1486 = vadd.xlane.f32.xlu0 %v1378_v28 }
 0x2c9   : > { %v877_v31 = vpop.xlane.xlu1 %876  ;;  %v875_v42 = vpop.xlane.xlu0 %874 }
 0x2cc   : > { %1616 = vadd.xlane.f32.xlu1 %v1539_v50  ;;  %1614 = vadd.xlane.f32.xlu0 %v1538_v59  ;;  %v4360_v50 = vmul.f32 %v4095_v56, %v4095_v56 }
 0x2cd   : > { %v1005_v62 = vpop.xlane.xlu1 %1004  ;;  %v1003_v11 = vpop.xlane.xlu0 %1002 }
 0x2ce   : > { %v1105_v32 = vsel %vm691_vm0, %v1005_v62, %v813_v22  ;;  %v1104_v28 = vsel %vm691_vm0, %v1003_v11, %v811_v63 }
 0x2cf   : > { %v1169_v20 = vmul.f32 0.015625, %v1105_v32  ;;  %v1168_v49 = vmul.f32 0.015625, %v1104_v28 }
 0x2d0   : > { %1428 = vadd.xlane.f32.xlu1 %v1349_v45  ;;  %1426 = vadd.xlane.f32.xlu0 %v1348_v60  ;;  %v1381_v60 = vsel %vm691_vm0, 0.0, %v4356_v41 }
 0x2d1   : > { %v4363_v22 = vsub.f32 %v3621_v6, %v1169_v20  ;;  %v4366_v63 = vsub.f32 %v3629_v16, %v1168_v49  ;;  %v1069_v59 = vpop.xlane.xlu1 %1068  ;;  %v1067_v62 = vpop.xlane.xlu0 %1066  ;;  %v1380_v6 = vsel %vm691_vm0, 0.0, %v4360_v50  ;;  %v5427_v49 = vld [vmem:[#allocation33_spill] sm:$0xff]  ;;  %v1541_v20 = vsel %vm691_vm0, %v1285_v30, 0.0 }
 0x2d2   : > { %v1137_v11 = vsel %vm691_vm0, %v1069_v59, %v877_v31  ;;  %v1136_v32 = vsel %vm691_vm0, %v1067_v62, %v875_v42  ;;  %v1540_v59 = vsel %vm691_vm0, %v1284_v35, 0.0  ;;  %v1287_v62 = vmul.f32 %v4118_v3, %v4118_v3 }
 0x2d3   : > { %5425 = vst [vmem:[#allocation68_spill] sm:$0xff] %v4363_v22  ;;  %v1201_v28 = vmul.f32 0.015625, %v1137_v11  ;;  %v1200_v61 = vmul.f32 0.015625, %v1136_v32  ;;  %v1286_v11 = vmul.f32 %v4121_v27, %v4121_v27  ;;  %v4398_v30 = vmul.f32 %v4136_v0, %v4136_v0 }
 0x2d4   : > { %1492 = vadd.xlane.f32.xlu1 %v1381_v60  ;;  %1490 = vadd.xlane.f32.xlu0 %v1380_v6  ;;  %v4402_v35 = vmul.f32 %v4139_v14, %v4139_v14 }
 0x2d5   : > { %v4379_v16 = vsub.f32 %v3631_v17, %v1201_v28  ;;  %v4382_v45 = vsub.f32 %v5427_v49, %v1200_v61  ;;  %v817_v31 = vpop.xlane.xlu1 %816  ;;  %v815_v42 = vpop.xlane.xlu0 %814  ;;  %v1351_v61 = vsel %vm691_vm0, 0.0, %v1287_v62  ;;  %v1350_v28 = vsel %vm691_vm0, 0.0, %v1286_v11 }
 0x2d6   : > { %v1383_v0 = vsel %vm691_vm0, 0.0, %v4398_v30  ;;  %v1382_v14 = vsel %vm691_vm0, 0.0, %v4402_v35 }
 0x2d7   : > { %5426 = vst [vmem:[#allocation69_spill] sm:$0xff] %v4379_v16  ;;  %5428 = vst [vmem:[#allocation33_spill] sm:$0xff] %v4382_v45 }
 0x2d8   : > { %1620 = vadd.xlane.f32.xlu1 %v1541_v20  ;;  %1618 = vadd.xlane.f32.xlu0 %v1540_v59 }
 0x2d9   : > { %v881_v17 = vpop.xlane.xlu1 %880  ;;  %v879_v32 = vpop.xlane.xlu0 %878 }
 0x2dc   : > { %1432 = vadd.xlane.f32.xlu1 %v1351_v61  ;;  %1430 = vadd.xlane.f32.xlu0 %v1350_v28  ;;  %v5429_v61 = vld [vmem:[#allocation34_spill] sm:$0xff] }
 0x2dd   : > { %v1009_v60 = vpop.xlane.xlu1 %1008  ;;  %v1007_v6 = vpop.xlane.xlu0 %1006 }
 0x2de   : > { %v1107_v49 = vsel %vm691_vm0, %v1009_v60, %v817_v31  ;;  %v1106_v20 = vsel %vm691_vm0, %v1007_v6, %v815_v42 }
 0x2df   : > { %v1171_v59 = vmul.f32 0.015625, %v1107_v49  ;;  %v1170_v56 = vmul.f32 0.015625, %v1106_v20  ;;  %v1543_v20 = vsel %vm691_vm0, %v1287_v62, 0.0 }
 0x2e0   : > { %1496 = vadd.xlane.f32.xlu1 %v1383_v0  ;;  %1494 = vadd.xlane.f32.xlu0 %v1382_v14  ;;  %v1542_v0 = vsel %vm691_vm0, %v1286_v11, 0.0 }
 0x2e1   : > { %v4415_v28 = vsub.f32 %v5429_v61, %v1171_v59  ;;  %v4418_v31 = vsub.f32 %v5430_v51, %v1170_v56  ;;  %v1073_v60 = vpop.xlane.xlu1 %1072  ;;  %v1071_v42 = vpop.xlane.xlu0 %1070  ;;  %v1289_v51 = vmul.f32 %v4162_v1, %v4162_v1  ;;  %v1288_v56 = vmul.f32 %v4165_v57, %v4165_v57 }
 0x2e2   : > { %v1139_v6 = vsel %vm691_vm0, %v1073_v60, %v881_v17  ;;  %v1138_v49 = vsel %vm691_vm0, %v1071_v42, %v879_v32  ;;  %v5432_v17 = vld [vmem:[#allocation36_spill] sm:$0xff]  ;;  %v5434_v32 = vld [vmem:[#allocation37_spill] sm:$0xff]  ;;  %v1290_v57 = vmul.f32 %v4210_v33, %v4210_v33 }
 0x2e3   : > { %5431 = vst [vmem:[#allocation34_spill] sm:$0xff] %v4418_v31  ;;  %v1203_v14 = vmul.f32 0.015625, %v1139_v6  ;;  %v1202_v59 = vmul.f32 0.015625, %v1138_v49  ;;  %v1353_v11 = vsel %vm691_vm0, 0.0, %v1289_v51  ;;  %v1352_v6 = vsel %vm691_vm0, 0.0, %v1288_v56 }
 0x2e4   : > { %1624 = vadd.xlane.f32.xlu1 %v1543_v20  ;;  %1622 = vadd.xlane.f32.xlu0 %v1542_v0  ;;  %v4444_v49 = vmul.f32 %v4181_v38, %v4181_v38  ;;  %v4448_v20 = vmul.f32 %v4184_v26, %v4184_v26 }
 0x2e5   : > { %v4433_v61 = vsub.f32 %v5432_v17, %v1203_v14  ;;  %v4436_v60 = vsub.f32 %v5434_v32, %v1202_v59  ;;  %v821_v62 = vpop.xlane.xlu1 %820  ;;  %v819_v42 = vpop.xlane.xlu0 %818 }
 0x2e6   : > { %v1385_v59 = vsel %vm691_vm0, 0.0, %v4444_v49  ;;  %v1384_v17 = vsel %vm691_vm0, 0.0, %v4448_v20 }
 0x2e7   : > { %5433 = vst [vmem:[#allocation35_spill] sm:$0xff] %v4433_v61  ;;  %5435 = vst [vmem:[#allocation36_spill] sm:$0xff] %v4436_v60 }
 0x2e8   : > { %1436 = vadd.xlane.f32.xlu1 %v1353_v11  ;;  %1434 = vadd.xlane.f32.xlu0 %v1352_v6  ;;  %v1291_v6 = vmul.f32 %v4207_v21, %v4207_v21 }
 0x2e9   : > { %v885_v0 = vpop.xlane.xlu1 %884  ;;  %v883_v14 = vpop.xlane.xlu0 %882 }
 0x2ec   : > { %1500 = vadd.xlane.f32.xlu1 %v1385_v59  ;;  %1498 = vadd.xlane.f32.xlu0 %v1384_v17  ;;  %v1545_v59 = vsel %vm691_vm0, %v1289_v51, 0.0  ;;  %v1544_v17 = vsel %vm691_vm0, %v1288_v56, 0.0  ;;  %v1355_v51 = vsel %vm691_vm0, 0.0, %v1291_v6  ;;  %v1354_v56 = vsel %vm691_vm0, 0.0, %v1290_v57 }
 0x2ed   : > { %v1013_v32 = vpop.xlane.xlu1 %1012  ;;  %v1011_v38 = vpop.xlane.xlu0 %1010 }
 0x2ee   : > { %v1109_v26 = vsel %vm691_vm0, %v1013_v32, %v821_v62  ;;  %v1108_v11 = vsel %vm691_vm0, %v1011_v38, %v819_v42  ;;  %v5436_v62 = vld [vmem:[#allocation38_spill] sm:$0xff]  ;;  %v5437_v38 = vld [vmem:[#allocation39_spill] sm:$0xff] }
 0x2ef   : > { %v1173_v1 = vmul.f32 0.015625, %v1109_v26  ;;  %v1172_v27 = vmul.f32 0.015625, %v1108_v11 }
 0x2f0   : > { %1628 = vadd.xlane.f32.xlu1 %v1545_v59  ;;  %1626 = vadd.xlane.f32.xlu0 %v1544_v17  ;;  %v4488_v17 = vmul.f32 %v4228_v13, %v4228_v13 }
 0x2f1   : > { %v4469_v32 = vsub.f32 %v5436_v62, %v1173_v1  ;;  %v4472_v42 = vsub.f32 %v5437_v38, %v1172_v27  ;;  %v1077_v21 = vpop.xlane.xlu1 %1076  ;;  %v1075_v3 = vpop.xlane.xlu0 %1074  ;;  %v4484_v27 = vmul.f32 %v4225_v19, %v4225_v19 }
 0x2f2   : > { %v1141_v26 = vsel %vm691_vm0, %v1077_v21, %v885_v0  ;;  %v1140_v11 = vsel %vm691_vm0, %v1075_v3, %v883_v14  ;;  %v5438_v21 = vld [vmem:[#allocation40_spill] sm:$0xff]  ;;  %v5439_v0 = vld [vmem:[#allocation41_spill] sm:$0xff] }
 0x2f3   : > { %v1205_v59 = vmul.f32 0.015625, %v1141_v26  ;;  %v1204_v1 = vmul.f32 0.015625, %v1140_v11  ;;  %v1387_v26 = vsel %vm691_vm0, 0.0, %v4484_v27  ;;  %v1386_v11 = vsel %vm691_vm0, 0.0, %v4488_v17 }
 0x2f4   : > { %1440 = vadd.xlane.f32.xlu1 %v1355_v51  ;;  %1438 = vadd.xlane.f32.xlu0 %v1354_v56 }
 0x2f5   : > { %v4491_v3 = vsub.f32 %v5438_v21, %v1205_v59  ;;  %v4494_v14 = vsub.f32 %v5439_v0, %v1204_v1  ;;  %v1401_v62 = vpop.xlane.xlu1 %1400  ;;  %v1399_v38 = vpop.xlane.xlu0 %1398  ;;  %v1293_v59 = vmul.f32 %v4251_v34, %v4251_v34  ;;  %v1547_v1 = vsel %vm691_vm0, %v1291_v6, 0.0 }
 0x2f6   : > { %v1546_v21 = vsel %vm691_vm0, %v1290_v57, 0.0  ;;  %v1292_v0 = vmul.f32 %v4254_v5, %v4254_v5  ;;  %v4518_v6 = vmul.f32 %v4269_v23, %v4269_v23 }
 0x2f7   : > { %v1357_v34 = vsel %vm691_vm0, 0.0, %v1293_v59 }
 0x2f8   : > { %1504 = vadd.xlane.f32.xlu1 %v1387_v26  ;;  %1502 = vadd.xlane.f32.xlu0 %v1386_v11 }
 0x2f9   : > { %v1465_v51 = vpop.xlane.xlu1 %1464  ;;  %v1463_v56 = vpop.xlane.xlu0 %1462 }
 0x2fc   : > { %1632 = vadd.xlane.f32.xlu1 %v1547_v1  ;;  %1630 = vadd.xlane.f32.xlu0 %v1546_v21  ;;  %v1356_v1 = vsel %vm691_vm0, 0.0, %v1292_v0  ;;  %v4524_v21 = vmul.f32 %v4272_v9, %v4272_v9 }
 0x2fd   : > { %v1593_v13 = vpop.xlane.xlu1 %1592  ;;  %v1591_v19 = vpop.xlane.xlu0 %1590 }
 0x2fe   : > { %v1719_v26 = vsel %vm691_vm0, %v1593_v13, %v1401_v62  ;;  %v1718_v11 = vsel %vm691_vm0, %v1591_v19, %v1399_v38 }
 0x2ff   : > { %v1783_v57 = vmul.f32 0.015625, %v1719_v26  ;;  %v1782_v33 = vmul.f32 0.015625, %v1718_v11  ;;  %v1389_v11 = vsel %vm691_vm0, 0.0, %v4518_v6 }
 0x300   : > { %1444 = vadd.xlane.f32.xlu1 %v1357_v34  ;;  %1442 = vadd.xlane.f32.xlu0 %v1356_v1  ;;  %v1388_v34 = vsel %vm691_vm0, 0.0, %v4524_v21 }
 0x301   : > { %v1847_v13 = vadd.f32 1e-05, %v1783_v57  ;;  %v1846_v19 = vadd.f32 1e-05, %v1782_v33  ;;  %v1657_v62 = vpop.xlane.xlu1 %1656  ;;  %v1655_v38 = vpop.xlane.xlu0 %1654 }
 0x302   : > { %v1751_v5 = vsel %vm691_vm0, %v1657_v62, %v1465_v51  ;;  %v1750_v26 = vsel %vm691_vm0, %v1655_v38, %v1463_v56  ;;  %v1549_v56 = vsel %vm691_vm0, %v1293_v59, 0.0  ;;  %v1294_v62 = vmul.f32 %v4308_v2, %v4308_v2  ;;  %v5441_v2 = vld [vmem:[#allocation44_spill] sm:$0xff] }
 0x303   : > { %2791 = vrsqrt.f32 %v1847_v13  ;;  %v1815_v23 = vmul.f32 0.015625, %v1751_v5  ;;  %v1814_v9 = vmul.f32 0.015625, %v1750_v26  ;;  %v1548_v13 = vsel %vm691_vm0, %v1292_v0, 0.0 }
 0x304   : > { %2793 = vrsqrt.f32 %v1846_v19  ;;  %1508 = vadd.xlane.f32.xlu1 %v1389_v11  ;;  %1506 = vadd.xlane.f32.xlu0 %v1388_v34  ;;  %v1295_v5 = vmul.f32 %v4305_v44, %v4305_v44  ;;  %v4546_v19 = vmul.f32 %v4327_v53, %v4327_v53  ;;  %v1358_v0 = vsel %vm691_vm0, 0.0, %v1294_v62  ;;  %v4559_v11 = vld [vmem:[%s5240_s2] ss:$0 sm:$0xff]  ;;  %v4576_v53 = vld [vmem:[%s5240_s2 + $0x1] ss:$0 sm:$0xff] }
 0x305   : > { %v1879_v33 = vadd.f32 1e-05, %v1815_v23  ;;  %v1878_v57 = vadd.f32 1e-05, %v1814_v9  ;;  %v1405_v51 = vpop.xlane.xlu1 %1404  ;;  %v1403_v1 = vpop.xlane.xlu0 %1402  ;;  %v4554_v38 = vmul.f32 %v4330_v58, %v4330_v58 }
 0x306   : > { %v1359_v59 = vsel %vm691_vm0, 0.0, %v1295_v5 }
 0x307   : > { %2795 = vrsqrt.f32 %v1879_v33 }
 0x308   : > { %2797 = vrsqrt.f32 %v1878_v57  ;;  %1636 = vadd.xlane.f32.xlu1 %v1549_v56  ;;  %1634 = vadd.xlane.f32.xlu0 %v1548_v13  ;;  %v5440_v56 = vld [vmem:[#allocation42_spill] sm:$0xff] }
 0x309   : > { %v1469_v23 = vpop.xlane.xlu1 %1468  ;;  %v1467_v9 = vpop.xlane.xlu0 %1466 }
 0x30c   : > { %1448 = vadd.xlane.f32.xlu1 %v1359_v59  ;;  %1446 = vadd.xlane.f32.xlu0 %v1358_v0  ;;  %v1391_v0 = vsel %vm691_vm0, 0.0, %v4546_v19 }
 0x30d   : > { %v2792_v26 = vpop.eup %2791  ;;  %v1597_v34 = vpop.xlane.xlu1 %1596 }
 0x30e   : > { %v1595_v33 = vpop.xlane.xlu0 %1594  ;;  %v2794_v57 = vpop.eup %2793  ;;  %v1975_v13 = vmul.f32 %v2792_v26, %v5440_v56  ;;  %v1721_v58 = vsel %vm691_vm0, %v1597_v34, %v1405_v51  ;;  %v1390_v51 = vsel %vm691_vm0, 0.0, %v4554_v38  ;;  %v1550_v34 = vsel %vm691_vm0, %v1294_v62, 0.0 }
 0x30f   : > { %v1720_v59 = vsel %vm691_vm0, %v1595_v33, %v1403_v1  ;;  %v1974_v44 = vmul.f32 %v2794_v57, %v5441_v2  ;;  %v1785_v40 = vmul.f32 0.015625, %v1721_v58  ;;  %v1551_v1 = vsel %vm691_vm0, %v1295_v5, 0.0 }
 0x310   : > { %v1784_v8 = vmul.f32 0.015625, %v1720_v59  ;;  %v2043_v26 = vmul.f32 %v4559_v11, %v1975_v13  ;;  %1512 = vadd.xlane.f32.xlu1 %v1391_v0  ;;  %1510 = vadd.xlane.f32.xlu0 %v1390_v51  ;;  %v1297_v33 = vmul.f32 %v4363_v22, %v4363_v22  ;;  %v1296_v13 = vmul.f32 %v4366_v63, %v4366_v63  ;;  %v5442_v51 = vld [vmem:[#allocation43_spill] sm:$0xff] }
 0x311   : > { %v2796_v2 = vpop.eup %2795  ;;  %v2042_v58 = vmul.f32 %v4559_v11, %v1974_v44  ;;  %v1849_v57 = vadd.f32 1e-05, %v1785_v40  ;;  %v1661_v59 = vpop.xlane.xlu1 %1660  ;;  %v5443_v40 = vld [vmem:[#allocation45_spill] sm:$0xff] }
 0x312   : > { %v1848_v56 = vadd.f32 1e-05, %v1784_v8  ;;  %v1659_v55 = vpop.xlane.xlu0 %1658  ;;  %v2798_v0 = vpop.eup %2797  ;;  %v2111_v5 = vadd.f32 %v4576_v53, %v2043_v26  ;;  %v2007_v10 = vmul.f32 %v2796_v2, %v5442_v51  ;;  %v1753_v62 = vsel %vm691_vm0, %v1661_v59, %v1469_v23 }
 0x313   : > { %v1752_v22 = vsel %vm691_vm0, %v1659_v55, %v1467_v9  ;;  %v2110_v44 = vadd.f32 %v4576_v53, %v2042_v58  ;;  %v2006_v8 = vmul.f32 %v2798_v0, %v5443_v40  ;;  %2799 = vrsqrt.f32 %v1849_v57 }
 0x314   : > { %v1817_v47 = vmul.f32 0.015625, %v1753_v62  ;;  %2175 = vst [vmem:[%s4601_s24 + $0x8] sm:$0xff] %v2111_v5  ;;  %v2075_v26 = vmul.f32 %v4559_v11, %v2007_v10  ;;  %2801 = vrsqrt.f32 %v1848_v56  ;;  %v1816_v2 = vmul.f32 0.015625, %v1752_v22  ;;  %1640 = vadd.xlane.f32.xlu1 %v1551_v1  ;;  %1638 = vadd.xlane.f32.xlu0 %v1550_v34 }
 0x315   : > { %2174 = vst [vmem:[%s4601_s24] sm:$0xff] %v2110_v44  ;;  %v2074_v55 = vmul.f32 %v4559_v11, %v2006_v8  ;;  %v1409_v9 = vpop.xlane.xlu1 %1408  ;;  %v1361_v0 = vsel %vm691_vm0, 0.0, %v1297_v33  ;;  %v1360_v10 = vsel %vm691_vm0, 0.0, %v1296_v13  ;;  %v4615_v1 = vmul.f32 %v4379_v16, %v4379_v16 }
 0x316   : > { %v1881_v23 = vadd.f32 1e-05, %v1817_v47  ;;  %v1407_v58 = vpop.xlane.xlu0 %1406  ;;  %v2143_v57 = vadd.f32 %v4576_v53, %v2075_v26  ;;  %v1880_v59 = vadd.f32 1e-05, %v1816_v2  ;;  %v4619_v47 = vmul.f32 %v4382_v45, %v4382_v45 }
 0x317   : > { %v2142_v22 = vadd.f32 %v4576_v53, %v2074_v55  ;;  %v1393_v5 = vsel %vm691_vm0, 0.0, %v4615_v1  ;;  %v1299_v62 = vmul.f32 %v4415_v28, %v4415_v28  ;;  %v1298_v44 = vmul.f32 %v4418_v31, %v4418_v31  ;;  %v5444_v55 = vld [vmem:[#allocation46_spill] sm:$0xff] }
 0x318   : > { %2803 = vrsqrt.f32 %v1881_v23  ;;  %2207 = vst [vmem:[%s4601_s24 + $0x108] sm:$0xff] %v2143_v57  ;;  %1452 = vadd.xlane.f32.xlu1 %v1361_v0  ;;  %1450 = vadd.xlane.f32.xlu0 %v1360_v10  ;;  %v1392_v51 = vsel %vm691_vm0, 0.0, %v4619_v47  ;;  %v1553_v0 = vsel %vm691_vm0, %v1297_v33, 0.0  ;;  %v5445_v10 = vld [vmem:[#allocation49_spill] sm:$0xff]  ;;  %v1552_v45 = vsel %vm691_vm0, %v1296_v13, 0.0 }
 0x319   : > { %2805 = vrsqrt.f32 %v1880_v59  ;;  %2206 = vst [vmem:[%s4601_s24 + $0x100] sm:$0xff] %v2142_v22  ;;  %v1473_v34 = vpop.xlane.xlu1 %1472  ;;  %v4650_v33 = vmul.f32 %v4433_v61, %v4433_v61 }
 0x31a   : > { %v1471_v56 = vpop.xlane.xlu0 %1470 }
 0x31c   : > { %1516 = vadd.xlane.f32.xlu1 %v1393_v5  ;;  %1514 = vadd.xlane.f32.xlu0 %v1392_v51 }
 0x31d   : > { %v2800_v40 = vpop.eup %2799  ;;  %v1601_v8 = vpop.xlane.xlu1 %1600 }
 0x31e   : > { %v1599_v26 = vpop.xlane.xlu0 %1598  ;;  %v2802_v2 = vpop.eup %2801  ;;  %v1977_v23 = vmul.f32 %v2800_v40, %v5444_v55  ;;  %v1723_v57 = vsel %vm691_vm0, %v1601_v8, %v1409_v9  ;;  %v1363_v9 = vsel %vm691_vm0, 0.0, %v1299_v62 }
 0x31f   : > { %v1722_v59 = vsel %vm691_vm0, %v1599_v26, %v1407_v58  ;;  %v1976_v22 = vmul.f32 %v2802_v2, %v5445_v10  ;;  %v1787_v5 = vmul.f32 0.015625, %v1723_v57  ;;  %v1362_v58 = vsel %vm691_vm0, 0.0, %v1298_v44 }
 0x320   : > { %v1786_v51 = vmul.f32 0.015625, %v1722_v59  ;;  %v2045_v16 = vmul.f32 %v4559_v11, %v1977_v23  ;;  %1644 = vadd.xlane.f32.xlu1 %v1553_v0  ;;  %1642 = vadd.xlane.f32.xlu0 %v1552_v45  ;;  %v4655_v45 = vmul.f32 %v4436_v60, %v4436_v60  ;;  %v5446_v59 = vld [vmem:[#allocation47_spill] sm:$0xff] }
 0x321   : > { %v2044_v8 = vmul.f32 %v4559_v11, %v1976_v22  ;;  %v1851_v26 = vadd.f32 1e-05, %v1787_v5  ;;  %v1665_v2 = vpop.xlane.xlu1 %1664 }
 0x322   : > { %v2804_v40 = vpop.eup %2803  ;;  %v1850_v13 = vadd.f32 1e-05, %v1786_v51  ;;  %v1663_v55 = vpop.xlane.xlu0 %1662  ;;  %v2113_v57 = vadd.f32 %v4576_v53, %v2045_v16  ;;  %v1755_v10 = vsel %vm691_vm0, %v1665_v2, %v1473_v34  ;;  %v5447_v51 = vld [vmem:[#allocation48_spill] sm:$0xff] }
 0x323   : > { %v2806_v23 = vpop.eup %2805  ;;  %v2009_v0 = vmul.f32 %v2804_v40, %v5446_v59  ;;  %v1754_v22 = vsel %vm691_vm0, %v1663_v55, %v1471_v56  ;;  %v2112_v5 = vadd.f32 %v4576_v53, %v2044_v8  ;;  %2807 = vrsqrt.f32 %v1851_v26 }
 0x324   : > { %v2008_v61 = vmul.f32 %v2806_v23, %v5447_v51  ;;  %v1819_v31 = vmul.f32 0.015625, %v1755_v10  ;;  %2177 = vst [vmem:[%s4601_s24 + $0x18] sm:$0xff] %v2113_v57  ;;  %2809 = vrsqrt.f32 %v1850_v13  ;;  %v1818_v16 = vmul.f32 0.015625, %v1754_v22  ;;  %1456 = vadd.xlane.f32.xlu1 %v1363_v9  ;;  %1454 = vadd.xlane.f32.xlu0 %v1362_v58 }
 0x325   : > { %v2077_v60 = vmul.f32 %v4559_v11, %v2009_v0  ;;  %2176 = vst [vmem:[%s4601_s24 + $0x10] sm:$0xff] %v2112_v5  ;;  %v1413_v56 = vpop.xlane.xlu1 %1412  ;;  %v1395_v13 = vsel %vm691_vm0, 0.0, %v4650_v33  ;;  %v1394_v9 = vsel %vm691_vm0, 0.0, %v4655_v45  ;;  %v1555_v58 = vsel %vm691_vm0, %v1299_v62, 0.0 }
 0x326   : > { %v2076_v34 = vmul.f32 %v4559_v11, %v2008_v61  ;;  %v1883_v40 = vadd.f32 1e-05, %v1819_v31  ;;  %v1411_v2 = vpop.xlane.xlu0 %1410  ;;  %v1882_v55 = vadd.f32 1e-05, %v1818_v16  ;;  %v1554_v23 = vsel %vm691_vm0, %v1298_v44, 0.0 }
 0x327   : > { %v2145_v8 = vadd.f32 %v4576_v53, %v2077_v60  ;;  %v1301_v60 = vmul.f32 %v4469_v32, %v4469_v32  ;;  %v1300_v57 = vmul.f32 %v4472_v42, %v4472_v42  ;;  %v4689_v59 = vmul.f32 %v4491_v3, %v4491_v3 }
 0x328   : > { %v2144_v26 = vadd.f32 %v4576_v53, %v2076_v34  ;;  %2811 = vrsqrt.f32 %v1883_v40  ;;  %1520 = vadd.xlane.f32.xlu1 %v1395_v13  ;;  %1518 = vadd.xlane.f32.xlu0 %v1394_v9  ;;  %v4693_v5 = vmul.f32 %v4494_v14, %v4494_v14 }
 0x329   : > { %2209 = vst [vmem:[%s4601_s24 + $0x118] sm:$0xff] %v2145_v8  ;;  %2813 = vrsqrt.f32 %v1882_v55  ;;  %v1477_v31 = vpop.xlane.xlu1 %1476  ;;  %v1365_v34 = vsel %vm691_vm0, 0.0, %v1301_v60 }
 0x32a   : > { %2208 = vst [vmem:[%s4601_s24 + $0x110] sm:$0xff] %v2144_v26  ;;  %v1475_v61 = vpop.xlane.xlu0 %1474  ;;  %v1364_v26 = vsel %vm691_vm0, 0.0, %v1300_v57 }
 0x32c   : > { %1648 = vadd.xlane.f32.xlu1 %v1555_v58  ;;  %1646 = vadd.xlane.f32.xlu0 %v1554_v23 }
 0x32d   : > { %v2808_v0 = vpop.eup %2807  ;;  %v1605_v10 = vpop.xlane.xlu1 %1604 }
 0x32e   : > { %v1603_v22 = vpop.xlane.xlu0 %1602  ;;  %v2810_v62 = vpop.eup %2809  ;;  %v1979_v51 = vmul.f32 %v2808_v0, %v3852_v37  ;;  %v1725_v44 = vsel %vm691_vm0, %v1605_v10, %v1413_v56  ;;  %v1397_v37 = vsel %vm691_vm0, 0.0, %v4689_v59  ;;  %v1396_v0 = vsel %vm691_vm0, 0.0, %v4693_v5 }
 0x32f   : > { %v1724_v16 = vsel %vm691_vm0, %v1603_v22, %v1411_v2  ;;  %v1978_v40 = vmul.f32 %v2810_v62, %v3855_v12  ;;  %v1789_v8 = vmul.f32 0.015625, %v1725_v44  ;;  %v5448_v62 = vld [vmem:[#allocation50_spill] sm:$0xff] }
 0x330   : > { %v1788_v55 = vmul.f32 0.015625, %v1724_v16  ;;  %v2047_v13 = vmul.f32 %v4559_v11, %v1979_v51  ;;  %1460 = vadd.xlane.f32.xlu1 %v1365_v34  ;;  %1458 = vadd.xlane.f32.xlu0 %v1364_v26 }
 0x331   : > { %v2046_v2 = vmul.f32 %v4559_v11, %v1978_v40  ;;  %v1853_v9 = vadd.f32 1e-05, %v1789_v8  ;;  %v1669_v12 = vpop.xlane.xlu1 %1668  ;;  %v5449_v40 = vld [vmem:[#allocation51_spill] sm:$0xff] }
 0x332   : > { %v2812_v56 = vpop.eup %2811  ;;  %v1852_v58 = vadd.f32 1e-05, %v1788_v55  ;;  %v1667_v23 = vpop.xlane.xlu0 %1666  ;;  %v2115_v22 = vadd.f32 %v4576_v53, %v2047_v13  ;;  %v1757_v44 = vsel %vm691_vm0, %v1669_v12, %v1477_v31 }
 0x333   : > { %v2814_v10 = vpop.eup %2813  ;;  %v2011_v51 = vmul.f32 %v2812_v56, %v5448_v62  ;;  %v1756_v16 = vsel %vm691_vm0, %v1667_v23, %v1475_v61  ;;  %v2114_v34 = vadd.f32 %v4576_v53, %v2046_v2  ;;  %2815 = vrsqrt.f32 %v1853_v9 }
 0x334   : > { %v2010_v8 = vmul.f32 %v2814_v10, %v5449_v40  ;;  %v1821_v55 = vmul.f32 0.015625, %v1757_v44  ;;  %2179 = vst [vmem:[%s4601_s24 + $0x28] sm:$0xff] %v2115_v22  ;;  %2817 = vrsqrt.f32 %v1852_v58  ;;  %v1820_v13 = vmul.f32 0.015625, %v1756_v16  ;;  %1524 = vadd.xlane.f32.xlu1 %v1397_v37  ;;  %1522 = vadd.xlane.f32.xlu0 %v1396_v0 }
 0x335   : > { %v2079_v26 = vmul.f32 %v4559_v11, %v2011_v51  ;;  %2178 = vst [vmem:[%s4601_s24 + $0x20] sm:$0xff] %v2114_v34  ;;  %v1417_v61 = vpop.xlane.xlu1 %1416  ;;  %v1557_v10 = vsel %vm691_vm0, %v1301_v60, 0.0  ;;  %v1556_v37 = vsel %vm691_vm0, %v1300_v57, 0.0  ;;  %v1569_v22 = vsel %vm691_vm0, %v4280_v4, 0.0 }
 0x336   : > { %v2078_v31 = vmul.f32 %v4559_v11, %v2010_v8  ;;  %v1885_v56 = vadd.f32 1e-05, %v1821_v55  ;;  %v1415_v12 = vpop.xlane.xlu0 %1414  ;;  %v1884_v23 = vadd.f32 1e-05, %v1820_v13  ;;  %v1568_v62 = vsel %vm691_vm0, %v4284_v18, 0.0 }
 0x337   : > { %v2147_v2 = vadd.f32 %v4576_v53, %v2079_v26  ;;  %v1571_v4 = vsel %vm691_vm0, %v4320_v24, 0.0  ;;  %v1570_v26 = vsel %vm691_vm0, %v4324_v15, 0.0  ;;  %v1573_v13 = vsel %vm691_vm0, %v4356_v41, 0.0 }
 0x338   : > { %v2146_v9 = vadd.f32 %v4576_v53, %v2078_v31  ;;  %2819 = vrsqrt.f32 %v1885_v56  ;;  %1652 = vadd.xlane.f32.xlu1 %v1557_v10  ;;  %1650 = vadd.xlane.f32.xlu0 %v1556_v37  ;;  %v1572_v15 = vsel %vm691_vm0, %v4360_v50, 0.0 }
 0x339   : > { %2211 = vst [vmem:[%s4601_s24 + $0x128] sm:$0xff] %v2147_v2  ;;  %2821 = vrsqrt.f32 %v1884_v23  ;;  %v1481_v58 = vpop.xlane.xlu1 %1480 }
 0x33a   : > { %2210 = vst [vmem:[%s4601_s24 + $0x120] sm:$0xff] %v2146_v9  ;;  %v1479_v0 = vpop.xlane.xlu0 %1478 }
 0x33c   : > { %1676 = vadd.xlane.f32.xlu1 %v1569_v22  ;;  %1674 = vadd.xlane.f32.xlu0 %v1568_v62 }
 0x33d   : > { %v2816_v60 = vpop.eup %2815  ;;  %v1609_v51 = vpop.xlane.xlu1 %1608 }
 0x33e   : > { %v1607_v57 = vpop.xlane.xlu0 %1606  ;;  %v2818_v44 = vpop.eup %2817  ;;  %v1981_v16 = vmul.f32 %v2816_v60, %v3896_v39  ;;  %v1727_v34 = vsel %vm691_vm0, %v1609_v51, %v1417_v61 }
 0x33f   : > { %v1726_v40 = vsel %vm691_vm0, %v1607_v57, %v1415_v12  ;;  %v1980_v18 = vmul.f32 %v2818_v44, %v3899_v29  ;;  %v1791_v8 = vmul.f32 0.015625, %v1727_v34  ;;  %v1574_v34 = vsel %vm691_vm0, %v4402_v35, 0.0 }
 0x340   : > { %v1790_v55 = vmul.f32 0.015625, %v1726_v40  ;;  %v2049_v39 = vmul.f32 %v4559_v11, %v1981_v16  ;;  %1680 = vadd.xlane.f32.xlu1 %v1571_v4  ;;  %1678 = vadd.xlane.f32.xlu0 %v1570_v26  ;;  %v1575_v16 = vsel %vm691_vm0, %v4398_v30, 0.0  ;;  %v1576_v30 = vsel %vm691_vm0, %v4448_v20, 0.0 }
 0x341   : > { %v2048_v24 = vmul.f32 %v4559_v11, %v1980_v18  ;;  %v1855_v56 = vadd.f32 1e-05, %v1791_v8  ;;  %v1673_v61 = vpop.xlane.xlu1 %1672  ;;  %v1577_v18 = vsel %vm691_vm0, %v4444_v49, 0.0  ;;  %v1579_v49 = vsel %vm691_vm0, %v4484_v27, 0.0 }
 0x342   : > { %v2820_v31 = vpop.eup %2819  ;;  %v1854_v29 = vadd.f32 1e-05, %v1790_v55  ;;  %v1671_v12 = vpop.xlane.xlu0 %1670  ;;  %v2117_v23 = vadd.f32 %v4576_v53, %v2049_v39  ;;  %v1759_v41 = vsel %vm691_vm0, %v1673_v61, %v1481_v58 }
 0x343   : > { %v2822_v2 = vpop.eup %2821  ;;  %v2013_v9 = vmul.f32 %v2820_v31, %v3912_v48  ;;  %v1758_v10 = vsel %vm691_vm0, %v1671_v12, %v1479_v0  ;;  %v2116_v37 = vadd.f32 %v4576_v53, %v2048_v24  ;;  %2823 = vrsqrt.f32 %v1855_v56 }
 0x344   : > { %v2012_v22 = vmul.f32 %v2822_v2, %v3915_v36  ;;  %v1823_v62 = vmul.f32 0.015625, %v1759_v41  ;;  %2181 = vst [vmem:[%s4601_s24 + $0x38] sm:$0xff] %v2117_v23  ;;  %2825 = vrsqrt.f32 %v1854_v29  ;;  %v1822_v60 = vmul.f32 0.015625, %v1758_v10  ;;  %1684 = vadd.xlane.f32.xlu1 %v1573_v13  ;;  %1682 = vadd.xlane.f32.xlu0 %v1572_v15 }
 0x345   : > { %v2081_v50 = vmul.f32 %v4559_v11, %v2013_v9  ;;  %2180 = vst [vmem:[%s4601_s24 + $0x30] sm:$0xff] %v2116_v37  ;;  %v1421_v0 = vpop.xlane.xlu1 %1420  ;;  %v1578_v29 = vsel %vm691_vm0, %v4488_v17, 0.0  ;;  %v1581_v17 = vsel %vm691_vm0, %v4518_v6, 0.0 }
 0x346   : > { %v2080_v48 = vmul.f32 %v4559_v11, %v2012_v22  ;;  %v1887_v58 = vadd.f32 1e-05, %v1823_v62  ;;  %v1419_v51 = vpop.xlane.xlu0 %1418  ;;  %v1886_v36 = vadd.f32 1e-05, %v1822_v60  ;;  %v1580_v22 = vsel %vm691_vm0, %v4524_v21, 0.0 }
 0x347   : > { %v2149_v57 = vadd.f32 %v4576_v53, %v2081_v50  ;;  %v1583_v21 = vsel %vm691_vm0, %v4546_v19, 0.0  ;;  %v1585_v19 = vsel %vm691_vm0, %v4615_v1, 0.0  ;;  %v1587_v1 = vsel %vm691_vm0, %v4650_v33, 0.0 }
 0x348   : > { %v2148_v44 = vadd.f32 %v4576_v53, %v2080_v48  ;;  %2827 = vrsqrt.f32 %v1887_v58  ;;  %1688 = vadd.xlane.f32.xlu1 %v1575_v16  ;;  %1686 = vadd.xlane.f32.xlu0 %v1574_v34  ;;  %v1582_v48 = vsel %vm691_vm0, %v4554_v38, 0.0  ;;  %v1584_v38 = vsel %vm691_vm0, %v4619_v47, 0.0 }
 0x349   : > { %2213 = vst [vmem:[%s4601_s24 + $0x138] sm:$0xff] %v2149_v57  ;;  %2829 = vrsqrt.f32 %v1886_v36  ;;  %v4781_v40 = vpop.xlane.xlu1 %1484  ;;  %v1586_v47 = vsel %vm691_vm0, %v4655_v45, 0.0  ;;  %v1588_v45 = vsel %vm691_vm0, %v4693_v5, 0.0 }
 0x34a   : > { %2212 = vst [vmem:[%s4601_s24 + $0x130] sm:$0xff] %v2148_v44  ;;  %v4783_v4 = vpop.xlane.xlu0 %1482 }
 0x34c   : > { %1692 = vadd.xlane.f32.xlu1 %v1577_v18  ;;  %1690 = vadd.xlane.f32.xlu0 %v1576_v30 }
 0x34d   : > { %v2824_v35 = vpop.eup %2823  ;;  %v1613_v8 = vpop.xlane.xlu1 %1612 }
 0x34e   : > { %v1611_v55 = vpop.xlane.xlu0 %1610  ;;  %v2826_v26 = vpop.eup %2825  ;;  %v1983_v39 = vmul.f32 %v2824_v35, %v3940_v46  ;;  %v1729_v13 = vsel %vm691_vm0, %v1613_v8, %v1421_v0 }
 0x34f   : > { %v1728_v31 = vsel %vm691_vm0, %v1611_v55, %v1419_v51  ;;  %v1982_v20 = vmul.f32 %v2826_v26, %v3943_v7  ;;  %v1793_v24 = vmul.f32 0.015625, %v1729_v13  ;;  %v5450_v26 = vld [vmem:[#allocation19_spill] sm:$0xff] }
 0x350   : > { %v1792_v56 = vmul.f32 0.015625, %v1728_v31  ;;  %v2051_v46 = vmul.f32 %v4559_v11, %v1983_v39  ;;  %1696 = vadd.xlane.f32.xlu1 %v1579_v49  ;;  %1694 = vadd.xlane.f32.xlu0 %v1578_v29 }
 0x351   : > { %v2050_v12 = vmul.f32 %v4559_v11, %v1982_v20  ;;  %v1857_v15 = vadd.f32 1e-05, %v1793_v24  ;;  %v1425_v27 = vpop.xlane.xlu1 %1424  ;;  %v1589_v24 = vsel %vm691_vm0, %v4689_v59, 0.0 }
 0x352   : > { %v2828_v61 = vpop.eup %2827  ;;  %v1856_v2 = vadd.f32 1e-05, %v1792_v56  ;;  %v1423_v23 = vpop.xlane.xlu0 %1422  ;;  %v2119_v9 = vadd.f32 %v4576_v53, %v2051_v46 }
 0x353   : > { %v2830_v7 = vpop.eup %2829  ;;  %v2015_v41 = vmul.f32 %v2828_v61, %v3956_v54  ;;  %v2118_v10 = vadd.f32 %v4576_v53, %v2050_v12  ;;  %2831 = vrsqrt.f32 %v1857_v15 }
 0x354   : > { %v2014_v37 = vmul.f32 %v2830_v7, %v3959_v43  ;;  %2183 = vst [vmem:[%s4601_s24 + $0x48] sm:$0xff] %v2119_v9  ;;  %2833 = vrsqrt.f32 %v1856_v2  ;;  %1700 = vadd.xlane.f32.xlu1 %v1581_v17  ;;  %1698 = vadd.xlane.f32.xlu0 %v1580_v22  ;;  %v5451_v9 = vld [vmem:[#allocation21_spill] sm:$0xff]  ;;  %v5452_v17 = vld [vmem:[#allocation23_spill] sm:$0xff] }
 0x355   : > { %v2083_v62 = vmul.f32 %v4559_v11, %v2015_v41  ;;  %2182 = vst [vmem:[%s4601_s24 + $0x40] sm:$0xff] %v2118_v10  ;;  %v4819_v6 = vpop.xlane.xlu1 %1488 }
 0x356   : > { %v2082_v54 = vmul.f32 %v4559_v11, %v2014_v37  ;;  %v4821_v50 = vpop.xlane.xlu0 %1486 }
 0x357   : > { %v2151_v43 = vadd.f32 %v4576_v53, %v2083_v62 }
 0x358   : > { %v2150_v60 = vadd.f32 %v4576_v53, %v2082_v54  ;;  %1704 = vadd.xlane.f32.xlu1 %v1583_v21  ;;  %1702 = vadd.xlane.f32.xlu0 %v1582_v48 }
 0x359   : > { %2215 = vst [vmem:[%s4601_s24 + $0x148] sm:$0xff] %v2151_v43  ;;  %v1617_v58 = vpop.xlane.xlu1 %1616 }
 0x35a   : > { %2214 = vst [vmem:[%s4601_s24 + $0x140] sm:$0xff] %v2150_v60  ;;  %v1615_v0 = vpop.xlane.xlu0 %1614  ;;  %v1731_v51 = vsel %vm691_vm0, %v1617_v58, %v1425_v27 }
 0x35b   : > { %v1730_v57 = vsel %vm691_vm0, %v1615_v0, %v1423_v23  ;;  %v1795_v36 = vmul.f32 0.015625, %v1731_v51 }
 0x35c   : > { %v1794_v44 = vmul.f32 0.015625, %v1730_v57  ;;  %1708 = vadd.xlane.f32.xlu1 %v1585_v19  ;;  %1706 = vadd.xlane.f32.xlu0 %v1584_v38 }
 0x35d   : > { %v2832_v16 = vpop.eup %2831  ;;  %v1859_v34 = vadd.f32 1e-05, %v1795_v36  ;;  %v1429_v30 = vpop.xlane.xlu1 %1428 }
 0x35e   : > { %v1858_v18 = vadd.f32 1e-05, %v1794_v44  ;;  %v1427_v35 = vpop.xlane.xlu0 %1426  ;;  %v2834_v8 = vpop.eup %2833  ;;  %v1985_v55 = vmul.f32 %v2832_v16, %v3984_v52 }
 0x35f   : > { %v1984_v39 = vmul.f32 %v2834_v8, %v5450_v26  ;;  %2835 = vrsqrt.f32 %v1859_v34 }
 0x360   : > { %v2053_v13 = vmul.f32 %v4559_v11, %v1985_v55  ;;  %2837 = vrsqrt.f32 %v1858_v18  ;;  %1712 = vadd.xlane.f32.xlu1 %v1587_v1  ;;  %1710 = vadd.xlane.f32.xlu0 %v1586_v47  ;;  %v5453_v18 = vld [vmem:[#allocation25_spill] sm:$0xff] }
 0x361   : > { %v2052_v52 = vmul.f32 %v4559_v11, %v1984_v39  ;;  %v4853_v31 = vpop.xlane.xlu1 %1492 }
 0x362   : > { %v4855_v49 = vpop.xlane.xlu0 %1490  ;;  %v2121_v20 = vadd.f32 %v4576_v53, %v2053_v13 }
 0x363   : > { %v2120_v33 = vadd.f32 %v4576_v53, %v2052_v52 }
 0x364   : > { %2185 = vst [vmem:[%s4601_s24 + $0x58] sm:$0xff] %v2121_v20  ;;  %1716 = vadd.xlane.f32.xlu1 %v1589_v24  ;;  %1714 = vadd.xlane.f32.xlu0 %v1588_v45 }
 0x365   : > { %2184 = vst [vmem:[%s4601_s24 + $0x50] sm:$0xff] %v2120_v33  ;;  %v1621_v56 = vpop.xlane.xlu1 %1620 }
 0x366   : > { %v1619_v29 = vpop.xlane.xlu0 %1618  ;;  %v1733_v46 = vsel %vm691_vm0, %v1621_v56, %v1429_v30 }
 0x367   : > { %v1732_v61 = vsel %vm691_vm0, %v1619_v29, %v1427_v35  ;;  %v1797_v12 = vmul.f32 0.015625, %v1733_v46  ;;  %v5454_v35 = vld [vmem:[#allocation27_spill] sm:$0xff] }
 0x368   : > { %v1796_v15 = vmul.f32 0.015625, %v1732_v61 }
 0x369   : > { %v2836_v2 = vpop.eup %2835  ;;  %v1861_v59 = vadd.f32 1e-05, %v1797_v12  ;;  %v1433_v5 = vpop.xlane.xlu1 %1432 }
 0x36a   : > { %v1860_v27 = vadd.f32 1e-05, %v1796_v15  ;;  %v1431_v23 = vpop.xlane.xlu0 %1430  ;;  %v2838_v7 = vpop.eup %2837  ;;  %v1987_v41 = vmul.f32 %v2836_v2, %v5451_v9 }
 0x36b   : > { %v1986_v10 = vmul.f32 %v2838_v7, %v5452_v17  ;;  %2839 = vrsqrt.f32 %v1861_v59  ;;  %v5455_v59 = vld [vmem:[#allocation29_spill] sm:$0xff] }
 0x36c   : > { %v2055_v37 = vmul.f32 %v4559_v11, %v1987_v41  ;;  %2841 = vrsqrt.f32 %v1860_v27 }
 0x36d   : > { %v2054_v22 = vmul.f32 %v4559_v11, %v1986_v10  ;;  %v4875_v62 = vpop.xlane.xlu1 %1496 }
 0x36e   : > { %v4877_v54 = vpop.xlane.xlu0 %1494  ;;  %v2123_v43 = vadd.f32 %v4576_v53, %v2055_v37 }
 0x36f   : > { %v2122_v60 = vadd.f32 %v4576_v53, %v2054_v22 }
 0x370   : > { %2187 = vst [vmem:[%s4601_s24 + $0x68] sm:$0xff] %v2123_v43 }
 0x371   : > { %2186 = vst [vmem:[%s4601_s24 + $0x60] sm:$0xff] %v2122_v60  ;;  %v1625_v21 = vpop.xlane.xlu1 %1624 }
 0x372   : > { %v1623_v48 = vpop.xlane.xlu0 %1622  ;;  %v1735_v58 = vsel %vm691_vm0, %v1625_v21, %v1433_v5  ;;  %v5456_v5 = vld [vmem:[#allocation31_spill] sm:$0xff] }
 0x373   : > { %v1734_v0 = vsel %vm691_vm0, %v1623_v48, %v1431_v23  ;;  %v1799_v51 = vmul.f32 0.015625, %v1735_v58 }
 0x374   : > { %v1798_v57 = vmul.f32 0.015625, %v1734_v0 }
 0x375   : > { %v2840_v36 = vpop.eup %2839  ;;  %v1863_v44 = vadd.f32 1e-05, %v1799_v51  ;;  %v1437_v38 = vpop.xlane.xlu1 %1436 }
 0x376   : > { %v1862_v19 = vadd.f32 1e-05, %v1798_v57  ;;  %v1435_v16 = vpop.xlane.xlu0 %1434  ;;  %v2842_v34 = vpop.eup %2841  ;;  %v1989_v30 = vmul.f32 %v2840_v36, %v5453_v18 }
 0x377   : > { %v1988_v8 = vmul.f32 %v2842_v34, %v5454_v35  ;;  %2843 = vrsqrt.f32 %v1863_v44  ;;  %v5458_v34 = vld [vmem:[#allocation53_spill] sm:$0xff] }
 0x378   : > { %v2057_v55 = vmul.f32 %v4559_v11, %v1989_v30  ;;  %2845 = vrsqrt.f32 %v1862_v19 }
 0x379   : > { %v2056_v26 = vmul.f32 %v4559_v11, %v1988_v8  ;;  %v4891_v39 = vpop.xlane.xlu1 %1500 }
 0x37a   : > { %v4893_v1 = vpop.xlane.xlu0 %1498  ;;  %v2125_v47 = vadd.f32 %v4576_v53, %v2057_v55 }
 0x37b   : > { %v2124_v13 = vadd.f32 %v4576_v53, %v2056_v26 }
 0x37c   : > { %2189 = vst [vmem:[%s4601_s24 + $0x78] sm:$0xff] %v2125_v47 }
 0x37d   : > { %2188 = vst [vmem:[%s4601_s24 + $0x70] sm:$0xff] %v2124_v13  ;;  %v1629_v52 = vpop.xlane.xlu1 %1628 }
 0x37e   : > { %v1627_v20 = vpop.xlane.xlu0 %1626  ;;  %v1737_v33 = vsel %vm691_vm0, %v1629_v52, %v1437_v38  ;;  %v5457_v38 = vld [vmem:[#allocation52_spill] sm:$0xff] }
 0x37f   : > { %v1736_v24 = vsel %vm691_vm0, %v1627_v20, %v1435_v16  ;;  %v1801_v45 = vmul.f32 0.015625, %v1737_v33 }
 0x380   : > { %v1800_v56 = vmul.f32 0.015625, %v1736_v24 }
 0x381   : > { %v2844_v29 = vpop.eup %2843  ;;  %v1865_v46 = vadd.f32 1e-05, %v1801_v45  ;;  %v1441_v12 = vpop.xlane.xlu1 %1440 }
 0x382   : > { %v1864_v61 = vadd.f32 1e-05, %v1800_v56  ;;  %v1439_v15 = vpop.xlane.xlu0 %1438  ;;  %v2846_v2 = vpop.eup %2845  ;;  %v1991_v27 = vmul.f32 %v2844_v29, %v5455_v59 }
 0x383   : > { %v1990_v23 = vmul.f32 %v2846_v2, %v5456_v5  ;;  %2847 = vrsqrt.f32 %v1865_v46  ;;  %v5459_v2 = vld [vmem:[#allocation56_spill] sm:$0xff] }
 0x384   : > { %v2059_v7 = vmul.f32 %v4559_v11, %v1991_v27  ;;  %2849 = vrsqrt.f32 %v1864_v61  ;;  %v5460_v27 = vld [vmem:[#allocation57_spill] sm:$0xff] }
 0x385   : > { %v2058_v9 = vmul.f32 %v4559_v11, %v1990_v23  ;;  %v4907_v41 = vpop.xlane.xlu1 %1504 }
 0x386   : > { %v4909_v17 = vpop.xlane.xlu0 %1502  ;;  %v2127_v10 = vadd.f32 %v4576_v53, %v2059_v7 }
 0x387   : > { %v2126_v37 = vadd.f32 %v4576_v53, %v2058_v9 }
 0x388   : > { %2191 = vst [vmem:[%s4601_s24 + $0x88] sm:$0xff] %v2127_v10 }
 0x389   : > { %2190 = vst [vmem:[%s4601_s24 + $0x80] sm:$0xff] %v2126_v37  ;;  %v1633_v22 = vpop.xlane.xlu1 %1632 }
 0x38a   : > { %v1631_v43 = vpop.xlane.xlu0 %1630  ;;  %v1739_v60 = vsel %vm691_vm0, %v1633_v22, %v1441_v12 }
 0x38b   : > { %v1738_v21 = vsel %vm691_vm0, %v1631_v43, %v1439_v15  ;;  %v1803_v48 = vmul.f32 0.015625, %v1739_v60 }
 0x38c   : > { %v1802_v58 = vmul.f32 0.015625, %v1738_v21 }
 0x38d   : > { %v2848_v0 = vpop.eup %2847  ;;  %v1867_v51 = vadd.f32 1e-05, %v1803_v48  ;;  %v1445_v36 = vpop.xlane.xlu1 %1444 }
 0x38e   : > { %v1866_v57 = vadd.f32 1e-05, %v1802_v58  ;;  %v1443_v44 = vpop.xlane.xlu0 %1442  ;;  %v2850_v19 = vpop.eup %2849  ;;  %v1993_v16 = vmul.f32 %v2848_v0, %v5457_v38 }
 0x38f   : > { %v1992_v18 = vmul.f32 %v2850_v19, %v5458_v34  ;;  %2851 = vrsqrt.f32 %v1867_v51 }
 0x390   : > { %v2061_v30 = vmul.f32 %v4559_v11, %v1993_v16  ;;  %2853 = vrsqrt.f32 %v1866_v57  ;;  %v5461_v16 = vld [vmem:[#allocation60_spill] sm:$0xff] }
 0x391   : > { %v2060_v35 = vmul.f32 %v4559_v11, %v1992_v18  ;;  %v4923_v8 = vpop.xlane.xlu1 %1508  ;;  %v5462_v18 = vld [vmem:[#allocation61_spill] sm:$0xff] }
 0x392   : > { %v4925_v55 = vpop.xlane.xlu0 %1506  ;;  %v2129_v26 = vadd.f32 %v4576_v53, %v2061_v30 }
 0x393   : > { %v2128_v47 = vadd.f32 %v4576_v53, %v2060_v35 }
 0x394   : > { %2193 = vst [vmem:[%s4601_s24 + $0x98] sm:$0xff] %v2129_v26 }
 0x395   : > { %2192 = vst [vmem:[%s4601_s24 + $0x90] sm:$0xff] %v2128_v47  ;;  %v1637_v13 = vpop.xlane.xlu1 %1636 }
 0x396   : > { %v1635_v52 = vpop.xlane.xlu0 %1634  ;;  %v1741_v20 = vsel %vm691_vm0, %v1637_v13, %v1445_v36 }
 0x397   : > { %v1740_v33 = vsel %vm691_vm0, %v1635_v52, %v1443_v44  ;;  %v1805_v24 = vmul.f32 0.015625, %v1741_v20 }
 0x398   : > { %v1804_v45 = vmul.f32 0.015625, %v1740_v33 }
 0x399   : > { %v2852_v56 = vpop.eup %2851  ;;  %v1869_v29 = vadd.f32 1e-05, %v1805_v24  ;;  %v1449_v61 = vpop.xlane.xlu1 %1448 }
 0x39a   : > { %v1868_v46 = vadd.f32 1e-05, %v1804_v45  ;;  %v1447_v12 = vpop.xlane.xlu0 %1446  ;;  %v2854_v15 = vpop.eup %2853  ;;  %v1995_v59 = vmul.f32 %v2852_v56, %v5459_v2 }
 0x39b   : > { %v1994_v5 = vmul.f32 %v2854_v15, %v5460_v27  ;;  %2855 = vrsqrt.f32 %v1869_v29 }
 0x39c   : > { %v2063_v23 = vmul.f32 %v4559_v11, %v1995_v59  ;;  %2857 = vrsqrt.f32 %v1868_v46 }
 0x39d   : > { %v2062_v7 = vmul.f32 %v4559_v11, %v1994_v5  ;;  %v4939_v9 = vpop.xlane.xlu1 %1512  ;;  %v5463_v5 = vld [vmem:[#allocation64_spill] sm:$0xff] }
 0x39e   : > { %v4941_v10 = vpop.xlane.xlu0 %1510  ;;  %v2131_v37 = vadd.f32 %v4576_v53, %v2063_v23 }
 0x39f   : > { %v2130_v22 = vadd.f32 %v4576_v53, %v2062_v7  ;;  %v5464_v7 = vld [vmem:[#allocation65_spill] sm:$0xff] }
 0x3a0   : > { %2195 = vst [vmem:[%s4601_s24 + $0xa8] sm:$0xff] %v2131_v37 }
 0x3a1   : > { %2194 = vst [vmem:[%s4601_s24 + $0xa0] sm:$0xff] %v2130_v22  ;;  %v1641_v43 = vpop.xlane.xlu1 %1640 }
 0x3a2   : > { %v1639_v60 = vpop.xlane.xlu0 %1638  ;;  %v1743_v21 = vsel %vm691_vm0, %v1641_v43, %v1449_v61 }
 0x3a3   : > { %v1742_v48 = vsel %vm691_vm0, %v1639_v60, %v1447_v12  ;;  %v1807_v58 = vmul.f32 0.015625, %v1743_v21 }
 0x3a4   : > { %v1806_v0 = vmul.f32 0.015625, %v1742_v48 }
 0x3a5   : > { %v2856_v51 = vpop.eup %2855  ;;  %v1871_v57 = vadd.f32 1e-05, %v1807_v58  ;;  %v1453_v44 = vpop.xlane.xlu1 %1452 }
 0x3a6   : > { %v1870_v36 = vadd.f32 1e-05, %v1806_v0  ;;  %v1451_v19 = vpop.xlane.xlu0 %1450  ;;  %v2858_v38 = vpop.eup %2857  ;;  %v1997_v34 = vmul.f32 %v2856_v51, %v5461_v16 }
 0x3a7   : > { %v1996_v30 = vmul.f32 %v2858_v38, %v5462_v18  ;;  %2859 = vrsqrt.f32 %v1871_v57 }
 0x3a8   : > { %v2065_v35 = vmul.f32 %v4559_v11, %v1997_v34  ;;  %2861 = vrsqrt.f32 %v1870_v36 }
 0x3a9   : > { %v2064_v26 = vmul.f32 %v4559_v11, %v1996_v30  ;;  %v4955_v47 = vpop.xlane.xlu1 %1516  ;;  %v5465_v30 = vld [vmem:[#allocation68_spill] sm:$0xff] }
 0x3aa   : > { %v4957_v13 = vpop.xlane.xlu0 %1514  ;;  %v2133_v52 = vadd.f32 %v4576_v53, %v2065_v35 }
 0x3ab   : > { %v2132_v20 = vadd.f32 %v4576_v53, %v2064_v26 }
 0x3ac   : > { %2197 = vst [vmem:[%s4601_s24 + $0xb8] sm:$0xff] %v2133_v52  ;;  %v4988_v52 = vld [vmem:[%s5240_s2] ss:$0 sm:$0xff] }
 0x3ad   : > { %2196 = vst [vmem:[%s4601_s24 + $0xb0] sm:$0xff] %v2132_v20  ;;  %v1645_v33 = vpop.xlane.xlu1 %1644 }
 0x3ae   : > { %v1643_v24 = vpop.xlane.xlu0 %1642  ;;  %v1745_v45 = vsel %vm691_vm0, %v1645_v33, %v1453_v44 }
 0x3af   : > { %v1744_v56 = vsel %vm691_vm0, %v1643_v24, %v1451_v19  ;;  %v1809_v29 = vmul.f32 0.015625, %v1745_v45 }
 0x3b0   : > { %v1808_v46 = vmul.f32 0.015625, %v1744_v56  ;;  %v4999_v56 = vld [vmem:[%s5240_s2 + $0x1] ss:$0 sm:$0xff] }
 0x3b1   : > { %v2860_v61 = vpop.eup %2859  ;;  %v1873_v12 = vadd.f32 1e-05, %v1809_v29  ;;  %v1457_v2 = vpop.xlane.xlu1 %1456 }
 0x3b2   : > { %v1872_v15 = vadd.f32 1e-05, %v1808_v46  ;;  %v1455_v59 = vpop.xlane.xlu0 %1454  ;;  %v2862_v27 = vpop.eup %2861  ;;  %v1999_v23 = vmul.f32 %v2860_v61, %v5463_v5 }
 0x3b3   : > { %v1998_v37 = vmul.f32 %v2862_v27, %v5464_v7  ;;  %2863 = vrsqrt.f32 %v1873_v12 }
 0x3b4   : > { %v2067_v22 = vmul.f32 %v4559_v11, %v1999_v23  ;;  %2865 = vrsqrt.f32 %v1872_v15 }
 0x3b5   : > { %v2066_v43 = vmul.f32 %v4559_v11, %v1998_v37  ;;  %v4971_v60 = vpop.xlane.xlu1 %1520 }
 0x3b6   : > { %v4973_v21 = vpop.xlane.xlu0 %1518  ;;  %v2135_v48 = vadd.f32 %v4576_v53, %v2067_v22 }
 0x3b7   : > { %v2134_v58 = vadd.f32 %v4576_v53, %v2066_v43 }
 0x3b8   : > { %2199 = vst [vmem:[%s4601_s24 + $0xc8] sm:$0xff] %v2135_v48 }
 0x3b9   : > { %2198 = vst [vmem:[%s4601_s24 + $0xc0] sm:$0xff] %v2134_v58  ;;  %v1649_v0 = vpop.xlane.xlu1 %1648 }
 0x3ba   : > { %v1647_v51 = vpop.xlane.xlu0 %1646  ;;  %v1747_v57 = vsel %vm691_vm0, %v1649_v0, %v1457_v2  ;;  %v5466_v0 = vld [vmem:[#allocation34_spill] sm:$0xff] }
 0x3bb   : > { %v1746_v36 = vsel %vm691_vm0, %v1647_v51, %v1455_v59  ;;  %v1811_v44 = vmul.f32 0.015625, %v1747_v57 }
 0x3bc   : > { %v1810_v11 = vmul.f32 0.015625, %v1746_v36 }
 0x3bd   : > { %v2864_v19 = vpop.eup %2863  ;;  %v1875_v38 = vadd.f32 1e-05, %v1811_v44  ;;  %v1461_v34 = vpop.xlane.xlu1 %1460 }
 0x3be   : > { %v1874_v16 = vadd.f32 1e-05, %v1810_v11  ;;  %v1459_v18 = vpop.xlane.xlu0 %1458  ;;  %v2866_v53 = vpop.eup %2865  ;;  %v2001_v35 = vmul.f32 %v2864_v19, %v5465_v30 }
 0x3bf   : > { %v2000_v26 = vmul.f32 %v2866_v53, %v4366_v63  ;;  %2867 = vrsqrt.f32 %v1875_v38 }
 0x3c0   : > { %v2069_v20 = vmul.f32 %v4988_v52, %v2001_v35  ;;  %2869 = vrsqrt.f32 %v1874_v16 }
 0x3c1   : > { %v2068_v33 = vmul.f32 %v4988_v52, %v2000_v26  ;;  %v4992_v24 = vpop.xlane.xlu1 %1524 }
 0x3c2   : > { %v4994_v45 = vpop.xlane.xlu0 %1522  ;;  %v2137_v63 = vadd.f32 %v4999_v56, %v2069_v20 }
 0x3c3   : > { %v2136_v29 = vadd.f32 %v4999_v56, %v2068_v33 }
 0x3c4   : > { %2201 = vst [vmem:[%s4601_s24 + $0xd8] sm:$0xff] %v2137_v63 }
 0x3c5   : > { %2200 = vst [vmem:[%s4601_s24 + $0xd0] sm:$0xff] %v2136_v29  ;;  %v1653_v46 = vpop.xlane.xlu1 %1652 }
 0x3c6   : > { %v1651_v61 = vpop.xlane.xlu0 %1650  ;;  %v1749_v12 = vsel %vm691_vm0, %v1653_v46, %v1461_v34 }
 0x3c7   : > { %v1748_v15 = vsel %vm691_vm0, %v1651_v61, %v1459_v18  ;;  %v1813_v2 = vmul.f32 0.015625, %v1749_v12 }
 0x3c8   : > { %v1812_v59 = vmul.f32 0.015625, %v1748_v15 }
 0x3c9   : > { %v2868_v27 = vpop.eup %2867  ;;  %v1877_v5 = vadd.f32 1e-05, %v1813_v2  ;;  %v1677_v7 = vpop.xlane.xlu1 %1676 }
 0x3ca   : > { %v1876_v23 = vadd.f32 1e-05, %v1812_v59  ;;  %v1675_v37 = vpop.xlane.xlu0 %1674  ;;  %v2870_v22 = vpop.eup %2869  ;;  %v2003_v43 = vmul.f32 %v2868_v27, %v4415_v28  ;;  %v1761_v48 = vsel %vm691_vm0, %v1677_v7, %v4781_v40 }
 0x3cb   : > { %v1760_v58 = vsel %vm691_vm0, %v1675_v37, %v4783_v4  ;;  %v2002_v51 = vmul.f32 %v2870_v22, %v5466_v0  ;;  %2871 = vrsqrt.f32 %v1877_v5  ;;  %v1825_v57 = vmul.f32 0.015625, %v1761_v48 }
 0x3cc   : > { %v1824_v36 = vmul.f32 0.015625, %v1760_v58  ;;  %v2071_v44 = vmul.f32 %v4988_v52, %v2003_v43  ;;  %2873 = vrsqrt.f32 %v1876_v23 }
 0x3cd   : > { %v2070_v28 = vmul.f32 %v4988_v52, %v2002_v51  ;;  %v1889_v11 = vadd.f32 1e-05, %v1825_v57  ;;  %v1681_v38 = vpop.xlane.xlu1 %1680  ;;  %v5467_v51 = vld [vmem:[#allocation18_spill] sm:$0xff] }
 0x3ce   : > { %v1888_v19 = vadd.f32 1e-05, %v1824_v36  ;;  %v1679_v40 = vpop.xlane.xlu0 %1678  ;;  %v2139_v16 = vadd.f32 %v4999_v56, %v2071_v44  ;;  %v1763_v4 = vsel %vm691_vm0, %v1681_v38, %v4819_v6 }
 0x3cf   : > { %v1762_v34 = vsel %vm691_vm0, %v1679_v40, %v4821_v50  ;;  %v2138_v18 = vadd.f32 %v4999_v56, %v2070_v28  ;;  %2875 = vrsqrt.f32 %v1889_v11  ;;  %v1827_v53 = vmul.f32 0.015625, %v1763_v4  ;;  %v5468_v28 = vld [vmem:[#allocation20_spill] sm:$0xff] }
 0x3d0   : > { %v1826_v30 = vmul.f32 0.015625, %v1762_v34  ;;  %2203 = vst [vmem:[%s4601_s24 + $0xe8] sm:$0xff] %v2139_v16  ;;  %2877 = vrsqrt.f32 %v1888_v19 }
 0x3d1   : > { %2202 = vst [vmem:[%s4601_s24 + $0xe0] sm:$0xff] %v2138_v18  ;;  %v1891_v35 = vadd.f32 1e-05, %v1827_v53  ;;  %v1685_v20 = vpop.xlane.xlu1 %1684 }
 0x3d2   : > { %v1890_v26 = vadd.f32 1e-05, %v1826_v30  ;;  %v1683_v33 = vpop.xlane.xlu0 %1682  ;;  %v1765_v6 = vsel %vm691_vm0, %v1685_v20, %v4853_v31  ;;  %v5469_v30 = vld [vmem:[#allocation22_spill] sm:$0xff] }
 0x3d3   : > { %v1764_v50 = vsel %vm691_vm0, %v1683_v33, %v4855_v49  ;;  %2879 = vrsqrt.f32 %v1891_v35  ;;  %v1829_v63 = vmul.f32 0.015625, %v1765_v6  ;;  %v5470_v6 = vld [vmem:[#allocation24_spill] sm:$0xff] }
 0x3d4   : > { %v1828_v29 = vmul.f32 0.015625, %v1764_v50  ;;  %2881 = vrsqrt.f32 %v1890_v26 }
 0x3d5   : > { %v2872_v46 = vpop.eup %2871  ;;  %v1893_v61 = vadd.f32 1e-05, %v1829_v63  ;;  %v1689_v15 = vpop.xlane.xlu1 %1688 }
 0x3d6   : > { %v1892_v12 = vadd.f32 1e-05, %v1828_v29  ;;  %v1687_v2 = vpop.xlane.xlu0 %1686  ;;  %v2874_v59 = vpop.eup %2873  ;;  %v2005_v27 = vmul.f32 %v2872_v46, %v4469_v32  ;;  %v1767_v31 = vsel %vm691_vm0, %v1689_v15, %v4875_v62 }
 0x3d7   : > { %v1766_v49 = vsel %vm691_vm0, %v1687_v2, %v4877_v54  ;;  %v2004_v5 = vmul.f32 %v2874_v59, %v4472_v42  ;;  %2883 = vrsqrt.f32 %v1893_v61  ;;  %v1831_v23 = vmul.f32 0.015625, %v1767_v31 }
 0x3d8   : > { %v1830_v7 = vmul.f32 0.015625, %v1766_v49  ;;  %v2073_v37 = vmul.f32 %v4988_v52, %v2005_v27  ;;  %2885 = vrsqrt.f32 %v1892_v12  ;;  %v5471_v49 = vld [vmem:[#allocation26_spill] sm:$0xff] }
 0x3d9   : > { %v2876_v22 = vpop.eup %2875  ;;  %v2072_v32 = vmul.f32 %v4988_v52, %v2004_v5  ;;  %v1895_v43 = vadd.f32 1e-05, %v1831_v23  ;;  %v1693_v58 = vpop.xlane.xlu1 %1692 }
 0x3da   : > { %v1894_v48 = vadd.f32 1e-05, %v1830_v7  ;;  %v1691_v62 = vpop.xlane.xlu0 %1690  ;;  %v2878_v0 = vpop.eup %2877  ;;  %v2141_v54 = vadd.f32 %v4999_v56, %v2073_v37  ;;  %v2017_v42 = vmul.f32 %v2876_v22, %v5467_v51  ;;  %v1769_v57 = vsel %vm691_vm0, %v1693_v58, %v4891_v39  ;;  %v5472_v37 = vld [vmem:[#allocation28_spill] sm:$0xff] }
 0x3db   : > { %v1768_v36 = vsel %vm691_vm0, %v1691_v62, %v4893_v1  ;;  %v2140_v44 = vadd.f32 %v4999_v56, %v2072_v32  ;;  %v2016_v11 = vmul.f32 %v2878_v0, %v5468_v28  ;;  %2887 = vrsqrt.f32 %v1895_v43 }
 0x3dc   : > { %v1833_v19 = vmul.f32 0.015625, %v1769_v57  ;;  %2205 = vst [vmem:[%s4601_s24 + $0xf8] sm:$0xff] %v2141_v54  ;;  %v2085_v38 = vmul.f32 %v4988_v52, %v2017_v42  ;;  %2889 = vrsqrt.f32 %v1894_v48  ;;  %v1832_v40 = vmul.f32 0.015625, %v1768_v36  ;;  %v5473_v42 = vld [vmem:[#allocation30_spill] sm:$0xff] }
 0x3dd   : > { %v2880_v16 = vpop.eup %2879  ;;  %2204 = vst [vmem:[%s4601_s24 + $0xf0] sm:$0xff] %v2140_v44  ;;  %v2084_v39 = vmul.f32 %v4988_v52, %v2016_v11  ;;  %v1697_v34 = vpop.xlane.xlu1 %1696  ;;  %v5474_v11 = vld [vmem:[#allocation32_spill] sm:$0xff] }
 0x3de   : > { %v1897_v4 = vadd.f32 1e-05, %v1833_v19  ;;  %v1695_v1 = vpop.xlane.xlu0 %1694  ;;  %v2882_v18 = vpop.eup %2881  ;;  %v2153_v53 = vadd.f32 %v4999_v56, %v2085_v38  ;;  %v2019_v35 = vmul.f32 %v2880_v16, %v5469_v30  ;;  %v1896_v26 = vadd.f32 1e-05, %v1832_v40 }
 0x3df   : > { %v1771_v20 = vsel %vm691_vm0, %v1697_v34, %v4907_v41  ;;  %v2152_v33 = vadd.f32 %v4999_v56, %v2084_v39  ;;  %v2018_v50 = vmul.f32 %v2882_v18, %v5470_v6  ;;  %v1770_v46 = vsel %vm691_vm0, %v1695_v1, %v4909_v17  ;;  %v5476_v6 = vld [vmem:[#allocation55_spill] sm:$0xff] }
 0x3e0   : > { %2891 = vrsqrt.f32 %v1897_v4  ;;  %v1835_v63 = vmul.f32 0.015625, %v1771_v20  ;;  %2217 = vst [vmem:[%s4601_s24 + $0x158] sm:$0xff] %v2153_v53  ;;  %v2087_v29 = vmul.f32 %v4988_v52, %v2019_v35  ;;  %v1834_v15 = vmul.f32 0.015625, %v1770_v46  ;;  %v5475_v35 = vld [vmem:[#allocation54_spill] sm:$0xff] }
 0x3e1   : > { %2893 = vrsqrt.f32 %v1896_v26  ;;  %v2884_v61 = vpop.eup %2883  ;;  %2216 = vst [vmem:[%s4601_s24 + $0x150] sm:$0xff] %v2152_v33  ;;  %v2086_v12 = vmul.f32 %v4988_v52, %v2018_v50  ;;  %v1701_v2 = vpop.xlane.xlu1 %1700 }
 0x3e2   : > { %v1899_v41 = vadd.f32 1e-05, %v1835_v63  ;;  %v1699_v59 = vpop.xlane.xlu0 %1698  ;;  %v2886_v27 = vpop.eup %2885  ;;  %v2155_v31 = vadd.f32 %v4999_v56, %v2087_v29  ;;  %v2021_v5 = vmul.f32 %v2884_v61, %v5471_v49  ;;  %v1773_v23 = vsel %vm691_vm0, %v1701_v2, %v4923_v8 }
 0x3e3   : > { %v1772_v17 = vsel %vm691_vm0, %v1699_v59, %v4925_v55  ;;  %v2154_v7 = vadd.f32 %v4999_v56, %v2086_v12  ;;  %v2020_v22 = vmul.f32 %v2886_v27, %v5472_v37  ;;  %v1898_v32 = vadd.f32 1e-05, %v1834_v15  ;;  %v5477_v27 = vld [vmem:[#allocation58_spill] sm:$0xff] }
 0x3e4   : > { %2895 = vrsqrt.f32 %v1899_v41  ;;  %2219 = vst [vmem:[%s4601_s24 + $0x168] sm:$0xff] %v2155_v31  ;;  %v2089_v43 = vmul.f32 %v4988_v52, %v2021_v5  ;;  %v1837_v48 = vmul.f32 0.015625, %v1773_v23  ;;  %v1836_v58 = vmul.f32 0.015625, %v1772_v17 }
 0x3e5   : > { %v2888_v62 = vpop.eup %2887  ;;  %2218 = vst [vmem:[%s4601_s24 + $0x160] sm:$0xff] %v2154_v7  ;;  %v2088_v8 = vmul.f32 %v4988_v52, %v2020_v22  ;;  %2897 = vrsqrt.f32 %v1898_v32  ;;  %v1705_v0 = vpop.xlane.xlu1 %1704  ;;  %v5478_v22 = vld [vmem:[#allocation59_spill] sm:$0xff] }
 0x3e6   : > { %v1703_v54 = vpop.xlane.xlu0 %1702  ;;  %v2890_v55 = vpop.eup %2889  ;;  %v2157_v51 = vadd.f32 %v4999_v56, %v2089_v43  ;;  %v2023_v57 = vmul.f32 %v2888_v62, %v5473_v42  ;;  %v1901_v36 = vadd.f32 1e-05, %v1837_v48  ;;  %v1900_v44 = vadd.f32 1e-05, %v1836_v58 }
 0x3e7   : > { %v2156_v28 = vadd.f32 %v4999_v56, %v2088_v8  ;;  %v2022_v19 = vmul.f32 %v2890_v55, %v5474_v11  ;;  %v1775_v38 = vsel %vm691_vm0, %v1705_v0, %v4939_v9  ;;  %v1774_v40 = vsel %vm691_vm0, %v1703_v54, %v4941_v10  ;;  %v5480_v11 = vld [vmem:[#allocation63_spill] sm:$0xff] }
 0x3e8   : > { %2221 = vst [vmem:[%s4601_s24 + $0x178] sm:$0xff] %v2157_v51  ;;  %v2091_v16 = vmul.f32 %v4988_v52, %v2023_v57  ;;  %2899 = vrsqrt.f32 %v1901_v36  ;;  %v1839_v39 = vmul.f32 0.015625, %v1775_v38  ;;  %v1838_v4 = vmul.f32 0.015625, %v1774_v40  ;;  %v5479_v51 = vld [vmem:[#allocation62_spill] sm:$0xff] }
 0x3e9   : > { %2220 = vst [vmem:[%s4601_s24 + $0x170] sm:$0xff] %v2156_v28  ;;  %v2090_v1 = vmul.f32 %v4988_v52, %v2022_v19  ;;  %2901 = vrsqrt.f32 %v1900_v44  ;;  %v1709_v18 = vpop.xlane.xlu1 %1708 }
 0x3ea   : > { %v2892_v34 = vpop.eup %2891  ;;  %v1707_v53 = vpop.xlane.xlu0 %1706  ;;  %v2159_v30 = vadd.f32 %v4999_v56, %v2091_v16  ;;  %v1903_v26 = vadd.f32 1e-05, %v1839_v39  ;;  %v1902_v20 = vadd.f32 1e-05, %v1838_v4  ;;  %v1777_v63 = vsel %vm691_vm0, %v1709_v18, %v4955_v47 }
 0x3eb   : > { %v2894_v9 = vpop.eup %2893  ;;  %v2025_v10 = vmul.f32 %v2892_v34, %v5475_v35  ;;  %v2158_v33 = vadd.f32 %v4999_v56, %v2090_v1  ;;  %v1776_v29 = vsel %vm691_vm0, %v1707_v53, %v4957_v13  ;;  %v1841_v61 = vmul.f32 0.015625, %v1777_v63  ;;  %v5481_v34 = vld [vmem:[#allocation66_spill] sm:$0xff]  ;;  %v5482_v53 = vld [vmem:[#allocation67_spill] sm:$0xff]  ;;  %v5484_v63 = vld [vmem:[#allocation33_spill] sm:$0xff] }
 0x3ec   : > { %v2024_v50 = vmul.f32 %v2894_v9, %v5476_v6  ;;  %2223 = vst [vmem:[%s4601_s24 + $0x188] sm:$0xff] %v2159_v30  ;;  %2903 = vrsqrt.f32 %v1903_v26  ;;  %v1840_v12 = vmul.f32 0.015625, %v1776_v29 }
 0x3ed   : > { %v2093_v46 = vmul.f32 %v4988_v52, %v2025_v10  ;;  %2222 = vst [vmem:[%s4601_s24 + $0x180] sm:$0xff] %v2158_v33  ;;  %2905 = vrsqrt.f32 %v1902_v20  ;;  %v1713_v2 = vpop.xlane.xlu1 %1712  ;;  %v1905_v13 = vadd.f32 1e-05, %v1841_v61  ;;  %v5483_v33 = vld [vmem:[#allocation69_spill] sm:$0xff] }
 0x3ee   : > { %v2896_v41 = vpop.eup %2895  ;;  %v2092_v15 = vmul.f32 %v4988_v52, %v2024_v50  ;;  %v1711_v59 = vpop.xlane.xlu0 %1710  ;;  %v1904_v49 = vadd.f32 1e-05, %v1840_v12  ;;  %v1779_v17 = vsel %vm691_vm0, %v1713_v2, %v4971_v60  ;;  %v5485_v2 = vld [vmem:[#allocation35_spill] sm:$0xff] }
 0x3ef   : > { %v2161_v47 = vadd.f32 %v4999_v56, %v2093_v46  ;;  %v2027_v31 = vmul.f32 %v2896_v41, %v5477_v27  ;;  %v2898_v5 = vpop.eup %2897  ;;  %v1778_v7 = vsel %vm691_vm0, %v1711_v59, %v4973_v21  ;;  %2907 = vrsqrt.f32 %v1905_v13  ;;  %v5486_v27 = vld [vmem:[#allocation36_spill] sm:$0xff] }
 0x3f0   : > { %v2160_v23 = vadd.f32 %v4999_v56, %v2092_v15  ;;  %v2026_v32 = vmul.f32 %v2898_v5, %v5478_v22  ;;  %v1843_v43 = vmul.f32 0.015625, %v1779_v17  ;;  %2909 = vrsqrt.f32 %v1904_v49 }
 0x3f1   : > { %2225 = vst [vmem:[%s4601_s24 + $0x198] sm:$0xff] %v2161_v47  ;;  %v2095_v37 = vmul.f32 %v4988_v52, %v2027_v31  ;;  %v1842_v48 = vmul.f32 0.015625, %v1778_v7  ;;  %v1717_v58 = vpop.xlane.xlu1 %1716 }
 0x3f2   : > { %2224 = vst [vmem:[%s4601_s24 + $0x190] sm:$0xff] %v2160_v23  ;;  %v1715_v62 = vpop.xlane.xlu0 %1714  ;;  %v2900_v8 = vpop.eup %2899  ;;  %v2094_v0 = vmul.f32 %v4988_v52, %v2026_v32  ;;  %v1907_v54 = vadd.f32 1e-05, %v1843_v43  ;;  %v1781_v21 = vsel %vm691_vm0, %v1717_v58, %v4992_v24 }
 0x3f3   : > { %v2163_v60 = vadd.f32 %v4999_v56, %v2095_v37  ;;  %v2902_v55 = vpop.eup %2901  ;;  %v2029_v42 = vmul.f32 %v2900_v8, %v5479_v51  ;;  %v1906_v57 = vadd.f32 1e-05, %v1842_v48  ;;  %v1845_v36 = vmul.f32 0.015625, %v1781_v21 }
 0x3f4   : > { %v1780_v44 = vsel %vm691_vm0, %v1715_v62, %v4994_v45  ;;  %v2162_v28 = vadd.f32 %v4999_v56, %v2094_v0  ;;  %v2028_v19 = vmul.f32 %v2902_v55, %v5480_v11  ;;  %2911 = vrsqrt.f32 %v1907_v54 }
 0x3f5   : > { %2227 = vst [vmem:[%s4601_s24 + $0x1a8] sm:$0xff] %v2163_v60  ;;  %v1844_v38 = vmul.f32 0.015625, %v1780_v44  ;;  %v2097_v40 = vmul.f32 %v4988_v52, %v2029_v42  ;;  %2913 = vrsqrt.f32 %v1906_v57  ;;  %v1909_v24 = vadd.f32 1e-05, %v1845_v36 }
 0x3f6   : > { %v2904_v16 = vpop.eup %2903  ;;  %2226 = vst [vmem:[%s4601_s24 + $0x1a0] sm:$0xff] %v2162_v28  ;;  %v2096_v39 = vmul.f32 %v4988_v52, %v2028_v19 }
 0x3f7   : > { %v1908_v4 = vadd.f32 1e-05, %v1844_v38  ;;  %v2906_v25 = vpop.eup %2905  ;;  %v2165_v45 = vadd.f32 %v4999_v56, %v2097_v40  ;;  %v2031_v1 = vmul.f32 %v2904_v16, %v5481_v34  ;;  %2915 = vrsqrt.f32 %v1909_v24 }
 0x3f8   : > { %v2164_v18 = vadd.f32 %v4999_v56, %v2096_v39  ;;  %v2030_v9 = vmul.f32 %v2906_v25, %v5482_v53 }
 0x3f9   : > { %2917 = vrsqrt.f32 %v1908_v4  ;;  %2229 = vst [vmem:[%s4601_s24 + $0x1b8] sm:$0xff] %v2165_v45  ;;  %v2099_v30 = vmul.f32 %v4988_v52, %v2031_v1  ;;  %v2908_v35 = vpop.eup %2907 }
 0x3fa   : > { %2228 = vst [vmem:[%s4601_s24 + $0x1b0] sm:$0xff] %v2164_v18  ;;  %v2098_v10 = vmul.f32 %v4988_v52, %v2030_v9  ;;  %v2910_v26 = vpop.eup %2909  ;;  %v2033_v6 = vmul.f32 %v2908_v35, %v5483_v33 }
 0x3fb   : > { %v2167_v20 = vadd.f32 %v4999_v56, %v2099_v30  ;;  %v2032_v29 = vmul.f32 %v2910_v26, %v5484_v63 }
 0x3fc   : > { %v2166_v50 = vadd.f32 %v4999_v56, %v2098_v10  ;;  %v2101_v46 = vmul.f32 %v4988_v52, %v2033_v6 }
 0x3fd   : > { %2231 = vst [vmem:[%s4601_s24 + $0x1c8] sm:$0xff] %v2167_v20  ;;  %v2100_v12 = vmul.f32 %v4988_v52, %v2032_v29 }
 0x3fe   : > { %v2912_v61 = vpop.eup %2911  ;;  %2230 = vst [vmem:[%s4601_s24 + $0x1c0] sm:$0xff] %v2166_v50  ;;  %v2169_v15 = vadd.f32 %v4999_v56, %v2101_v46 }
 0x3ff   : > { %v2914_v41 = vpop.eup %2913  ;;  %v2035_v59 = vmul.f32 %v2912_v61, %v5485_v2  ;;  %v2168_v47 = vadd.f32 %v4999_v56, %v2100_v12 }
 0x400   : > { %v2034_v31 = vmul.f32 %v2914_v41, %v5486_v27  ;;  %2233 = vst [vmem:[%s4601_s24 + $0x1d8] sm:$0xff] %v2169_v15 }
 0x401   : > { %v2916_v13 = vpop.eup %2915  ;;  %v2103_v49 = vmul.f32 %v4988_v52, %v2035_v59  ;;  %2232 = vst [vmem:[%s4601_s24 + $0x1d0] sm:$0xff] %v2168_v47 }
 0x402   : > { %v2102_v23 = vmul.f32 %v4988_v52, %v2034_v31  ;;  %v2037_v17 = vmul.f32 %v2916_v13, %v4491_v3 }
 0x403   : > { %v2918_v5 = vpop.eup %2917  ;;  %v2171_v7 = vadd.f32 %v4999_v56, %v2103_v49 }
 0x404   : > { %v2036_v37 = vmul.f32 %v2918_v5, %v4494_v14  ;;  %v2170_v22 = vadd.f32 %v4999_v56, %v2102_v23  ;;  %v2105_v32 = vmul.f32 %v4988_v52, %v2037_v17 }
 0x405   : > { %2235 = vst [vmem:[%s4601_s24 + $0x1e8] sm:$0xff] %v2171_v7 }
 0x406   : > { %v2104_v43 = vmul.f32 %v4988_v52, %v2036_v37  ;;  %2234 = vst [vmem:[%s4601_s24 + $0x1e0] sm:$0xff] %v2170_v22  ;;  %v2173_v48 = vadd.f32 %v4999_v56, %v2105_v32 }
 0x408   : > { %v2172_v58 = vadd.f32 %v4999_v56, %v2104_v43  ;;  %2237 = vst [vmem:[%s4601_s24 + $0x1f8] sm:$0xff] %v2173_v48 }
 0x40a   : > { %2236 = vst [vmem:[%s4601_s24 + $0x1f0] sm:$0xff] %v2172_v58 }
 0x40b   : > { %s2400_s10 = sshll.u32 %s3061_s18, 1  ;;  %s2406_s6 = sshll.u32 %s3065_s19, 7 }
 0x40c   : > { %s2252_s5 = sadd.s32 %s2406_s6, %s2400_s10  ;;  %s2271_s29 = sshll.u32 %s4601_s24, 4  ;;  %s2272_s29 = int_to_ptr.vmem [resolvable:$true] %s2271_s29 }
 0x40d   : > { %s2402_s30 = sshll.u32 %s2252_s5, 7  ;;  %s3083_s15 = smov 256  }
 0x40e   : > { %s2254_s25 = scalar_lea.hbm %s5241_s3, %s2402_s30  ;;  %p5487_p4 = scmp.ne.s32.totalorder %s5330_s28, 0 }
 0x40f   : > { %s3084_s26 = smov 512   ;;  %s3085_s23 = smov 2  }
 0x410   : > { %2669 = sst [smem:[#allocation9]] (%p5487_p4), %s3083_s15  ;;  %s3086_s18 = smov 128  }
 0x411   : > { %2670 = sst [smem:[#allocation9 + $0x1]] (%p5487_p4), %s3084_s26  ;;  %s3087_s19 = smov 8  }
 0x412   : > { %2671 = sst [smem:[#allocation9 + $0x2]] (%p5487_p4), %s3085_s23  ;;  %s3088_s24 = smov [#allocation8]  }
 0x413   : > { %2672 = sst [smem:[#allocation9 + $0x3]] (%p5487_p4), %s3086_s18  ;;  %s3089_s8 = smov 0  }
 0x414   : > { %2673 = sst [smem:[#allocation9 + $0x4]] (%p5487_p4), %s3086_s18 }
 0x415   : > { %2674 = sst [smem:[#allocation9 + $0x5]] (%p5487_p4), %s3087_s19 }
 0x416   : > { %2675 = dma.general (%p5487_p4), %s2272_s29, 8192, %s2254_s25, %s2239_s4, %s3088_s24, [#allocation9], %s3089_s8, 0  }
 0x417 PF: > { %s5488_s9 = sld [smem:[#allocation13_spill]]  ;;  %s5489_s20 = sld [smem:[#allocation15_spill]] }
 0x418   : > { %p2692_p7 = scmp.ge.s32.totalorder %s3077_s22, 2 }
 0x41d   : > { %s2299_s12 = sand.u32 1, %s5488_s9   ;;  %p5490_p9 = scmp.ne.s32.totalorder %s5489_s20, 0 }
 0x41e   : > { %s2300_s10 = scalar_lea.sflag [#allocation4], %s2299_s12 }
 0x41f   : > { %p2686_p11 = pnand %p2692_p7, %p5490_p9 }
 0x421   : > { %3032 = dma.done.wait (!%p2686_p11), %s2300_s10, 8192  }
 0x422   : > { %3034 = vsyncadd (!%p2686_p11), %s2300_s10, 4294959104  ;;  %s20_s22 = sadd.s32 1, %s3077_s22   ;;  %s5491_s18 = sld [smem:[#allocation14_spill]] }
 0x423   : > { %p17_p13 = scmp.ge.s32.totalorder %s20_s22, 6   ;;  %s5492_s20 = sld [smem:[#allocation16_spill]] }
 0x424   : > { %s5493_s28 = sld [smem:[#allocation17_spill]]  ;;  %s5494_s12 = smov %s3041_s13 }
 0x425   : > { %s5495_s13 = smov %s3045_s14  ;;  %s5496_s14 = smov %s3250_s1 }
 0x426   : > { %s5497_s15 = smov %s3053_s16  ;;  %s5498_s16 = smov %s3057_s17 }
 0x427   : > { %s5499_s17 = smov %s3245_s7  ;;  %s5500_s19 = smov %s3073_s21 }
 0x428   :  { %19 = sbr.rel (!%p17_p13) target bundleno = 12 (0xc), region = 87 }
 0x42a   : > { %s5501_s21 = smov %s5493_s28 }
 0x42f   :  { %2305 = vsyncpa [#allocation3], 1 }
 0x430   :  { %2307 = vsyncpa [#allocation3 + $0x1], 1 }
 0x431   :  { %2308 = vsyncpa [#allocation6], 1 }
 0x432   :  { %2309 = vsyncpa [#allocation4], 1 }
 0x433   :  { %2311 = vsyncpa [#allocation4 + $0x1], 1 }

</bundles_post_ra>
